<compile_context>
chip_gen: v7x
topology: tpu7x:2x2x1
jax: 0.10.0
libtpu: 0.0.40
codegen_flags: <defaults>
</compile_context>

<pallas_src>
import functools
import math

import jax
import jax.numpy as jnp
import numpy as np
from jax.experimental import pallas as pl
from jax.experimental.pallas import tpu as pltpu

N_CLASSES = 13        # cfg.n_classes (synthetic choice)
BN_EPS = 1e-5
LEAKY = 0.1

_VMEM_TILE_BUDGET = 12 * 1024 * 1024   # double-buffered tile working-set target
_VMEM_LIMIT_BYTES = 32 * 1024 * 1024   # explicit scoped-VMEM limit (safe v5e..v7x)


def _round_up(x, m):
    return ((x + m - 1) // m) * m


# --------------------------------------------------------------------------
# Pallas kernels: fused GEMM   out = act( A @ W + shift )
#   A, W are bf16 (MXU-native); accumulation + epilogue in f32.
#   BN scale is folded into W at init; `shift` carries beta / bias.
# --------------------------------------------------------------------------
def _gemm_single_k_kernel(a_ref, w_ref, shift_ref, o_ref, *, neg_slope):
    y = jnp.dot(a_ref[...], w_ref[...], preferred_element_type=jnp.float32)
    y = y + shift_ref[...]
    if neg_slope is not None:          # 0.0 -> ReLU, 0.1 -> LeakyReLU, None -> linear
        y = jnp.maximum(y, y * neg_slope)
    o_ref[...] = y.astype(o_ref.dtype)


def _gemm_multi_k_kernel(a_ref, w_ref, shift_ref, o_ref, acc_ref, *, neg_slope):
    k = pl.program_id(2)

    @pl.when(k == 0)
    def _init():
        acc_ref[...] = jnp.zeros_like(acc_ref)

    acc_ref[...] += jnp.dot(a_ref[...], w_ref[...],
                            preferred_element_type=jnp.float32)

    @pl.when(k == pl.num_programs(2) - 1)
    def _finish():
        y = acc_ref[...] + shift_ref[...]
        if neg_slope is not None:
            y = jnp.maximum(y, y * neg_slope)
        o_ref[...] = y.astype(o_ref.dtype)


def fused_gemm(A, Wmat, shift, *, neg_slope, out_dtype):
    """act((A @ Wmat) + shift).  A:(M,K) bf16, Wmat:(K,Npad) bf16 (Npad%128==0),
    shift:(N_true,) f32.  Returns (M, N_true)."""
    M, K = A.shape
    Kw, Npad = Wmat.shape
    assert Kw == K and Npad % 128 == 0
    N_true = shift.shape[0]

    # ---- M tiling: full-height MXU tiles (256) once M outgrows a single tile
    Mp16 = _round_up(M, 16)
    tm = Mp16 if Mp16 <= 256 else 256
    Mp = _round_up(M, tm)
    m_tiles = Mp // tm

    # ---- N tiling: lane-dense; keep >=2 parallel blocks when m_tiles == 1
    #      so dual-TensorCore chips (v7x) don't idle a core.
    if m_tiles >= 2:
        tn = 256 if Npad % 256 == 0 else 128
    else:
        if Npad % 256 == 0 and Npad >= 512:
            tn = 256
        elif Npad >= 256:
            tn = 128
        else:
            tn = Npad
    n_tiles = Npad // tn

    # ---- K tiling: as few steps as fit the VMEM budget (usually 1) ----
    out_b = jnp.dtype(out_dtype).itemsize
    fixed = 2 * tm * tn * out_b + tm * tn * 4 + 4 * tn * 4
    tk_cap = max(128, (_VMEM_TILE_BUDGET - fixed) // (4 * (tm + tn)))
    if K <= tk_cap:
        Kpad = _round_up(K, 16)        # bf16 sublane alignment; full-dim block
        tk = Kpad
        k_steps = 1
    else:
        k_steps = -(-K // tk_cap)
        tk = _round_up(-(-K // k_steps), 128)
        Kpad = _round_up(K, tk)
        k_steps = Kpad // tk

    if (Mp, Kpad) != (M, K):
        A = jnp.pad(A, ((0, Mp - M), (0, Kpad - K)))
    if Kpad != K:
        Wmat = jnp.pad(Wmat, ((0, Kpad - K), (0, 0)))
    shift2 = shift if Npad == N_true else jnp.pad(shift, (0, Npad - N_true))
    shift2 = shift2.reshape(1, Npad).astype(jnp.float32)

    if k_steps == 1:
        out = pl.pallas_call(
            functools.partial(_gemm_single_k_kernel, neg_slope=neg_slope),
            out_shape=jax.ShapeDtypeStruct((Mp, Npad), out_dtype),
            grid=(m_tiles, n_tiles),
            in_specs=[
                pl.BlockSpec((tm, Kpad), lambda i, j: (i, 0)),
                pl.BlockSpec((Kpad, tn), lambda i, j: (0, j)),
                pl.BlockSpec((1, tn), lambda i, j: (0, j)),
            ],
            out_specs=pl.BlockSpec((tm, tn), lambda i, j: (i, j)),
            compiler_params=pltpu.CompilerParams(
                dimension_semantics=("parallel", "parallel"),
                vmem_limit_bytes=_VMEM_LIMIT_BYTES),
        )(A, Wmat, shift2)
    else:
        out = pl.pallas_call(
            functools.partial(_gemm_multi_k_kernel, neg_slope=neg_slope),
            out_shape=jax.ShapeDtypeStruct((Mp, Npad), out_dtype),
            grid=(m_tiles, n_tiles, k_steps),
            in_specs=[
                pl.BlockSpec((tm, tk), lambda i, j, k: (i, k)),
                pl.BlockSpec((tk, tn), lambda i, j, k: (k, j)),
                pl.BlockSpec((1, tn), lambda i, j, k: (0, j)),
            ],
            out_specs=pl.BlockSpec((tm, tn), lambda i, j, k: (i, j)),
            scratch_shapes=[pltpu.VMEM((tm, tn), jnp.float32)],
            compiler_params=pltpu.CompilerParams(
                dimension_semantics=("parallel", "parallel", "arbitrary"),
                vmem_limit_bytes=_VMEM_LIMIT_BYTES),
        )(A, Wmat, shift2)

    if Mp == M and Npad == N_true:
        return out
    return out[:M, :N_true]


# --------------------------------------------------------------------------
# Conv2d as im2col + fused Pallas GEMM (weights pre-packed at init)
# --------------------------------------------------------------------------
def _kept_taps(k, d, p, s, Lo, L):
    """Contiguous range of kernel taps whose receptive column touches real data."""
    kept = [t for t in range(k)
            if (Lo - 1) * s + t * d - p >= 0 and t * d - p <= L - 1]
    if not kept:
        kept = list(range(k))
    return kept[0], kept[-1] + 1


# TODO(synk): im2col is still materialized in HBM; fully streaming the NHWC
# tile once per 3x3 conv (overlapping-window tiles need a manual DMA path)
# would remove the remaining ~9x activation read blow-up.
def conv2d(x, wmat4, shift, *, stride=(1, 1), padding=(0, 0), dilation=(1, 1),
           neg_slope=None, out_dtype=jnp.bfloat16):
    # wmat4: (kh, kw, Cin, Npad) bf16, BN scale folded, Cout padded to 128.
    kh, kw, Cin, Npad = wmat4.shape
    B, H, W, C = x.shape
    sh, sw = stride
    ph, pw = padding
    dh, dw = dilation
    Ho = (H + 2 * ph - (dh * (kh - 1) + 1)) // sh + 1
    Wo = (W + 2 * pw - (dw * (kw - 1) + 1)) // sw + 1

    # trace-time pruning of all-padding taps (big K cut for dilated deep layers)
    i0, i1 = _kept_taps(kh, dh, ph, sh, Ho, H)
    j0, j1 = _kept_taps(kw, dw, pw, sw, Wo, W)

    xp = jnp.pad(x, ((0, 0), (ph, ph), (pw, pw), (0, 0))) if (ph or pw) else x
    cols = []
    for i in range(i0, i1):
        for j in range(j0, j1):
            cols.append(xp[:, i * dh: i * dh + (Ho - 1) * sh + 1: sh,
                              j * dw: j * dw + (Wo - 1) * sw + 1: sw, :])
    A = jnp.stack(cols, axis=3).reshape(B * Ho * Wo, (i1 - i0) * (j1 - j0) * C)

    Wsel = wmat4 if (i1 - i0, j1 - j0) == (kh, kw) else wmat4[i0:i1, j0:j1]
    Wmat = Wsel.reshape((i1 - i0) * (j1 - j0) * Cin, Npad)

    Y = fused_gemm(A, Wmat, shift, neg_slope=neg_slope, out_dtype=out_dtype)
    return Y.reshape(B, Ho, Wo, shift.shape[0])


def conv_transpose2d(x, wmat4, shift, *, k, stride, padding, output_padding=0,
                     neg_slope=None, out_dtype=jnp.bfloat16):
    """PyTorch ConvTranspose2d via subpixel (phase) decomposition.

    The s*s sub-kernels (built at init) are stacked along Cout with the phase
    index equal to the output (dh,dw) offset, so ONE stride-1 conv plus ONE
    depth-to-space reshape/transpose and a crop produce the full-resolution
    output (no zero-dilated input, no per-phase slice/stack)."""
    B, Hin, Win, Cin = x.shape
    s, p, op = stride, padding, output_padding
    Th, Tw = wmat4.shape[0], wmat4.shape[1]
    N_true = shift.shape[0]
    Cout = N_true // (s * s)
    Hout = (Hin - 1) * s - 2 * p + k + op
    Wout = (Win - 1) * s - 2 * p + k + op

    # rows/cols of the stride-1 subpixel conv needed to cover [p, p + Hout)
    Uh = -(-(Hout + p) // s)
    Uw = -(-(Wout + p) // s)
    xp = jnp.pad(x, ((0, 0),
                     (Th - 1, max(0, Uh - Hin)),
                     (Tw - 1, max(0, Uw - Win)),
                     (0, 0)))
    y = conv2d(xp, wmat4, shift, stride=(1, 1), padding=(0, 0),
               neg_slope=neg_slope, out_dtype=out_dtype)

    Yh, Yw = y.shape[1], y.shape[2]
    F = y.reshape(B, Yh, Yw, s, s, Cout)
    F = jnp.transpose(F, (0, 1, 3, 2, 4, 5)).reshape(B, Yh * s, Yw * s, Cout)
    return F[:, p:p + Hout, p:p + Wout, :]


def maxpool2(x):
    B, H, W, C = x.shape
    return x.reshape(B, H // 2, 2, W // 2, 2, C).max(axis=(2, 4))


# --------------------------------------------------------------------------
# Parameter init + one-time packing (xavier-normal-style, bias = 0)
# --------------------------------------------------------------------------
class KeyGen:
    def __init__(self, key):
        self.key = key

    def __call__(self):
        self.key, k = jax.random.split(self.key)
        return k


def _xavier(key, shape, fan_in, fan_out):
    std = math.sqrt(2.0 / (fan_in + fan_out))
    return std * jax.random.normal(key, shape, jnp.float32)


def _fold_bn(cout, bn):
    if bn:  # eval-mode fresh-init BN: gamma/sqrt(var+eps), beta - mean*scale
        scale = jnp.full((cout,), 1.0 / math.sqrt(1.0 + BN_EPS), jnp.float32)
    else:
        scale = jnp.ones((cout,), jnp.float32)
    shift = jnp.zeros((cout,), jnp.float32)  # biases zero-initialized
    return scale, shift


def _pack_conv(w, bn):
    # w: (Cout, Cin, kh, kw) torch layout -> (kh, kw, Cin, Npad) bf16,
    # BN scale folded, Cout zero-padded to a multiple of 128 (lane-dense GEMM).
    Cout = w.shape[0]
    scale, shift = _fold_bn(Cout, bn)
    Wp = jnp.transpose(w, (2, 3, 1, 0)) * scale[None, None, None, :]
    Npad = _round_up(Cout, 128)
    if Npad != Cout:
        Wp = jnp.pad(Wp, ((0, 0), (0, 0), (0, 0), (0, Npad - Cout)))
    return dict(wmat=Wp.astype(jnp.bfloat16), shift=shift)


def _pack_deconv(w_t, s, bn):
    # w_t: (Cin, Cout, kH, kW) torch ConvTranspose2d layout.
    # Build the s*s subpixel sub-kernels stacked along Cout, phase-major so the
    # later depth-to-space is a single reshape:
    #   packed[th, tw, cin, (dh*s+dw)*Cout + cout] = w_t[cin, cout,
    #                          dh + (Th-1-th)*s, dw + (Tw-1-tw)*s]  (0 if OOB)
    Cin, Cout, kH, kW = w_t.shape
    Th, Tw = -(-kH // s), -(-kW // s)
    scale, shift = _fold_bn(Cout, bn)
    w_s = w_t * scale[None, :, None, None]

    kh_idx = np.arange(s)[:, None] + (Th - 1 - np.arange(Th))[None, :] * s  # (s,Th)
    vh = kh_idx < kH
    kh_idx = np.where(vh, kh_idx, 0)
    kw_idx = np.arange(s)[:, None] + (Tw - 1 - np.arange(Tw))[None, :] * s  # (s,Tw)
    vw = kw_idx < kW
    kw_idx = np.where(vw, kw_idx, 0)

    sub = w_s[:, :, kh_idx, :][:, :, :, :, kw_idx]          # (Cin,Cout,s,Th,s,Tw)
    mask = vh[:, :, None, None] & vw[None, None, :, :]      # (s,Th,s,Tw)
    sub = sub * jnp.asarray(mask, sub.dtype)[None, None]

    packed = jnp.transpose(sub, (3, 5, 0, 2, 4, 1))          # (Th,Tw,Cin,dh,dw,Cout)
    packed = packed.reshape(Th, Tw, Cin, s * s * Cout)
    N = s * s * Cout
    Npad = _round_up(N, 128)
    if Npad != N:
        packed = jnp.pad(packed, ((0, 0), (0, 0), (0, 0), (0, Npad - N)))
    shift_t = jnp.tile(shift, s * s)
    return dict(wmat=packed.astype(jnp.bfloat16), shift=shift_t)


def init_params(key):
    kg = KeyGen(key)
    p = {}

    def C(name, cin, cout, k, bn):
        kh, kw = k if isinstance(k, tuple) else (k, k)
        w = _xavier(kg(), (cout, cin, kh, kw), cin * kh * kw, cout * kh * kw)
        p[name] = _pack_conv(w, bn)

    def D(name, cin, cout, k, s, bn):
        w = _xavier(kg(), (cin, cout, k, k), cin * k * k, cout * k * k)
        p[name] = _pack_deconv(w, s, bn)

    C('conv1_1', 3, 16, 3, True);    C('conv1_2', 16, 32, 3, True)
    C('conv3_1', 32, 64, 3, True);   C('conv3_2', 64, 32, 1, True);   C('conv3_3', 32, 64, 3, True)
    C('conv4_1', 64, 128, 3, True);  C('conv4_2', 128, 64, 1, True);  C('conv4_3', 64, 128, 3, True)
    C('conv5_1', 128, 256, 3, True); C('conv5_2', 256, 128, 1, True); C('conv5_3', 128, 256, 3, True)
    C('conv5_4', 256, 128, 1, True); C('conv5_5', 128, 256, 3, True)
    C('conv6_1', 256, 512, 3, True); C('conv6_2', 512, 256, 1, True); C('conv6_3', 256, 512, 3, True)
    C('conv6_4', 512, 256, 1, True); C('conv6_5', 256, 512, 3, True)
    C('conv7_1', 512, 512, 3, True); C('conv7_2', 512, 512, 3, True)
    C('reduce1', 768, 128, 3, True)
    D('deconv1', 128, 64, 3, 2, True)
    C('reorg4', 128, 64, 3, False)
    C('reduse2', 128, 64, 3, False)
    C('slice', 64, 64, (9, 1), False)
    C('do_conv1', 64, 64, 1, False)
    D('do_deconvT1', 64, 32, 16, 8, False)
    D('do_deconvT2', 32, 16, 6, 2, False)
    C('do_conv2', 16, N_CLASSES, 3, False)
    return p


# --------------------------------------------------------------------------
# DarkSCNN forward
# --------------------------------------------------------------------------
def forward(params, x_nchw):
    x = jnp.transpose(x_nchw, (0, 2, 3, 1)).astype(jnp.bfloat16)   # NCHW -> NHWC bf16

    def cv(x, name, pad=1, dil=1, act=LEAKY, out_dtype=jnp.bfloat16):
        pp = params[name]
        padding = pad if isinstance(pad, tuple) else (pad, pad)
        return conv2d(x, pp['wmat'], pp['shift'], stride=(1, 1), padding=padding,
                      dilation=(dil, dil), neg_slope=act, out_dtype=out_dtype)

    def dc(x, name, k, s, p, op, act):
        pp = params[name]
        return conv_transpose2d(x, pp['wmat'], pp['shift'], k=k, stride=s,
                                padding=p, output_padding=op, neg_slope=act)

    # conv1
    x = maxpool2(cv(x, 'conv1_1'))
    x = maxpool2(cv(x, 'conv1_2'))
    # conv3
    x = cv(x, 'conv3_1'); x = cv(x, 'conv3_2', pad=0); x = maxpool2(cv(x, 'conv3_3'))
    # conv4
    x = cv(x, 'conv4_1'); x = cv(x, 'conv4_2', pad=0); x_4 = maxpool2(cv(x, 'conv4_3'))
    # conv5
    x = cv(x_4, 'conv5_1'); x = cv(x, 'conv5_2', pad=0); x = cv(x, 'conv5_3')
    x = cv(x, 'conv5_4', pad=0); x_5 = maxpool2(cv(x, 'conv5_5'))
    # conv6 (dilated) + conv7
    # TODO(synk): fuse this tiny-spatial deep chain (conv6_* .. reduce1) into one
    # pallas_call with the activation resident in VMEM to cut ~10 kernel launches.
    x = cv(x_5, 'conv6_1', pad=2, dil=2); x = cv(x, 'conv6_2', pad=0)
    x = cv(x, 'conv6_3', pad=2, dil=2);   x = cv(x, 'conv6_4', pad=0)
    x = cv(x, 'conv6_5')
    x = cv(x, 'conv7_1'); x_7 = cv(x, 'conv7_2')
    # upsample1
    cat_8 = jnp.concatenate([x_5, x_7], axis=-1)          # 256 + 512 = 768 ch
    up1 = cv(cat_8, 'reduce1')
    up1 = dc(up1, 'deconv1', k=3, s=2, p=1, op=1, act=LEAKY)
    # reorg + concat + reduce
    reorg4 = cv(x_4, 'reorg4')
    cat_4 = jnp.concatenate([reorg4, up1], axis=-1)        # 64 + 64 = 128 ch
    x = cv(cat_4, 'reduse2')
    # slicing
    # TODO(synk): original `slicing` (SCNN message-passing) source not provided;
    # approximated with its declared hyperparams as Conv2d(64,64,(9,1),pad=(4,0)) + ReLU.
    x = cv(x, 'slice', pad=(4, 0), act=0.0)
    # deconv_out (plain Sequential -> no activations between layers)
    x = cv(x, 'do_conv1', pad=0, act=None)
    x = dc(x, 'do_deconvT1', k=16, s=8, p=4, op=0, act=None)
    x = dc(x, 'do_deconvT2', k=6, s=2, p=2, op=0, act=None)
    x = cv(x, 'do_conv2', pad=1, act=None, out_dtype=jnp.float32)  # logits in f32
    return jnp.transpose(x, (0, 3, 1, 2))                  # NHWC -> NCHW


if __name__ == "__main__":
    key = jax.random.PRNGKey(0)
    k_params, k_x, k_a, k_w = jax.random.split(key, 4)

    # --- quick standalone check that also exercises the multi-K-step kernel ---
    A = jax.random.normal(k_a, (512, 8192), jnp.float32).astype(jnp.bfloat16)
    Wm = jax.random.normal(k_w, (8192, 256), jnp.float32).astype(jnp.bfloat16)
    sh = jnp.zeros((256,), jnp.float32)
    out_mk = fused_gemm(A, Wm, sh, neg_slope=LEAKY, out_dtype=jnp.float32)
    ref = jnp.dot(A.astype(jnp.float32), Wm.astype(jnp.float32))
    ref = jnp.maximum(ref, ref * LEAKY)
    rel_err = float(jnp.max(jnp.abs(out_mk - ref)) / (jnp.max(jnp.abs(ref)) + 1e-6))
    assert rel_err < 1e-2, rel_err

    # --- full DarkSCNN forward ---
    params = init_params(k_params)
    x = jax.random.normal(k_x, (2, 3, 32, 32), jnp.float32)   # NCHW input

    fwd = jax.jit(forward)
    out = jax.block_until_ready(fwd(params, x))

    assert out.shape == (2, N_CLASSES, 32, 32), out.shape
    assert out.dtype == jnp.float32
    assert bool(jnp.all(jnp.isfinite(out)))
    print("KERNEL_OK")
</pallas_src>

<mosaic_0001>
module attributes {stable_mosaic.version = 11 : i64} {
  func.func @_gemm_multi_k_kernel(%arg0: i32, %arg1: i32, %arg2: i32, %arg3: memref<256x4096xbf16, #tpu.memory_space<vmem>>, %arg4: memref<4096x256xbf16, #tpu.memory_space<vmem>>, %arg5: memref<1x256xf32, #tpu.memory_space<vmem>>, %arg6: memref<256x256xf32, #tpu.memory_space<vmem>>, %arg7: memref<256x256xf32, #tpu.memory_space<vmem>>) attributes {dimension_semantics = [#tpu.dimension_semantics<parallel>, #tpu.dimension_semantics<parallel>, #tpu.dimension_semantics<arbitrary>], iteration_bounds = array<i64: 2, 1, 2>, scalar_prefetch = 0 : i64, scratch_operands = 1 : i64, tpu.core_type = #tpu.core_type<tc>, window_params = [{transform_indices = @transform_0, window_bounds = array<i64: 256, 4096>}, {transform_indices = @transform_1, window_bounds = array<i64: 4096, 256>}, {transform_indices = @transform_2, window_bounds = array<i64: 1, 256>}, {transform_indices = @transform_3, window_bounds = array<i64: 256, 256>}]} {
    %c0_i32 = arith.constant 0 : i32
    %0 = arith.cmpi eq, %arg2, %c0_i32 : i32
    %1 = arith.extui %0 : i1 to i32
    %c0_i32_0 = arith.constant 0 : i32
    %2 = arith.cmpi ne, %1, %c0_i32_0 : i32
    scf.if %2 {
      %cst_9 = arith.constant 0.000000e+00 : f32
      %12 = vector.broadcast %cst_9 : f32 to vector<256x256xf32>
      %c0_10 = arith.constant 0 : index
      %c0_11 = arith.constant 0 : index
      %13 = vector.load %arg7[%c0_10, %c0_11] : memref<256x256xf32, #tpu.memory_space<vmem>>, vector<256x256xf32>
      tpu.vector_store %arg7[%c0_10, %c0_11], %12 {strides = array<i32>} : memref<256x256xf32, #tpu.memory_space<vmem>>, vector<256x256xf32>,
    } else {
    }
    %c0 = arith.constant 0 : index
    %c0_1 = arith.constant 0 : index
    %3 = vector.load %arg7[%c0, %c0_1] : memref<256x256xf32, #tpu.memory_space<vmem>>, vector<256x256xf32>
    %c0_2 = arith.constant 0 : index
    %c0_3 = arith.constant 0 : index
    %4 = vector.load %arg3[%c0_2, %c0_3] : memref<256x4096xbf16, #tpu.memory_space<vmem>>, vector<256x4096xbf16>
    %c0_4 = arith.constant 0 : index
    %c0_5 = arith.constant 0 : index
    %5 = vector.load %arg4[%c0_4, %c0_5] : memref<4096x256xbf16, #tpu.memory_space<vmem>>, vector<4096x256xbf16>
    %cst = arith.constant dense<0.000000e+00> : vector<256x256xf32>
    %6 = tpu.matmul %4, %5, %cst {dimension_numbers = #tpu.dot_dimension_numbers<[1], [0], [0], [1], [0, 0, 1, 1], [], []>} : vector<256x4096xbf16>, vector<4096x256xbf16>, vector<256x256xf32> -> vector<256x256xf32>
    %7 = arith.addf %3, %6 : vector<256x256xf32>
    %c0_6 = arith.constant 0 : index
    %c0_7 = arith.constant 0 : index
    %8 = vector.load %arg7[%c0_6, %c0_7] : memref<256x256xf32, #tpu.memory_space<vmem>>, vector<256x256xf32>
    tpu.vector_store %arg7[%c0_6, %c0_7], %7 {strides = array<i32>} : memref<256x256xf32, #tpu.memory_space<vmem>>, vector<256x256xf32>,
    %c1_i32 = arith.constant 1 : i32
    %9 = arith.cmpi eq, %arg2, %c1_i32 : i32
    %10 = arith.extui %9 : i1 to i32
    %c0_i32_8 = arith.constant 0 : i32
    %11 = arith.cmpi ne, %10, %c0_i32_8 : i32
    scf.if %11 {
      %c0_9 = arith.constant 0 : index
      %c0_10 = arith.constant 0 : index
      %12 = vector.load %arg7[%c0_9, %c0_10] : memref<256x256xf32, #tpu.memory_space<vmem>>, vector<256x256xf32>
      %c0_11 = arith.constant 0 : index
      %c0_12 = arith.constant 0 : index
      %13 = vector.load %arg5[%c0_11, %c0_12] : memref<1x256xf32, #tpu.memory_space<vmem>>, vector<1x256xf32>
      %14 = vector.broadcast %13 : vector<1x256xf32> to vector<256x256xf32>
      %15 = arith.addf %12, %14 : vector<256x256xf32>
      %cst_13 = arith.constant 1.000000e-01 : f32
      %16 = vector.broadcast %cst_13 : f32 to vector<256x256xf32>
      %17 = arith.mulf %15, %16 : vector<256x256xf32>
      %18 = arith.maximumf %15, %17 : vector<256x256xf32>
      %c0_14 = arith.constant 0 : index
      %c0_15 = arith.constant 0 : index
      %19 = vector.load %arg6[%c0_14, %c0_15] : memref<256x256xf32, #tpu.memory_space<vmem>>, vector<256x256xf32>
      tpu.vector_store %arg6[%c0_14, %c0_15], %18 {strides = array<i32>} : memref<256x256xf32, #tpu.memory_space<vmem>>, vector<256x256xf32>,
    } else {
    }
    return
  }
  func.func @transform_0(%arg0: i32, %arg1: i32, %arg2: i32) -> (i32, i32) {
    %c0_i32 = arith.constant 0 : i32
    return %arg0, %arg2 : i32, i32
  }
  func.func @transform_1(%arg0: i32, %arg1: i32, %arg2: i32) -> (i32, i32) {
    %c0_i32 = arith.constant 0 : i32
    return %arg2, %arg1 : i32, i32
  }
  func.func @transform_2(%arg0: i32, %arg1: i32, %arg2: i32) -> (i32, i32) {
    %c0_i32 = arith.constant 0 : i32
    %c0_i32_0 = arith.constant 0 : i32
    return %c0_i32, %arg1 : i32, i32
  }
  func.func @transform_3(%arg0: i32, %arg1: i32, %arg2: i32) -> (i32, i32) {
    %c0_i32 = arith.constant 0 : i32
    return %arg0, %arg1 : i32, i32
  }
}

</mosaic_0001>

<bundles_post_ra>
// kernel: tpu_custom_call.1
= control target key start
LH: loop header
LB: loop body
LE: loop exit
PB: predicated region body
PF: predicated region fallthrough
CT: control target
= control target key end

     0   :  { %s15081_s0 = inlined_call_operand.hbm [shape: bf16[512,8192], index: 0, kind: input, shape index: {}]   ;;  %s15082_s1 = inlined_call_operand.hbm [shape: bf16[8192,256], index: 1, kind: input, shape index: {}]   ;;  %s15083_s2 = inlined_call_operand.hbm [shape: f32[1,256], index: 2, kind: input, shape index: {}]   ;;  %s15084_s3 = inlined_call_operand.hbm [shape: f32[512,256], index: 3, kind: output, shape index: {}]  }
   0x1   :  { %15107 = sst [smem:[#allocation25_spill]] %s15083_s2 }
   0x2   :  { %15108 = sst [smem:[#allocation26_spill]] %s15084_s3 }
   0x3   :  { %8 = vsyncpa [#allocation4], 0 }
   0x4   :  { %10 = vsyncpa [#allocation4 + $0x1], 0 }
   0x5   :  { %11 = vsyncpa [#allocation7], 0 }
   0x6   :  { %13 = vsyncpa [#allocation7 + $0x1], 0 }
   0x7   :  { %14 = vsyncpa [#allocation5], 0 }
   0x8   :  { %16 = vsyncpa [#allocation5 + $0x1], 0  ;;  %s13470_s12 = smov 0   ;;  %s13472_s13 = smov 0  }
   0x9   :  { %s13474_s14 = smov 0   ;;  %s13476_s15 = smov 0  }
   0xa   :  { %s13478_s16 = smov 0   ;;  %s13480_s17 = smov 0  }
   0xb   :  { %s13482_s18 = smov 0   ;;  %s13484_s19 = smov 0  }
   0xc   :  { %s13486_s20 = smov 0   ;;  %s13488_s21 = smov 0  }
   0xd   :  { %s13490_s22 = smov 0   ;;  %s13492_s23 = smov 0  }
   0xe   :  { %s13494_s24 = smov 0   ;;  %s13496_s25 = smov 0  }
   0xf LB: > { %15109 = sst [smem:[#allocation14_spill]] %s13385_s12  ;;  %s13537_s26 = sadd.s32 4294967295, %s13437_s25   ;;  %s13437_s25 = sphi %s13496_s25, %s22_s25   ;;  %s13433_s24 = sphi %s13494_s24, %s15172_s24   ;;  %s13429_s23 = sphi %s13492_s23, %s15171_s23   ;;  %s13425_s22 = sphi %s13490_s22, %s15170_s22   ;;  %s13421_s21 = sphi %s13488_s21, %s15169_s21   ;;  %s13417_s20 = sphi %s13486_s20, %s15168_s20   ;;  %s13413_s19 = sphi %s13484_s19, %s15167_s19   ;;  %s13409_s18 = sphi %s13482_s18, %s15166_s18   ;;  %s13405_s17 = sphi %s13480_s17, %s15165_s17   ;;  %s13401_s16 = sphi %s13478_s16, %s15164_s16   ;;  %s13397_s15 = sphi %s13476_s15, %s15160_s15   ;;  %s13393_s14 = sphi %s13474_s14, %s15163_s14   ;;  %s13389_s13 = sphi %s13472_s13, %s15162_s13   ;;  %s13385_s12 = sphi %s13470_s12, %s15159_s12  }
  0x10   : > { %15110 = sst [smem:[#allocation15_spill]] %s13389_s13  ;;  %s10263_s27 = sadd.s32 4294967294, %s13437_s25  }
  0x11   : > { %15111 = sst [smem:[#allocation16_spill]] %s13401_s16  ;;  %p57_p0 = scmp.ne.s32.totalorder %s13417_s20, %s13413_s19 }
  0x12   : > { %15112 = sst [smem:[#allocation17_spill]] %s13421_s21  ;;  %p58_p1 = scmp.eq.s32.totalorder %s13437_s25, 0 }
  0x13   : > { %15113 = sst [smem:[#allocation18_spill]] %s13425_s22  ;;  %p63_p2 = scmp.ne.s32.totalorder %s13413_s19, %s13409_s18 }
  0x14   : > { %15114 = sst [smem:[#allocation19_spill]] %s13537_s26  ;;  %p15085_p3 = scmp.eq.s32.totalorder %s13537_s26, 0 }
  0x15   : > { %p13547_p4 = por %p58_p1, %p57_p0  ;;  %p85_p5 = scmp.ne.s32.totalorder %s13405_s17, %s13401_s16 }
  0x16   : > { %p13555_p6 = por %p15085_p3, %p63_p2  ;;  %p91_p7 = scmp.ne.s32.totalorder %s13401_s16, %s13397_s15 }
  0x17   : > { %p13560_p8 = por %p85_p5, %p58_p1  ;;  %p142_p10 = scmp.ne.s32.totalorder %s13393_s14, %s13389_s13 }
  0x18   : > { %s15116_s4 = scalar_select %p13555_p6, 1, 0 }
  0x19   : > { %p13567_p9 = por %p91_p7, %p15085_p3  ;;  %p143_p11 = scmp.eq.s32.totalorder %s13537_s26, 3 }
  0x1a   : > { %15117 = sst [smem:[#allocation20_spill]] %s15116_s4  ;;  %p148_p12 = scmp.ne.s32.totalorder %s13389_s13, %s13385_s12 }
  0x1b   : > { %s15119_s7 = scalar_select %p13567_p9, 1, 0 }
  0x1c   : > { %p149_p13 = scmp.eq.s32.totalorder %s10263_s27, 3  ;;  %p10264_p0 = scmp.ge.s32.totalorder %s13437_s25, 1 }
  0x1d   : > { %15120 = sst [smem:[#allocation21_spill]] %s15119_s7  ;;  %p13577_p2 = por %p143_p11, %p142_p10 }
  0x1e   : > { %p156_p1 = scmp.lt.s32.totalorder %s13437_s25, 5  ;;  %p13582_p5 = por %p149_p13, %p148_p12 }
  0x1f   : > { %s15121_s8 = scalar_select %p13577_p2, 1, 0 }
  0x20   : > { %s15123_s9 = scalar_select %p13582_p5, 1, 0 }
  0x21   : > { %15122 = sst [smem:[#allocation22_spill]] %s15121_s8  ;;  %p13586_p7 = pnand %p10264_p0, %p156_p1 }
  0x22   : > { %15124 = sst [smem:[#allocation23_spill]] %s15123_s9  ;;  %s13439_s11 = smov [#allocation8]  }
  0x23   : > { %s15125_s10 = scalar_select %p13586_p7, 1, 0 }
  0x24   : > { %s172_s15 = sshll.u32 %s13439_s11, 4  ;;  %p12288_p3 = pneg %p13586_p7  ;;  %s173_s15 = int_to_ptr.vmem [resolvable:$true] %s172_s15 }
  0x25   : > { %p12304_p9 = scmp.lt.s32.totalorder %s13437_s25, 4  ;;  %p15126_p10 = scmp.eq.s32.totalorder %s13537_s26, 0 }
  0x26   : > { %s15130_s2 = sld [smem:[#allocation25_spill]] }
  0x27   : > { %p13595_p11 = pnand %p12288_p3, %p15126_p10  ;;  %p13601_p12 = pnand %p12304_p9, %p13547_p4 }
  0x28   : > { %p13607_p13 = pnand %p12304_p9, %p13560_p8 }
  0x29   : > { %s15128_s27 = scalar_select %p13601_p12, 1, 0 }
  0x2a   : > { %s15129_s28 = scalar_select %p13607_p13, 1, 0 }
  0x2b   : > { %p13197_p0 = pneg %p13595_p11 }
  0x2c   : > { %s13195_s29 = scalar_lea.hbm %s15130_s2, 32 }
  0x2d   : > { %p13196_p3 = scmp.ne.s32.totalorder %s15130_s2, %s13195_s29  ;;  %p13202_p10 = scmp.lt.u32.totalorder %s13195_s29, %s15130_s2 }
  0x2f   : > { %p13198_p1 = pnand %p13197_p0, %p13196_p3 }
  0x31   : > { %p13199_p4 = pneg %p13198_p1 }
  0x33   : > { %p13204_p8 = pnand %p13202_p10, %p13199_p4 }
  0x35   : > { %13207 = shalt.err (!%p13204_p8)
}
  0x36   : > { %s13208_s5 = scalar_lea.vmem %s173_s15, 32  ;;  %p13216_p6 = scmp.lt.s32.totalorder %s173_s15, %s173_s15 }
  0x37   : > { %p13209_p9 = scmp.ne.s32.totalorder %s173_s15, %s13208_s5  ;;  %p13217_p7 = scmp.lt.s32.totalorder %s13208_s5, %s13208_s5 }
  0x39   : > { %p13211_p5 = pnand %p13209_p9, %p13197_p0  ;;  %p13218_p13 = por %p13217_p7, %p13216_p6 }
  0x3b   : > { %p13212_p2 = pneg %p13211_p5 }
  0x3d   : > { %p13219_p12 = pnand %p13218_p13, %p13212_p2 }
  0x3f   : > { %13222 = shalt.err (!%p13219_p12)
}
  0x40   : > { %12291 = dma.hbm_to_vmem [thread:$0]  (!%p13595_p11), %s15130_s2, 32, %s173_s15, [#allocation7]  }
  0x41   : > { %s41_s3 = sadd.s32 1, %s13433_s24  ;;  %s34_s29 = sadd.s32 1, %s13429_s23 }
  0x42   : > { %s183_s9 = sand.u32 1, %s13417_s20   ;;  %p35_p6 = scmp.ge.s32.totalorder %s34_s29, 2 }
  0x43   : > { %s10267_s11 = sshll.u32 %s183_s9, 12  ;;  %s10269_s18 = sshll.u32 %s13429_s23, 5 }
  0x44   : > { %s15174_s29 = smov (%p35_p6, %s34_s29), 0  ;;  %s15176_s3 = smov (!%p35_p6, %s41_s3), %s13433_s24 }
  0x45   : > { %15131 = sst [smem:[#allocation24_spill]] %s15174_s29  ;;  %s46_s30 = ssub.s32 %s13429_s23, %s15174_s29 }
  0x46   : > { %p43_p2 = scmp.ge.s32.totalorder %s15176_s3, 2  ;;  %p76_p5 = scmp.eq.s32.totalorder %s46_s30, 0 }
  0x47   : > { %s11313_s15 = sshll.u32 %s13433_s24, 11  ;;  %s187_s5 = scalar_lea.vmem [#allocation3], %s10267_s11 }
  0x48   : > { %s197_s12 = sshll.u32 %s187_s5, 4  ;;  %s15178_s3 = smov (%p43_p2, %s15176_s3), 0  ;;  %s13661_s12 = int_to_ptr.vmem [resolvable:$true] %s197_s12 }
  0x49   : > { %s15132_s6 = sadd.s32 1, %s13405_s17  ;;  %s45_s8 = ssub.s32 %s13433_s24, %s15178_s3 }
  0x4a   : > { %s13642_s2 = scalar_select %p76_p5, %s13405_s17, %s15132_s6  }
  0x4b   : > { %s194_s22 = sadd.s32 %s11313_s15, %s10269_s18  ;;  %s47_s21 = sor.u32 %s46_s30, %s45_s8 }
  0x4c   : > { %p130_p7 = scmp.eq.s32.totalorder %s45_s8, 0  ;;  %p48_p11 = scmp.eq.s32.totalorder %s47_s21, 0 }
  0x4d   : > { %s10271_s29 = sshll.u32 %s194_s22, 6  ;;  %s15133_s13 = sadd.s32 1, %s13393_s14 }
  0x4e   : > { %s13649_s7 = scalar_select %p130_p7, %s13393_s14, %s15133_s13  }
  0x4f   : > { %s15134_s16 = sadd.s32 1, %s13417_s20  ;;  %s13659_s4 = scalar_lea.hbm %s15081_s0, %s10271_s29 }
  0x50   : > { %s13654_s11 = scalar_select %p48_p11, %s13417_s20, %s15134_s16  }
  0x51   : > { %s207_s8 = sand.u32 1, %s13437_s25   ;;  %s13664_s21 = scalar_lea.sflag [#allocation4], %s183_s9 }
  0x52   : > { %s13223_s22 = scalar_lea.hbm %s13659_s4, 65536  ;;  %p15135_p13 = scmp.ne.s32.totalorder %s15128_s27, 0 }
  0x53   : > { %p13224_p12 = scmp.ne.s32.totalorder %s13659_s4, %s13223_s22  ;;  %s13228_s26 = scalar_lea.hbm %s15081_s0, 262144 }
  0x54   : > { %p13225_p3 = pneg %p15135_p13  ;;  %p13229_p4 = scmp.lt.u32.totalorder %s13659_s4, %s15081_s0 }
  0x55   : > { %p13230_p10 = scmp.lt.u32.totalorder %s13228_s26, %s13223_s22  ;;  %p13232_p9 = scmp.lt.u32.totalorder %s13223_s22, %s13659_s4 }
  0x56   : > { %p13226_p0 = pnand %p13225_p3, %p13224_p12 }
  0x57   : > { %p13231_p8 = por %p13230_p10, %p13229_p4 }
  0x58   : > { %p13227_p1 = pneg %p13226_p0 }
  0x59   : > { %p13233_p6 = por %p13232_p9, %p13231_p8 }
  0x5b   : > { %p13234_p2 = pnand %p13233_p6, %p13227_p1 }
  0x5d   : > { %13237 = shalt.err (!%p13234_p2)
}
  0x5e   : > { %s13238_s9 = scalar_lea.vmem %s13661_s12, 65536  ;;  %s13440_s30 = smov [#allocation3]  }
  0x5f   : > { %p13239_p5 = scmp.ne.s32.totalorder %s13661_s12, %s13238_s9  ;;  %s13243_s15 = sshll.u32 %s13440_s30, 4  ;;  %s13244_s15 = int_to_ptr.vmem [resolvable:$false] %s13243_s15 }
  0x60   : > { %s13245_s6 = scalar_lea.vmem %s13244_s15, 131072  ;;  %p13246_p12 = scmp.lt.s32.totalorder %s13661_s12, %s13244_s15 }
  0x61   : > { %p13241_p7 = pnand %p13239_p5, %p13225_p3  ;;  %p13247_p0 = scmp.lt.s32.totalorder %s13245_s6, %s13238_s9 }
  0x63   : > { %p13242_p11 = pneg %p13241_p7  ;;  %p13248_p4 = por %p13247_p0, %p13246_p12 }
  0x65   : > { %p13249_p10 = pnand %p13248_p4, %p13242_p11 }
  0x67   : > { %13252 = shalt.err (!%p13249_p10)
}
  0x68   : > { %s13441_s5 = smov 4096   ;;  %s13442_s22 = smov 2048  }
  0x69   : > { %s13443_s13 = smov 128   ;;  %s209_s16 = sand.u32 1, %s13405_s17  }
  0x6a   : > { %12295 = dma.hbm_to_vmem [thread:$0]  (!%p15135_p13), %s13659_s4, 65536, %s13661_s12, %s13664_s21, %s13441_s5, %s13442_s22, %s13443_s13  }
  0x6b   : > { %s10272_s26 = sshll.u32 %s209_s16, 12  ;;  %s11315_s29 = sshll.u32 %s13429_s23, 16 }
  0x6c   : > { %s13698_s30 = scalar_lea.hbm %s15082_s1, %s11315_s29  ;;  %s211_s15 = scalar_lea.vmem [#allocation6], %s10272_s26 }
  0x6d   : > { %s221_s6 = sshll.u32 %s211_s15, 4  ;;  %s13704_s27 = scalar_lea.sflag [#allocation7], %s207_s8  ;;  %s13700_s6 = int_to_ptr.vmem [resolvable:$true] %s221_s6 }
  0x6e   : > { %s13253_s4 = scalar_lea.hbm %s13698_s30, 65536  ;;  %p15136_p3 = scmp.ne.s32.totalorder %s15129_s28, 0 }
  0x6f   : > { %p13254_p13 = scmp.ne.s32.totalorder %s13698_s30, %s13253_s4  ;;  %s13258_s5 = scalar_lea.hbm %s15082_s1, 131072 }
  0x70   : > { %p13255_p1 = pneg %p15136_p3  ;;  %p13259_p6 = scmp.lt.u32.totalorder %s13698_s30, %s15082_s1 }
  0x71   : > { %p13260_p2 = scmp.lt.u32.totalorder %s13258_s5, %s13253_s4  ;;  %p13262_p7 = scmp.lt.u32.totalorder %s13253_s4, %s13698_s30 }
  0x72   : > { %p13256_p8 = pnand %p13255_p1, %p13254_p13 }
  0x73   : > { %p13261_p5 = por %p13260_p2, %p13259_p6 }
  0x74   : > { %p13257_p9 = pneg %p13256_p8 }
  0x75   : > { %p13263_p11 = por %p13262_p7, %p13261_p5 }
  0x77   : > { %p13264_p12 = pnand %p13263_p11, %p13257_p9 }
  0x79   : > { %13267 = shalt.err (!%p13264_p12)
}
  0x7a   : > { %s13268_s8 = scalar_lea.vmem %s13700_s6, 65536  ;;  %s13444_s26 = smov [#allocation6]  }
  0x7b   : > { %p13269_p0 = scmp.ne.s32.totalorder %s13700_s6, %s13268_s8  ;;  %s13273_s29 = sshll.u32 %s13444_s26, 4  ;;  %s13274_s29 = int_to_ptr.vmem [resolvable:$false] %s13273_s29 }
  0x7c   : > { %s13275_s18 = scalar_lea.vmem %s13274_s29, 131072  ;;  %p13276_p13 = scmp.lt.s32.totalorder %s13700_s6, %s13274_s29 }
  0x7d   : > { %p13271_p4 = pnand %p13269_p0, %p13255_p1  ;;  %p13277_p8 = scmp.lt.s32.totalorder %s13275_s18, %s13268_s8 }
  0x7f   : > { %p13272_p10 = pneg %p13271_p4  ;;  %p13278_p6 = por %p13277_p8, %p13276_p13 }
  0x81   : > { %p13279_p2 = pnand %p13278_p6, %p13272_p10 }
  0x83   : > { %13282 = shalt.err (!%p13279_p2)
}
  0x84   : > { %s13445_s9 = smov 8   ;;  %p15137_p1 = scmp.ne.s32.totalorder %s15125_s10, 0 }
  0x85   : > { %12298 = dma.hbm_to_vmem [thread:$0]  (!%p15136_p3), %s13698_s30, 65536, %s13700_s6, %s13704_s27, %s13443_s13, %s13443_s13, %s13445_s9  }
  0x86   : > { %233 = sbr.rel (%p15137_p1) target bundleno = 1568 (0x620), region = 32  ;;  %s15138_s15 = sld [smem:[#allocation20_spill]] (!%p15137_p1) }
  0x87   : > { %s235_s4 = sand.u32 (!%p15137_p1), 1, %s13413_s19  }
  0x88   : > { %s10277_s12 = sshll.u32 (!%p15137_p1), %s235_s4, 12  ;;  %s236_s21 = scalar_lea.sflag (!%p15137_p1), [#allocation4], %s235_s4 }
  0x89   : > { %s13737_s5 = scalar_lea.vmem (!%p15137_p1), [#allocation3], %s10277_s12 }
  0x8c   : > { %p15139_p9 = scmp.ne.s32.totalorder (!%p15137_p1), %s15138_s15, 0 }
  0x8e   : > { %13368 = dma.done.wait (%p15139_p9), %s236_s21, 65536  }
  0x8f   : > { %13370 = vsyncadd (%p15139_p9), %s236_s21, 4294901760  ;;  %s15140_s28 = sld [smem:[#allocation19_spill]]  ;;  %s15141_s22 = sld [smem:[#allocation16_spill]] }
  0x90   : > { %s15142_s16 = sld [smem:[#allocation21_spill]] }
  0x95   : > { %s244_s8 = sand.u32 1, %s15140_s28   ;;  %s246_s13 = sand.u32 1, %s15141_s22  }
  0x96   : > { %s10278_s30 = sshll.u32 %s246_s13, 12  ;;  %s245_s10 = scalar_lea.sflag [#allocation7], %s244_s8 }
  0x97   : > { %s13745_s6 = scalar_lea.vmem [#allocation6], %s10278_s30  ;;  %p15143_p3 = scmp.ne.s32.totalorder %s15142_s16, 0 }
  0x99   : > { %13372 = dma.done.wait (%p15143_p3), %s245_s10, 65536  }
  0x9a   : > { %13374 = vsyncadd (%p15143_p3), %s245_s10, 4294901760  ;;  %p15144_p5 = scmp.eq.s32.totalorder %s15140_s28, 0 }
  0x9c   : > { %13376 = dma.done.wait (%p15144_p5), [#allocation7], 32   ;;  %p15145_p7 = pmov %p15144_p5 }
  0x9d   : > { %s15146_s27 = sld [smem:[#allocation15_spill]]  ;;  %s15147_s9 = sld [smem:[#allocation17_spill]] }
  0x9e   : > { %13378 = vsyncadd (%p15145_p7), [#allocation7], 4294967264 }
  0xa3   : > { %s277_s26 = sand.u32 1, %s15146_s27   ;;  %p10281_p11 = scmp.ne.s32.totalorder %s15147_s9, 0 }
  0xa4   : > { %s10280_s29 = sshll.u32 %s277_s26, 9  ;;  %v13446_v0 = vmov (!%p10281_p11), 0.0  }
  0xa5   : > { %s13758_s18 = scalar_lea.vmem [#allocation9], %s10280_s29  ;;  %290 = sbr.rel (%p10281_p11) target bundleno = 197 (0xc5), region = 48  ;;  %291 = vst [vmem:[#allocation2] sm:$0xff] (!%p10281_p11), %v13446_v0  ;;  %292 = vst [vmem:[#allocation2 + $0x8] sm:$0xff] (!%p10281_p11), %v13446_v0 }
  0xa6   : > { %293 = vst [vmem:[#allocation2 + $0x10] sm:$0xff] (!%p10281_p11), %v13446_v0  ;;  %294 = vst [vmem:[#allocation2 + $0x18] sm:$0xff] (!%p10281_p11), %v13446_v0 }
  0xa7   : > { %295 = vst [vmem:[#allocation2 + $0x20] sm:$0xff] (!%p10281_p11), %v13446_v0  ;;  %296 = vst [vmem:[#allocation2 + $0x28] sm:$0xff] (!%p10281_p11), %v13446_v0 }
  0xa8   : > { %297 = vst [vmem:[#allocation2 + $0x30] sm:$0xff] (!%p10281_p11), %v13446_v0  ;;  %298 = vst [vmem:[#allocation2 + $0x38] sm:$0xff] (!%p10281_p11), %v13446_v0 }
  0xa9   : > { %299 = vst [vmem:[#allocation2 + $0x40] sm:$0xff] (!%p10281_p11), %v13446_v0  ;;  %300 = vst [vmem:[#allocation2 + $0x48] sm:$0xff] (!%p10281_p11), %v13446_v0 }
  0xaa   : > { %301 = vst [vmem:[#allocation2 + $0x50] sm:$0xff] (!%p10281_p11), %v13446_v0  ;;  %302 = vst [vmem:[#allocation2 + $0x58] sm:$0xff] (!%p10281_p11), %v13446_v0 }
  0xab   : > { %303 = vst [vmem:[#allocation2 + $0x60] sm:$0xff] (!%p10281_p11), %v13446_v0  ;;  %304 = vst [vmem:[#allocation2 + $0x68] sm:$0xff] (!%p10281_p11), %v13446_v0 }
  0xac   : > { %305 = vst [vmem:[#allocation2 + $0x70] sm:$0xff] %v13446_v0  ;;  %306 = vst [vmem:[#allocation2 + $0x78] sm:$0xff] %v13446_v0 }
  0xad   : > { %307 = vst [vmem:[#allocation2 + $0x80] sm:$0xff] %v13446_v0  ;;  %308 = vst [vmem:[#allocation2 + $0x88] sm:$0xff] %v13446_v0 }
  0xae   : > { %309 = vst [vmem:[#allocation2 + $0x90] sm:$0xff] %v13446_v0  ;;  %310 = vst [vmem:[#allocation2 + $0x98] sm:$0xff] %v13446_v0 }
  0xaf   : > { %311 = vst [vmem:[#allocation2 + $0xa0] sm:$0xff] %v13446_v0  ;;  %312 = vst [vmem:[#allocation2 + $0xa8] sm:$0xff] %v13446_v0 }
  0xb0   : > { %313 = vst [vmem:[#allocation2 + $0xb0] sm:$0xff] %v13446_v0  ;;  %314 = vst [vmem:[#allocation2 + $0xb8] sm:$0xff] %v13446_v0 }
  0xb1   : > { %315 = vst [vmem:[#allocation2 + $0xc0] sm:$0xff] %v13446_v0  ;;  %316 = vst [vmem:[#allocation2 + $0xc8] sm:$0xff] %v13446_v0 }
  0xb2   : > { %317 = vst [vmem:[#allocation2 + $0xd0] sm:$0xff] %v13446_v0  ;;  %318 = vst [vmem:[#allocation2 + $0xd8] sm:$0xff] %v13446_v0 }
  0xb3   : > { %319 = vst [vmem:[#allocation2 + $0xe0] sm:$0xff] %v13446_v0  ;;  %320 = vst [vmem:[#allocation2 + $0xe8] sm:$0xff] %v13446_v0 }
  0xb4   : > { %321 = vst [vmem:[#allocation2 + $0xf0] sm:$0xff] %v13446_v0  ;;  %322 = vst [vmem:[#allocation2 + $0xf8] sm:$0xff] %v13446_v0 }
  0xb5   : > { %323 = vst [vmem:[#allocation2 + $0x100] sm:$0xff] %v13446_v0  ;;  %324 = vst [vmem:[#allocation2 + $0x108] sm:$0xff] %v13446_v0 }
  0xb6   : > { %325 = vst [vmem:[#allocation2 + $0x110] sm:$0xff] %v13446_v0  ;;  %326 = vst [vmem:[#allocation2 + $0x118] sm:$0xff] %v13446_v0 }
  0xb7   : > { %327 = vst [vmem:[#allocation2 + $0x120] sm:$0xff] %v13446_v0  ;;  %328 = vst [vmem:[#allocation2 + $0x128] sm:$0xff] %v13446_v0 }
  0xb8   : > { %329 = vst [vmem:[#allocation2 + $0x130] sm:$0xff] %v13446_v0  ;;  %330 = vst [vmem:[#allocation2 + $0x138] sm:$0xff] %v13446_v0 }
  0xb9   : > { %331 = vst [vmem:[#allocation2 + $0x140] sm:$0xff] %v13446_v0  ;;  %332 = vst [vmem:[#allocation2 + $0x148] sm:$0xff] %v13446_v0 }
  0xba   : > { %333 = vst [vmem:[#allocation2 + $0x150] sm:$0xff] %v13446_v0  ;;  %334 = vst [vmem:[#allocation2 + $0x158] sm:$0xff] %v13446_v0 }
  0xbb   : > { %335 = vst [vmem:[#allocation2 + $0x160] sm:$0xff] %v13446_v0  ;;  %336 = vst [vmem:[#allocation2 + $0x168] sm:$0xff] %v13446_v0 }
  0xbc   : > { %337 = vst [vmem:[#allocation2 + $0x170] sm:$0xff] %v13446_v0  ;;  %338 = vst [vmem:[#allocation2 + $0x178] sm:$0xff] %v13446_v0 }
  0xbd   : > { %339 = vst [vmem:[#allocation2 + $0x180] sm:$0xff] %v13446_v0  ;;  %340 = vst [vmem:[#allocation2 + $0x188] sm:$0xff] %v13446_v0 }
  0xbe   : > { %341 = vst [vmem:[#allocation2 + $0x190] sm:$0xff] %v13446_v0  ;;  %342 = vst [vmem:[#allocation2 + $0x198] sm:$0xff] %v13446_v0 }
  0xbf   : > { %343 = vst [vmem:[#allocation2 + $0x1a0] sm:$0xff] %v13446_v0  ;;  %344 = vst [vmem:[#allocation2 + $0x1a8] sm:$0xff] %v13446_v0 }
  0xc0   : > { %345 = vst [vmem:[#allocation2 + $0x1b0] sm:$0xff] %v13446_v0  ;;  %346 = vst [vmem:[#allocation2 + $0x1b8] sm:$0xff] %v13446_v0 }
  0xc1   : > { %347 = vst [vmem:[#allocation2 + $0x1c0] sm:$0xff] %v13446_v0  ;;  %348 = vst [vmem:[#allocation2 + $0x1c8] sm:$0xff] %v13446_v0 }
  0xc2   : > { %349 = vst [vmem:[#allocation2 + $0x1d0] sm:$0xff] %v13446_v0  ;;  %350 = vst [vmem:[#allocation2 + $0x1d8] sm:$0xff] %v13446_v0 }
  0xc3   : > { %351 = vst [vmem:[#allocation2 + $0x1e0] sm:$0xff] %v13446_v0  ;;  %352 = vst [vmem:[#allocation2 + $0x1e8] sm:$0xff] %v13446_v0 }
  0xc4   : > { %353 = vst [vmem:[#allocation2 + $0x1f0] sm:$0xff] %v13446_v0  ;;  %354 = vst [vmem:[#allocation2 + $0x1f8] sm:$0xff] %v13446_v0 }
  0xc5 PF: > { %v12427_v1 = vld [vmem:[%s13745_s6 + $0x4] ss:$8 sps:$4 sm:$0xff]   ;;  %v12431_v3 = vld [vmem:[%s13745_s6] ss:$8 sps:$4 sm:$0xff]   ;;  %v12433_v5 = vld [vmem:[%s13745_s6 + $0x14] ss:$8 sps:$4 sm:$0xff]  }
  0xc6   : > { %v12429_v2 = vld [vmem:[%s13745_s6 + $0x804] ss:$8 sps:$4 sm:$0xff]   ;;  %6563 = vmatprep.subr.bf16.mxu1 %v12427_v1  ;;  %v12432_v4 = vld [vmem:[%s13745_s6 + $0x800] ss:$8 sps:$4 sm:$0xff]   ;;  %v12435_v6 = vld [vmem:[%s13745_s6 + $0x814] ss:$8 sps:$4 sm:$0xff]  }
  0xc7   : > { %8107 = vmatprep.subr.bf16.mxu0 %v12429_v2  ;;  %6564 = vmatpush1.bf16.msra.mxu1 %v12431_v3  ;;  %v12437_v7 = vld [vmem:[%s13745_s6 + $0x10] ss:$8 sps:$4 sm:$0xff]   ;;  %v12439_v9 = vld [vmem:[%s13745_s6 + $0x24] ss:$8 sps:$4 sm:$0xff]   ;;  %v12443_v11 = vld [vmem:[%s13745_s6 + $0x20] ss:$8 sps:$4 sm:$0xff]  }
  0xc8   : > { %8108 = vmatpush1.bf16.msra.mxu0 %v12432_v4  ;;  %6565 = vmatprep.subr.bf16.mxu1 %v12433_v5  ;;  %v12438_v8 = vld [vmem:[%s13745_s6 + $0x810] ss:$8 sps:$4 sm:$0xff]   ;;  %v12441_v10 = vld [vmem:[%s13745_s6 + $0x824] ss:$8 sps:$4 sm:$0xff]   ;;  %v12444_v12 = vld [vmem:[%s13745_s6 + $0x820] ss:$8 sps:$4 sm:$0xff]  }
  0xc9   : > { %8109 = vmatprep.subr.bf16.mxu0 %v12435_v6  ;;  %v12445_v13 = vld [vmem:[%s13745_s6 + $0x34] ss:$8 sps:$4 sm:$0xff]   ;;  %v12449_v15 = vld [vmem:[%s13745_s6 + $0x30] ss:$8 sps:$4 sm:$0xff]   ;;  %v12451_v17 = vld [vmem:[%s13745_s6 + $0x44] ss:$8 sps:$4 sm:$0xff]  }
  0xca   : > { %v12447_v14 = vld [vmem:[%s13745_s6 + $0x834] ss:$8 sps:$4 sm:$0xff]   ;;  %v12450_v16 = vld [vmem:[%s13745_s6 + $0x830] ss:$8 sps:$4 sm:$0xff]   ;;  %v12453_v18 = vld [vmem:[%s13745_s6 + $0x844] ss:$8 sps:$4 sm:$0xff]  }
  0xcb   : > { %6566 = vmatpush1.bf16.msra.mxu1 %v12437_v7  ;;  %v12455_v19 = vld [vmem:[%s13745_s6 + $0x40] ss:$8 sps:$4 sm:$0xff]   ;;  %v12457_v21 = vld [vmem:[%s13745_s6 + $0x54] ss:$8 sps:$4 sm:$0xff]   ;;  %v12461_v23 = vld [vmem:[%s13745_s6 + $0x50] ss:$8 sps:$4 sm:$0xff]  }
  0xcc   : > { %8110 = vmatpush1.bf16.msra.mxu0 %v12438_v8  ;;  %6567 = vmatprep.subr.bf16.mxu1 %v12439_v9  ;;  %v12456_v20 = vld [vmem:[%s13745_s6 + $0x840] ss:$8 sps:$4 sm:$0xff]   ;;  %v12459_v22 = vld [vmem:[%s13745_s6 + $0x854] ss:$8 sps:$4 sm:$0xff]   ;;  %v12462_v24 = vld [vmem:[%s13745_s6 + $0x850] ss:$8 sps:$4 sm:$0xff]  }
  0xcd   : > { %8111 = vmatprep.subr.bf16.mxu0 %v12441_v10  ;;  %v12463_v25 = vld [vmem:[%s13745_s6 + $0x64] ss:$8 sps:$4 sm:$0xff]   ;;  %v12467_v27 = vld [vmem:[%s13745_s6 + $0x60] ss:$8 sps:$4 sm:$0xff]   ;;  %v12469_v29 = vld [vmem:[%s13745_s6 + $0x74] ss:$8 sps:$4 sm:$0xff]  }
  0xce   : > { %v12465_v26 = vld [vmem:[%s13745_s6 + $0x864] ss:$8 sps:$4 sm:$0xff]   ;;  %v12468_v28 = vld [vmem:[%s13745_s6 + $0x860] ss:$8 sps:$4 sm:$0xff]   ;;  %v12471_v30 = vld [vmem:[%s13745_s6 + $0x874] ss:$8 sps:$4 sm:$0xff]  }
  0xcf   : > { %6568 = vmatpush1.bf16.msra.mxu1 %v12443_v11  ;;  %v12473_v31 = vld [vmem:[%s13745_s6 + $0x70] ss:$8 sps:$4 sm:$0xff]   ;;  %v12475_v33 = vld [vmem:[%s13745_s6 + $0x84] ss:$8 sps:$4 sm:$0xff]   ;;  %v12479_v35 = vld [vmem:[%s13745_s6 + $0x80] ss:$8 sps:$4 sm:$0xff]  }
  0xd0   : > { %8112 = vmatpush1.bf16.msra.mxu0 %v12444_v12  ;;  %6569 = vmatprep.subr.bf16.mxu1 %v12445_v13  ;;  %v12474_v32 = vld [vmem:[%s13745_s6 + $0x870] ss:$8 sps:$4 sm:$0xff]   ;;  %v12477_v34 = vld [vmem:[%s13745_s6 + $0x884] ss:$8 sps:$4 sm:$0xff]   ;;  %v12480_v36 = vld [vmem:[%s13745_s6 + $0x880] ss:$8 sps:$4 sm:$0xff]  }
  0xd1   : > { %8113 = vmatprep.subr.bf16.mxu0 %v12447_v14  ;;  %v12481_v37 = vld [vmem:[%s13745_s6 + $0x94] ss:$8 sps:$4 sm:$0xff]   ;;  %v12485_v39 = vld [vmem:[%s13745_s6 + $0x90] ss:$8 sps:$4 sm:$0xff]   ;;  %v12487_v41 = vld [vmem:[%s13745_s6 + $0xa4] ss:$8 sps:$4 sm:$0xff]  }
  0xd2   : > { %v12483_v38 = vld [vmem:[%s13745_s6 + $0x894] ss:$8 sps:$4 sm:$0xff]   ;;  %v12486_v40 = vld [vmem:[%s13745_s6 + $0x890] ss:$8 sps:$4 sm:$0xff]   ;;  %v12489_v42 = vld [vmem:[%s13745_s6 + $0x8a4] ss:$8 sps:$4 sm:$0xff]  }
  0xd3   : > { %6570 = vmatpush1.bf16.msra.mxu1 %v12449_v15  ;;  %v12491_v43 = vld [vmem:[%s13745_s6 + $0xa0] ss:$8 sps:$4 sm:$0xff]   ;;  %v12493_v45 = vld [vmem:[%s13745_s6 + $0xb4] ss:$8 sps:$4 sm:$0xff]   ;;  %v12497_v47 = vld [vmem:[%s13745_s6 + $0xb0] ss:$8 sps:$4 sm:$0xff]  }
  0xd4   : > { %8114 = vmatpush1.bf16.msra.mxu0 %v12450_v16  ;;  %6571 = vmatprep.subr.bf16.mxu1 %v12451_v17  ;;  %v12492_v44 = vld [vmem:[%s13745_s6 + $0x8a0] ss:$8 sps:$4 sm:$0xff]   ;;  %v12495_v46 = vld [vmem:[%s13745_s6 + $0x8b4] ss:$8 sps:$4 sm:$0xff]   ;;  %v12498_v48 = vld [vmem:[%s13745_s6 + $0x8b0] ss:$8 sps:$4 sm:$0xff]  }
  0xd5   : > { %8115 = vmatprep.subr.bf16.mxu0 %v12453_v18  ;;  %v13874_v49 = vld [vmem:[%s13737_s5] sm:$0xff]  ;;  %v12505_v59 = vld [vmem:[%s13745_s6 + $0xd4] ss:$8 sps:$4 sm:$0xff]   ;;  %v12509_v61 = vld [vmem:[%s13745_s6 + $0xd0] ss:$8 sps:$4 sm:$0xff]   ;;  %s15148_s15 = sld [smem:[#allocation17_spill]] }
  0xd6   : > { %v13877_v50 = vld [vmem:[%s13737_s5 + $0x80] sm:$0xff]  ;;  %v12507_v60 = vld [vmem:[%s13745_s6 + $0x8d4] ss:$8 sps:$4 sm:$0xff]   ;;  %v12510_v62 = vld [vmem:[%s13745_s6 + $0x8d0] ss:$8 sps:$4 sm:$0xff]  }
  0xd7   : > { %6572 = vmatpush1.bf16.msra.mxu1 %v12455_v19  ;;  %v13880_v51 = vld [vmem:[%s13737_s5 + $0x40] sm:$0xff]  ;;  %v10283_v54 = vcombine.high %v13874_v49, %v13877_v50  ;;  %v12517_v3 = vld [vmem:[%s13745_s6 + $0xf4] ss:$8 sps:$4 sm:$0xff]   ;;  %v12521_v5 = vld [vmem:[%s13745_s6 + $0xf0] ss:$8 sps:$4 sm:$0xff]   ;;  %v10282_v13 = vcombine.low %v13874_v49, %v13877_v50 }
  0xd8   : > { %8116 = vmatpush1.bf16.msra.mxu0 %v12456_v20  ;;  %6573 = vmatprep.subr.bf16.mxu1 %v12457_v21  ;;  %v443_v52 = vld [vmem:[%s13737_s5 + $0xc0] sm:$0xff]  ;;  %v12519_v4 = vld [vmem:[%s13745_s6 + $0x8f4] ss:$8 sps:$4 sm:$0xff]   ;;  %v12522_v6 = vld [vmem:[%s13745_s6 + $0x8f0] ss:$8 sps:$4 sm:$0xff]  }
  0xd9   : > { %8117 = vmatprep.subr.bf16.mxu0 %v12459_v22  ;;  %v12499_v53 = vld [vmem:[%s13745_s6 + $0xc4] ss:$8 sps:$4 sm:$0xff]   ;;  %v10299_v56 = vcombine.high %v13880_v51, %v443_v52  ;;  %6595 = vmatprep.mubr.bf16.mxu1 %v10283_v54  ;;  %v12503_v57 = vld [vmem:[%s13745_s6 + $0xc0] ss:$8 sps:$4 sm:$0xff]   ;;  %v10298_v14 = vcombine.low %v13880_v51, %v443_v52  ;;  %v12529_v19 = vld [vmem:[%s13745_s6 + $0x110] ss:$8 sps:$4 sm:$0xff]  }
  0xda   : > { %v12501_v55 = vld [vmem:[%s13745_s6 + $0x8c4] ss:$8 sps:$4 sm:$0xff]   ;;  %v12504_v58 = vld [vmem:[%s13745_s6 + $0x8c0] ss:$8 sps:$4 sm:$0xff]   ;;  %v12531_v20 = vld [vmem:[%s13745_s6 + $0x114] ss:$8 sps:$4 sm:$0xff]  }
  0xdb   : > { %6574 = vmatpush1.bf16.msra.mxu1 %v12461_v23  ;;  %8139 = vmatprep.mubr.bf16.mxu0 %v10299_v56  ;;  %v12511_v63 = vld [vmem:[%s13745_s6 + $0xe4] ss:$8 sps:$4 sm:$0xff]   ;;  %v12515_v1 = vld [vmem:[%s13745_s6 + $0xe0] ss:$8 sps:$4 sm:$0xff]   ;;  %v12532_v21 = vld [vmem:[%s13745_s6 + $0x910] ss:$8 sps:$4 sm:$0xff]  }
  0xdc   : > { %8118 = vmatpush1.bf16.msra.mxu0 %v12462_v24  ;;  %6575 = vmatprep.subr.bf16.mxu1 %v12463_v25  ;;  %v12513_v0 = vld [vmem:[%s13745_s6 + $0x8e4] ss:$8 sps:$4 sm:$0xff]   ;;  %v12516_v2 = vld [vmem:[%s13745_s6 + $0x8e0] ss:$8 sps:$4 sm:$0xff]   ;;  %v12534_v22 = vld [vmem:[%s13745_s6 + $0x914] ss:$8 sps:$4 sm:$0xff]  }
  0xdd   : > { %8119 = vmatprep.subr.bf16.mxu0 %v12465_v26  ;;  %v12525_v7 = vld [vmem:[%s13745_s6 + $0x104] ss:$8 sps:$4 sm:$0xff]   ;;  %v12523_v15 = vld [vmem:[%s13745_s6 + $0x100] ss:$8 sps:$4 sm:$0xff]   ;;  %v12555_v51 = vld [vmem:[%s13745_s6 + $0x154] ss:$8 sps:$4 sm:$0xff]  }
  0xde   : > { %v12528_v8 = vld [vmem:[%s13745_s6 + $0x904] ss:$8 sps:$4 sm:$0xff]   ;;  %v12526_v16 = vld [vmem:[%s13745_s6 + $0x900] ss:$8 sps:$4 sm:$0xff]   ;;  %v12558_v52 = vld [vmem:[%s13745_s6 + $0x954] ss:$8 sps:$4 sm:$0xff]  }
  0xdf   : > { %6576 = vmatpush1.bf16.msra.mxu1 %v12467_v27  ;;  %v451_v9 = vld [vmem:[%s13737_s5 + $0x100] sm:$0xff]  ;;  %p11306_p12 = scmp.ne.s32.totalorder %s15148_s15, 1 }
  0xe0   : > { %8120 = vmatpush1.bf16.msra.mxu0 %v12468_v28  ;;  %6577 = vmatprep.subr.bf16.mxu1 %v12469_v29  ;;  %v467_v10 = vld [vmem:[%s13737_s5 + $0x180] sm:$0xff] }
  0xe1   : > { %8121 = vmatprep.subr.bf16.mxu0 %v12471_v30  ;;  %v459_v11 = vld [vmem:[%s13737_s5 + $0x140] sm:$0xff]  ;;  %v10315_v17 = vcombine.high %v451_v9, %v467_v10  ;;  %v10314_v29 = vcombine.low %v451_v9, %v467_v10  ;;  %v12565_v9 = vld [vmem:[%s13745_s6 + $0x170] ss:$8 sps:$4 sm:$0xff]  }
  0xe2   : > { %v475_v12 = vld [vmem:[%s13737_s5 + $0x1c0] sm:$0xff]  ;;  %v12568_v10 = vld [vmem:[%s13745_s6 + $0x970] ss:$8 sps:$4 sm:$0xff]  }
  0xe3   : > { %6578 = vmatpush1.bf16.msra.mxu1 %v12473_v31  ;;  %v10331_v18 = vcombine.high %v459_v11, %v475_v12  ;;  %v483_v23 = vld [vmem:[%s13737_s5 + $0x200] sm:$0xff]  ;;  %v10330_v30 = vcombine.low %v459_v11, %v475_v12 }
  0xe4   : > { %8122 = vmatpush1.bf16.msra.mxu0 %v12474_v32  ;;  %6579 = vmatprep.subr.bf16.mxu1 %v12475_v33  ;;  %v499_v24 = vld [vmem:[%s13737_s5 + $0x280] sm:$0xff] }
  0xe5   : > { %8123 = vmatprep.subr.bf16.mxu0 %v12477_v34  ;;  %v491_v25 = vld [vmem:[%s13737_s5 + $0x240] sm:$0xff]  ;;  %v10347_v31 = vcombine.high %v483_v23, %v499_v24 }
  0xe6   : > { %v507_v26 = vld [vmem:[%s13737_s5 + $0x2c0] sm:$0xff] }
  0xe7   : > { %6580 = vmatpush1.bf16.msra.mxu1 %v12479_v35  ;;  %v12537_v27 = vld [vmem:[%s13745_s6 + $0x124] ss:$8 sps:$4 sm:$0xff]   ;;  %v10363_v32 = vcombine.high %v491_v25, %v507_v26  ;;  %v12535_v33 = vld [vmem:[%s13745_s6 + $0x120] ss:$8 sps:$4 sm:$0xff]   ;;  %v12543_v35 = vld [vmem:[%s13745_s6 + $0x134] ss:$8 sps:$4 sm:$0xff]  }
  0xe8   : > { %8124 = vmatpush1.bf16.msra.mxu0 %v12480_v36  ;;  %6581 = vmatprep.subr.bf16.mxu1 %v12481_v37  ;;  %v12540_v28 = vld [vmem:[%s13745_s6 + $0x924] ss:$8 sps:$4 sm:$0xff]   ;;  %v12538_v34 = vld [vmem:[%s13745_s6 + $0x920] ss:$8 sps:$4 sm:$0xff]   ;;  %v12546_v36 = vld [vmem:[%s13745_s6 + $0x934] ss:$8 sps:$4 sm:$0xff]  }
  0xe9   : > { %8125 = vmatprep.subr.bf16.mxu0 %v12483_v38  ;;  %v515_v37 = vld [vmem:[%s13737_s5 + $0x300] sm:$0xff] }
  0xea   : > { %v531_v38 = vld [vmem:[%s13737_s5 + $0x380] sm:$0xff] }
  0xeb   : > { %6582 = vmatpush1.bf16.msra.mxu1 %v12485_v39  ;;  %v523_v39 = vld [vmem:[%s13737_s5 + $0x340] sm:$0xff] }
  0xec   : > { %8126 = vmatpush1.bf16.msra.mxu0 %v12486_v40  ;;  %6583 = vmatprep.subr.bf16.mxu1 %v12487_v41  ;;  %v539_v40 = vld [vmem:[%s13737_s5 + $0x3c0] sm:$0xff]  ;;  %v12541_v41 = vld [vmem:[%s13745_s6 + $0x130] ss:$8 sps:$4 sm:$0xff]  }
  0xed   : > { %8127 = vmatprep.subr.bf16.mxu0 %v12489_v42  ;;  %v12544_v42 = vld [vmem:[%s13745_s6 + $0x930] ss:$8 sps:$4 sm:$0xff]   ;;  %v12547_v49 = vld [vmem:[%s13745_s6 + $0x140] ss:$8 sps:$4 sm:$0xff]   ;;  %v12573_v11 = vld [vmem:[%s13745_s6 + $0x184] ss:$8 sps:$4 sm:$0xff]  }
  0xee   : > { %v12550_v50 = vld [vmem:[%s13745_s6 + $0x940] ss:$8 sps:$4 sm:$0xff]   ;;  %v12576_v12 = vld [vmem:[%s13745_s6 + $0x984] ss:$8 sps:$4 sm:$0xff]  }
  0xef   : > { %6584 = vmatpush1.bf16.msra.mxu1 %v12491_v43  ;;  %v12549_v43 = vld [vmem:[%s13745_s6 + $0x144] ss:$8 sps:$4 sm:$0xff]  }
  0xf0   : > { %8128 = vmatpush1.bf16.msra.mxu0 %v12492_v44  ;;  %6585 = vmatprep.subr.bf16.mxu1 %v12493_v45  ;;  %v12552_v44 = vld [vmem:[%s13745_s6 + $0x944] ss:$8 sps:$4 sm:$0xff]   ;;  %v10346_v45 = vcombine.low %v483_v23, %v499_v24 }
  0xf1   : > { %8129 = vmatprep.subr.bf16.mxu0 %v12495_v46  ;;  %v10362_v46 = vcombine.low %v491_v25, %v507_v26  ;;  %v563_v54 = vld [vmem:[%s13737_s5 + $0x480] sm:$0xff]  ;;  %v12577_v25 = vld [vmem:[%s13745_s6 + $0x190] ss:$8 sps:$4 sm:$0xff]  }
  0xf2   : > { %v571_v56 = vld [vmem:[%s13737_s5 + $0x4c0] sm:$0xff]  ;;  %v12580_v26 = vld [vmem:[%s13745_s6 + $0x990] ss:$8 sps:$4 sm:$0xff]  }
  0xf3   : > { %6586 = vmatpush1.bf16.msra.mxu1 %v12497_v47  ;;  %v10379_v47 = vcombine.high %v515_v37, %v531_v38  ;;  %v619_v23 = vld [vmem:[%s13737_s5 + $0x640] sm:$0xff] }
  0xf4   : > { %8130 = vmatpush1.bf16.msra.mxu0 %v12498_v48  ;;  %6587 = vmatprep.subr.bf16.mxu1 %v12499_v53  ;;  %v10395_v48 = vcombine.high %v523_v39, %v539_v40  ;;  %v547_v53 = vld [vmem:[%s13737_s5 + $0x400] sm:$0xff] }
  0xf5   : > { %8131 = vmatprep.subr.bf16.mxu0 %v12501_v55  ;;  %v555_v55 = vld [vmem:[%s13737_s5 + $0x440] sm:$0xff] }
  0xf6   : > { %v635_v24 = vld [vmem:[%s13737_s5 + $0x6c0] sm:$0xff] }
  0xf7   : > { %6588 = vmatpush1.bf16.msra.mxu1 %v12503_v57  ;;  %v12553_v57 = vld [vmem:[%s13745_s6 + $0x150] ss:$8 sps:$4 sm:$0xff]  }
  0xf8   : > { %8132 = vmatpush1.bf16.msra.mxu0 %v12504_v58  ;;  %6589 = vmatprep.subr.bf16.mxu1 %v12505_v59  ;;  %v12556_v58 = vld [vmem:[%s13745_s6 + $0x950] ss:$8 sps:$4 sm:$0xff]   ;;  %v12561_v59 = vld [vmem:[%s13745_s6 + $0x164] ss:$8 sps:$4 sm:$0xff]  }
  0xf9   : > { %8133 = vmatprep.subr.bf16.mxu0 %v12507_v60  ;;  %v12564_v60 = vld [vmem:[%s13745_s6 + $0x964] ss:$8 sps:$4 sm:$0xff]  }
  0xfb   : > { %6590 = vmatpush1.bf16.msra.mxu1 %v12509_v61  ;;  %v10378_v61 = vcombine.low %v515_v37, %v531_v38  ;;  %v643_v37 = vld [vmem:[%s13737_s5 + $0x700] sm:$0xff] }
  0xfc   : > { %8134 = vmatpush1.bf16.msra.mxu0 %v12510_v62  ;;  %6591 = vmatprep.subr.bf16.mxu1 %v12511_v63  ;;  %v10394_v62 = vcombine.low %v523_v39, %v539_v40  ;;  %v10411_v63 = vcombine.high %v547_v53, %v563_v54  ;;  %v659_v38 = vld [vmem:[%s13737_s5 + $0x780] sm:$0xff] }
  0xfd   : > { %8135 = vmatprep.subr.bf16.mxu0 %v12513_v0  ;;  %v10427_v0 = vcombine.high %v555_v55, %v571_v56  ;;  %v651_v39 = vld [vmem:[%s13737_s5 + $0x740] sm:$0xff] }
  0xfe   : > { %v667_v40 = vld [vmem:[%s13737_s5 + $0x7c0] sm:$0xff] }
  0xff   : > { %6592 = vmatpush1.bf16.msra.mxu1 %v12515_v1  ;;  %v12559_v1 = vld [vmem:[%s13745_s6 + $0x160] ss:$8 sps:$4 sm:$0xff]  }
 0x100   : > { %8136 = vmatpush1.bf16.msra.mxu0 %v12516_v2  ;;  %6593 = vmatprep.subr.bf16.mxu1 %v12517_v3  ;;  %v12562_v2 = vld [vmem:[%s13745_s6 + $0x960] ss:$8 sps:$4 sm:$0xff]   ;;  %v12567_v3 = vld [vmem:[%s13745_s6 + $0x174] ss:$8 sps:$4 sm:$0xff]  }
 0x101   : > { %8137 = vmatprep.subr.bf16.mxu0 %v12519_v4  ;;  %v12570_v4 = vld [vmem:[%s13745_s6 + $0x974] ss:$8 sps:$4 sm:$0xff]  }
 0x103   : > { %6594 = vmatpush1.bf16.msra.mxu1 %v12521_v5  ;;  %v579_v5 = vld [vmem:[%s13737_s5 + $0x500] sm:$0xff] }
 0x104   : > { %8138 = vmatpush1.bf16.msra.mxu0 %v12522_v6  ;;  %6756 = vmatprep.subr.bf16.mxu1 %v12525_v7  ;;  %v595_v6 = vld [vmem:[%s13737_s5 + $0x580] sm:$0xff] }
 0x105   : > { %8300 = vmatprep.subr.bf16.mxu0 %v12528_v8  ;;  %v587_v7 = vld [vmem:[%s13737_s5 + $0x540] sm:$0xff] }
 0x106   : > { %6596 = vmatmul.mubr.bf16.vlgmr.msra.gmra.mrb[0].mxu1 %v10282_v13  ;;  %v603_v8 = vld [vmem:[%s13737_s5 + $0x5c0] sm:$0xff]  ;;  %v10410_v13 = vcombine.low %v547_v53, %v563_v54 }
 0x107   : > { %8140 = vmatmul.mubr.bf16.vlgmr.msra.gmra.mrb[0].mxu0 %v10298_v14  ;;  %6757 = vmatpush1.bf16.msra.mxu1 %v12523_v15  ;;  %v10426_v14 = vcombine.low %v555_v55, %v571_v56  ;;  %v10443_v15 = vcombine.high %v579_v5, %v595_v6  ;;  %v675_v53 = vld [vmem:[%s13737_s5 + $0x800] sm:$0xff] }
 0x108   : > { %8301 = vmatpush1.bf16.msra.mxu0 %v12526_v16  ;;  %6605 = vmatprep.mubr.bf16.mxu1 %v10315_v17  ;;  %v10459_v16 = vcombine.high %v587_v7, %v603_v8  ;;  %v12571_v17 = vld [vmem:[%s13745_s6 + $0x180] ss:$8 sps:$4 sm:$0xff]  }
 0x109   : > { %8149 = vmatprep.mubr.bf16.mxu0 %v10331_v18  ;;  %6758 = vmatprep.subr.bf16.mxu1 %v12531_v20  ;;  %v12574_v18 = vld [vmem:[%s13745_s6 + $0x980] ss:$8 sps:$4 sm:$0xff]   ;;  %v12582_v20 = vld [vmem:[%s13745_s6 + $0x994] ss:$8 sps:$4 sm:$0xff]  }
 0x10a   : > { %8302 = vmatprep.subr.bf16.mxu0 %v12534_v22  ;;  %v627_v22 = vld [vmem:[%s13737_s5 + $0x680] sm:$0xff] }
 0x10b   : > { %6759 = vmatpush1.bf16.msra.mxu1 %v12529_v19  ;;  %v12579_v19 = vld [vmem:[%s13745_s6 + $0x194] ss:$8 sps:$4 sm:$0xff]   ;;  %v691_v54 = vld [vmem:[%s13737_s5 + $0x880] sm:$0xff] }
 0x10c   : > { %8303 = vmatpush1.bf16.msra.mxu0 %v12532_v21  ;;  %6760 = vmatprep.subr.bf16.mxu1 %v12537_v27  ;;  %v611_v21 = vld [vmem:[%s13737_s5 + $0x600] sm:$0xff] }
 0x10d   : > { %8304 = vmatprep.subr.bf16.mxu0 %v12540_v28  ;;  %v12585_v27 = vld [vmem:[%s13745_s6 + $0x1a4] ss:$8 sps:$4 sm:$0xff]  }
 0x10e   : > { %6606 = vmatmul.mubr.bf16.gmra.mrb[4].mxu1 %v10314_v29  ;;  %v12588_v28 = vld [vmem:[%s13745_s6 + $0x9a4] ss:$8 sps:$4 sm:$0xff]   ;;  %v10442_v29 = vcombine.low %v579_v5, %v595_v6 }
 0x10f   : > { %8150 = vmatmul.mubr.bf16.gmra.mrb[4].mxu0 %v10330_v30  ;;  %6615 = vmatprep.mubr.bf16.mxu1 %v10347_v31  ;;  %v10458_v30 = vcombine.low %v587_v7, %v603_v8  ;;  %v10475_v31 = vcombine.high %v611_v21, %v627_v22  ;;  %v683_v55 = vld [vmem:[%s13737_s5 + $0x840] sm:$0xff] }
 0x110   : > { %8159 = vmatprep.mubr.bf16.mxu0 %v10363_v32  ;;  %6761 = vmatpush1.bf16.msra.mxu1 %v12535_v33  ;;  %v10491_v32 = vcombine.high %v619_v23, %v635_v24  ;;  %v12583_v33 = vld [vmem:[%s13745_s6 + $0x1a0] ss:$8 sps:$4 sm:$0xff]  }
 0x111   : > { %8305 = vmatpush1.bf16.msra.mxu0 %v12538_v34  ;;  %6762 = vmatprep.subr.bf16.mxu1 %v12543_v35  ;;  %v12586_v34 = vld [vmem:[%s13745_s6 + $0x9a0] ss:$8 sps:$4 sm:$0xff]   ;;  %v12591_v35 = vld [vmem:[%s13745_s6 + $0x1b4] ss:$8 sps:$4 sm:$0xff]  }
 0x112   : > { %8306 = vmatprep.subr.bf16.mxu0 %v12546_v36  ;;  %v12594_v36 = vld [vmem:[%s13745_s6 + $0x9b4] ss:$8 sps:$4 sm:$0xff]   ;;  %v699_v56 = vld [vmem:[%s13737_s5 + $0x8c0] sm:$0xff] }
 0x113   : > { %v707_v5 = vld [vmem:[%s13737_s5 + $0x900] sm:$0xff] }
 0x114   : > { %6763 = vmatpush1.bf16.msra.mxu1 %v12541_v41  ;;  %v12589_v41 = vld [vmem:[%s13745_s6 + $0x1b0] ss:$8 sps:$4 sm:$0xff]   ;;  %v723_v6 = vld [vmem:[%s13737_s5 + $0x980] sm:$0xff] }
 0x115   : > { %8307 = vmatpush1.bf16.msra.mxu0 %v12544_v42  ;;  %6764 = vmatprep.subr.bf16.mxu1 %v12549_v43  ;;  %v12592_v42 = vld [vmem:[%s13745_s6 + $0x9b0] ss:$8 sps:$4 sm:$0xff]   ;;  %v12597_v43 = vld [vmem:[%s13745_s6 + $0x1c4] ss:$8 sps:$4 sm:$0xff]  }
 0x116   : > { %8308 = vmatprep.subr.bf16.mxu0 %v12552_v44  ;;  %6616 = vmatmul.mubr.bf16.gmra.mrb[8].mxu1 %v10346_v45  ;;  %v12600_v44 = vld [vmem:[%s13745_s6 + $0x9c4] ss:$8 sps:$4 sm:$0xff]   ;;  %v10474_v45 = vcombine.low %v611_v21, %v627_v22  ;;  %v10570_v21 = vcombine.low %v707_v5, %v723_v6 }
 0x117   : > { %8160 = vmatmul.mubr.bf16.gmra.mrb[8].mxu0 %v10362_v46  ;;  %6625 = vmatprep.mubr.bf16.mxu1 %v10379_v47  ;;  %v10490_v46 = vcombine.low %v619_v23, %v635_v24  ;;  %v10507_v47 = vcombine.high %v643_v37, %v659_v38  ;;  %v715_v7 = vld [vmem:[%s13737_s5 + $0x940] sm:$0xff] }
 0x118   : > { %8169 = vmatprep.mubr.bf16.mxu0 %v10395_v48  ;;  %6765 = vmatpush1.bf16.msra.mxu1 %v12547_v49  ;;  %v10523_v48 = vcombine.high %v651_v39, %v667_v40  ;;  %v12595_v49 = vld [vmem:[%s13745_s6 + $0x1c0] ss:$8 sps:$4 sm:$0xff]  }
 0x119   : > { %8309 = vmatpush1.bf16.msra.mxu0 %v12550_v50  ;;  %6766 = vmatprep.subr.bf16.mxu1 %v12555_v51  ;;  %v12598_v50 = vld [vmem:[%s13745_s6 + $0x9c0] ss:$8 sps:$4 sm:$0xff]   ;;  %v12603_v51 = vld [vmem:[%s13745_s6 + $0x1d4] ss:$8 sps:$4 sm:$0xff]  }
 0x11a   : > { %8310 = vmatprep.subr.bf16.mxu0 %v12558_v52  ;;  %v12606_v52 = vld [vmem:[%s13745_s6 + $0x9d4] ss:$8 sps:$4 sm:$0xff]   ;;  %v731_v8 = vld [vmem:[%s13737_s5 + $0x9c0] sm:$0xff] }
 0x11b   : > { %v10586_v22 = vcombine.low %v715_v7, %v731_v8 }
 0x11c   : > { %6767 = vmatpush1.bf16.msra.mxu1 %v12553_v57  ;;  %v12601_v57 = vld [vmem:[%s13745_s6 + $0x1d0] ss:$8 sps:$4 sm:$0xff]  }
 0x11d   : > { %8311 = vmatpush1.bf16.msra.mxu0 %v12556_v58  ;;  %6768 = vmatprep.subr.bf16.mxu1 %v12561_v59  ;;  %v12604_v58 = vld [vmem:[%s13745_s6 + $0x9d0] ss:$8 sps:$4 sm:$0xff]   ;;  %v12609_v59 = vld [vmem:[%s13745_s6 + $0x1e4] ss:$8 sps:$4 sm:$0xff]  }
 0x11e   : > { %8312 = vmatprep.subr.bf16.mxu0 %v12564_v60  ;;  %6626 = vmatmul.mubr.bf16.gmra.mrb[12].mxu1 %v10378_v61  ;;  %v12612_v60 = vld [vmem:[%s13745_s6 + $0x9e4] ss:$8 sps:$4 sm:$0xff]   ;;  %v10506_v61 = vcombine.low %v643_v37, %v659_v38 }
 0x11f   : > { %8170 = vmatmul.mubr.bf16.gmra.mrb[12].mxu0 %v10394_v62  ;;  %6635 = vmatprep.mubr.bf16.mxu1 %v10411_v63  ;;  %v10522_v62 = vcombine.low %v651_v39, %v667_v40  ;;  %v10539_v63 = vcombine.high %v675_v53, %v691_v54 }
 0x120   : > { %8179 = vmatprep.mubr.bf16.mxu0 %v10427_v0  ;;  %6769 = vmatpush1.bf16.msra.mxu1 %v12559_v1  ;;  %v10555_v0 = vcombine.high %v683_v55, %v699_v56  ;;  %v12607_v1 = vld [vmem:[%s13745_s6 + $0x1e0] ss:$8 sps:$4 sm:$0xff]  }
 0x121   : > { %8313 = vmatpush1.bf16.msra.mxu0 %v12562_v2  ;;  %6770 = vmatprep.subr.bf16.mxu1 %v12567_v3  ;;  %v12610_v2 = vld [vmem:[%s13745_s6 + $0x9e0] ss:$8 sps:$4 sm:$0xff]   ;;  %v12615_v3 = vld [vmem:[%s13745_s6 + $0x1f4] ss:$8 sps:$4 sm:$0xff]  }
 0x122   : > { %8314 = vmatprep.subr.bf16.mxu0 %v12570_v4  ;;  %v12618_v4 = vld [vmem:[%s13745_s6 + $0x9f4] ss:$8 sps:$4 sm:$0xff]  }
 0x124   : > { %6771 = vmatpush1.bf16.msra.mxu1 %v12565_v9  ;;  %v12613_v9 = vld [vmem:[%s13745_s6 + $0x1f0] ss:$8 sps:$4 sm:$0xff]  }
 0x125   : > { %8315 = vmatpush1.bf16.msra.mxu0 %v12568_v10  ;;  %6772 = vmatprep.subr.bf16.mxu1 %v12573_v11  ;;  %v12616_v10 = vld [vmem:[%s13745_s6 + $0x9f0] ss:$8 sps:$4 sm:$0xff]   ;;  %v12621_v11 = vld [vmem:[%s13745_s6 + $0x204] ss:$8 sps:$4 sm:$0xff]  }
 0x126   : > { %8316 = vmatprep.subr.bf16.mxu0 %v12576_v12  ;;  %6636 = vmatmul.mubr.bf16.gmra.mrb[16].mxu1 %v10410_v13  ;;  %v12624_v12 = vld [vmem:[%s13745_s6 + $0xa04] ss:$8 sps:$4 sm:$0xff]   ;;  %v10538_v13 = vcombine.low %v675_v53, %v691_v54 }
 0x127   : > { %8180 = vmatmul.mubr.bf16.gmra.mrb[16].mxu0 %v10426_v14  ;;  %6645 = vmatprep.mubr.bf16.mxu1 %v10443_v15  ;;  %v10554_v14 = vcombine.low %v683_v55, %v699_v56  ;;  %v10571_v15 = vcombine.high %v707_v5, %v723_v6 }
 0x128   : > { %8189 = vmatprep.mubr.bf16.mxu0 %v10459_v16  ;;  %6773 = vmatpush1.bf16.msra.mxu1 %v12571_v17  ;;  %v10587_v16 = vcombine.high %v715_v7, %v731_v8  ;;  %v739_v17 = vld [vmem:[%s13737_s5 + $0xa00] sm:$0xff] }
 0x129   : > { %8317 = vmatpush1.bf16.msra.mxu0 %v12574_v18  ;;  %6774 = vmatprep.subr.bf16.mxu1 %v12579_v19  ;;  %v755_v18 = vld [vmem:[%s13737_s5 + $0xa80] sm:$0xff] }
 0x12a   : > { %8318 = vmatprep.subr.bf16.mxu0 %v12582_v20  ;;  %v747_v19 = vld [vmem:[%s13737_s5 + $0xa40] sm:$0xff]  ;;  %v10603_v23 = vcombine.high %v739_v17, %v755_v18 }
 0x12b   : > { %v763_v20 = vld [vmem:[%s13737_s5 + $0xac0] sm:$0xff] }
 0x12c   : > { %6775 = vmatpush1.bf16.msra.mxu1 %v12577_v25  ;;  %v10619_v24 = vcombine.high %v747_v19, %v763_v20  ;;  %v771_v25 = vld [vmem:[%s13737_s5 + $0xb00] sm:$0xff] }
 0x12d   : > { %8319 = vmatpush1.bf16.msra.mxu0 %v12580_v26  ;;  %6776 = vmatprep.subr.bf16.mxu1 %v12585_v27  ;;  %v787_v26 = vld [vmem:[%s13737_s5 + $0xb80] sm:$0xff] }
 0x12e   : > { %8320 = vmatprep.subr.bf16.mxu0 %v12588_v28  ;;  %6646 = vmatmul.mubr.bf16.gmra.mrb[20].mxu1 %v10442_v29  ;;  %v779_v27 = vld [vmem:[%s13737_s5 + $0xb40] sm:$0xff]  ;;  %v10602_v29 = vcombine.low %v739_v17, %v755_v18  ;;  %v10634_v37 = vcombine.low %v771_v25, %v787_v26  ;;  %v12627_v17 = vld [vmem:[%s13745_s6 + $0x214] ss:$8 sps:$4 sm:$0xff]  }
 0x12f   : > { %8190 = vmatmul.mubr.bf16.gmra.mrb[20].mxu0 %v10458_v30  ;;  %6655 = vmatprep.mubr.bf16.mxu1 %v10475_v31  ;;  %v795_v28 = vld [vmem:[%s13737_s5 + $0xbc0] sm:$0xff]  ;;  %v10618_v30 = vcombine.low %v747_v19, %v763_v20  ;;  %v10635_v31 = vcombine.high %v771_v25, %v787_v26  ;;  %v12630_v18 = vld [vmem:[%s13745_s6 + $0xa14] ss:$8 sps:$4 sm:$0xff]   ;;  %v492_v25 = vld [vmem:[%s13737_s5 + $0x248] sm:$0xff] }
 0x130   : > { %8199 = vmatprep.mubr.bf16.mxu0 %v10491_v32  ;;  %6777 = vmatpush1.bf16.msra.mxu1 %v12583_v33  ;;  %v10651_v32 = vcombine.high %v779_v27, %v795_v28  ;;  %v803_v33 = vld [vmem:[%s13737_s5 + $0xc00] sm:$0xff]  ;;  %v10650_v38 = vcombine.low %v779_v27, %v795_v28  ;;  %v508_v26 = vld [vmem:[%s13737_s5 + $0x2c8] sm:$0xff] }
 0x131   : > { %8321 = vmatpush1.bf16.msra.mxu0 %v12586_v34  ;;  %6778 = vmatprep.subr.bf16.mxu1 %v12591_v35  ;;  %v819_v34 = vld [vmem:[%s13737_s5 + $0xc80] sm:$0xff] }
 0x132   : > { %8322 = vmatprep.subr.bf16.mxu0 %v12594_v36  ;;  %v811_v35 = vld [vmem:[%s13737_s5 + $0xc40] sm:$0xff]  ;;  %v10667_v39 = vcombine.high %v803_v33, %v819_v34 }
 0x133   : > { %v827_v36 = vld [vmem:[%s13737_s5 + $0xcc0] sm:$0xff] }
 0x134   : > { %6779 = vmatpush1.bf16.msra.mxu1 %v12589_v41  ;;  %v10683_v40 = vcombine.high %v811_v35, %v827_v36  ;;  %v835_v41 = vld [vmem:[%s13737_s5 + $0xd00] sm:$0xff] }
 0x135   : > { %8323 = vmatpush1.bf16.msra.mxu0 %v12592_v42  ;;  %6780 = vmatprep.subr.bf16.mxu1 %v12597_v43  ;;  %v851_v42 = vld [vmem:[%s13737_s5 + $0xd80] sm:$0xff] }
 0x136   : > { %8324 = vmatprep.subr.bf16.mxu0 %v12600_v44  ;;  %6656 = vmatmul.mubr.bf16.gmra.mrb[24].mxu1 %v10474_v45  ;;  %v843_v43 = vld [vmem:[%s13737_s5 + $0xd40] sm:$0xff]  ;;  %v10666_v45 = vcombine.low %v803_v33, %v819_v34  ;;  %v10698_v53 = vcombine.low %v835_v41, %v851_v42  ;;  %v10365_v34 = vcombine.high %v492_v25, %v508_v26 }
 0x137   : > { %8200 = vmatmul.mubr.bf16.gmra.mrb[24].mxu0 %v10490_v46  ;;  %6665 = vmatprep.mubr.bf16.mxu1 %v10507_v47  ;;  %v859_v44 = vld [vmem:[%s13737_s5 + $0xdc0] sm:$0xff]  ;;  %v10682_v46 = vcombine.low %v811_v35, %v827_v36  ;;  %v10699_v47 = vcombine.high %v835_v41, %v851_v42  ;;  %v12639_v35 = vld [vmem:[%s13745_s6 + $0x234] ss:$8 sps:$4 sm:$0xff]   ;;  %v12637_v41 = vld [vmem:[%s13745_s6 + $0x230] ss:$8 sps:$4 sm:$0xff]  }
 0x138   : > { %8209 = vmatprep.mubr.bf16.mxu0 %v10523_v48  ;;  %6781 = vmatpush1.bf16.msra.mxu1 %v12595_v49  ;;  %v10715_v48 = vcombine.high %v843_v43, %v859_v44  ;;  %v867_v49 = vld [vmem:[%s13737_s5 + $0xe00] sm:$0xff]  ;;  %v10714_v54 = vcombine.low %v843_v43, %v859_v44  ;;  %v12642_v36 = vld [vmem:[%s13745_s6 + $0xa34] ss:$8 sps:$4 sm:$0xff]   ;;  %v12640_v42 = vld [vmem:[%s13745_s6 + $0xa30] ss:$8 sps:$4 sm:$0xff]  }
 0x139   : > { %8325 = vmatpush1.bf16.msra.mxu0 %v12598_v50  ;;  %6782 = vmatprep.subr.bf16.mxu1 %v12603_v51  ;;  %v883_v50 = vld [vmem:[%s13737_s5 + $0xe80] sm:$0xff] }
 0x13a   : > { %8326 = vmatprep.subr.bf16.mxu0 %v12606_v52  ;;  %v875_v51 = vld [vmem:[%s13737_s5 + $0xe40] sm:$0xff]  ;;  %v10731_v55 = vcombine.high %v867_v49, %v883_v50 }
 0x13b   : > { %v891_v52 = vld [vmem:[%s13737_s5 + $0xec0] sm:$0xff] }
 0x13c   : > { %6783 = vmatpush1.bf16.msra.mxu1 %v12601_v57  ;;  %v10747_v56 = vcombine.high %v875_v51, %v891_v52  ;;  %v899_v57 = vld [vmem:[%s13737_s5 + $0xf00] sm:$0xff] }
 0x13d   : > { %8327 = vmatpush1.bf16.msra.mxu0 %v12604_v58  ;;  %6784 = vmatprep.subr.bf16.mxu1 %v12609_v59  ;;  %v915_v58 = vld [vmem:[%s13737_s5 + $0xf80] sm:$0xff] }
 0x13e   : > { %8328 = vmatprep.subr.bf16.mxu0 %v12612_v60  ;;  %6666 = vmatmul.mubr.bf16.gmra.mrb[28].mxu1 %v10506_v61  ;;  %v907_v59 = vld [vmem:[%s13737_s5 + $0xf40] sm:$0xff]  ;;  %v10730_v61 = vcombine.low %v867_v49, %v883_v50  ;;  %v10762_v5 = vcombine.low %v899_v57, %v915_v58 }
 0x13f   : > { %8210 = vmatmul.mubr.bf16.gmra.mrb[28].mxu0 %v10522_v62  ;;  %6675 = vmatprep.mubr.bf16.mxu1 %v10539_v63  ;;  %v923_v60 = vld [vmem:[%s13737_s5 + $0xfc0] sm:$0xff]  ;;  %v10746_v62 = vcombine.low %v875_v51, %v891_v52  ;;  %v10763_v63 = vcombine.high %v899_v57, %v915_v58  ;;  %v12651_v51 = vld [vmem:[%s13745_s6 + $0x254] ss:$8 sps:$4 sm:$0xff]   ;;  %v12649_v57 = vld [vmem:[%s13745_s6 + $0x250] ss:$8 sps:$4 sm:$0xff]  }
 0x140   : > { %8219 = vmatprep.mubr.bf16.mxu0 %v10555_v0  ;;  %6785 = vmatpush1.bf16.msra.mxu1 %v12607_v1  ;;  %v10779_v0 = vcombine.high %v907_v59, %v923_v60  ;;  %v420_v1 = vld [vmem:[%s13737_s5 + $0x8] sm:$0xff]  ;;  %v10778_v6 = vcombine.low %v907_v59, %v923_v60  ;;  %v12654_v52 = vld [vmem:[%s13745_s6 + $0xa54] ss:$8 sps:$4 sm:$0xff]   ;;  %v12652_v58 = vld [vmem:[%s13745_s6 + $0xa50] ss:$8 sps:$4 sm:$0xff]  }
 0x141   : > { %8329 = vmatpush1.bf16.msra.mxu0 %v12610_v2  ;;  %6786 = vmatprep.subr.bf16.mxu1 %v12615_v3  ;;  %v436_v2 = vld [vmem:[%s13737_s5 + $0x88] sm:$0xff] }
 0x142   : > { %8330 = vmatprep.subr.bf16.mxu0 %v12618_v4  ;;  %v428_v3 = vld [vmem:[%s13737_s5 + $0x48] sm:$0xff]  ;;  %v10285_v7 = vcombine.high %v420_v1, %v436_v2 }
 0x143   : > { %v444_v4 = vld [vmem:[%s13737_s5 + $0xc8] sm:$0xff] }
 0x144   : > { %6787 = vmatpush1.bf16.msra.mxu1 %v12613_v9  ;;  %v10301_v8 = vcombine.high %v428_v3, %v444_v4  ;;  %v452_v9 = vld [vmem:[%s13737_s5 + $0x108] sm:$0xff] }
 0x145   : > { %8331 = vmatpush1.bf16.msra.mxu0 %v12616_v10  ;;  %6949 = vmatprep.subr.bf16.mxu1 %v12621_v11  ;;  %v468_v10 = vld [vmem:[%s13737_s5 + $0x188] sm:$0xff] }
 0x146   : > { %8493 = vmatprep.subr.bf16.mxu0 %v12624_v12  ;;  %6676 = vmatmul.mubr.bf16.gmra.mrb[32].mxu1 %v10538_v13  ;;  %v460_v11 = vld [vmem:[%s13737_s5 + $0x148] sm:$0xff]  ;;  %v10317_v19 = vcombine.high %v452_v9, %v468_v10 }
 0x147   : > { %8220 = vmatmul.mubr.bf16.gmra.mrb[32].mxu0 %v10554_v14  ;;  %6685 = vmatprep.mubr.bf16.mxu1 %v10571_v15  ;;  %v476_v12 = vld [vmem:[%s13737_s5 + $0x1c8] sm:$0xff]  ;;  %v10284_v15 = vcombine.low %v420_v1, %v436_v2 }
 0x148   : > { %8229 = vmatprep.mubr.bf16.mxu0 %v10587_v16  ;;  %v12619_v13 = vld [vmem:[%s13745_s6 + $0x200] ss:$8 sps:$4 sm:$0xff]   ;;  %v10300_v16 = vcombine.low %v428_v3, %v444_v4  ;;  %v10333_v20 = vcombine.high %v460_v11, %v476_v12  ;;  %v12633_v27 = vld [vmem:[%s13745_s6 + $0x224] ss:$8 sps:$4 sm:$0xff]   ;;  %v12663_v3 = vld [vmem:[%s13745_s6 + $0x274] ss:$8 sps:$4 sm:$0xff]  }
 0x149   : > { %v12622_v14 = vld [vmem:[%s13745_s6 + $0xa00] ss:$8 sps:$4 sm:$0xff]   ;;  %v12636_v28 = vld [vmem:[%s13745_s6 + $0xa24] ss:$8 sps:$4 sm:$0xff]   ;;  %v12666_v4 = vld [vmem:[%s13745_s6 + $0xa74] ss:$8 sps:$4 sm:$0xff]  }
 0x14a   : > { %v12645_v43 = vld [vmem:[%s13745_s6 + $0x244] ss:$8 sps:$4 sm:$0xff]  }
 0x14b   : > { %v12648_v44 = vld [vmem:[%s13745_s6 + $0xa44] ss:$8 sps:$4 sm:$0xff]  }
 0x14c   : > { %v12657_v59 = vld [vmem:[%s13745_s6 + $0x264] ss:$8 sps:$4 sm:$0xff]  }
 0x14d   : > { %v12660_v60 = vld [vmem:[%s13745_s6 + $0xa64] ss:$8 sps:$4 sm:$0xff]  }
 0x14e   : > { %6686 = vmatmul.mubr.bf16.gmra.mrb[36].mxu1 %v10570_v21  ;;  %v12625_v21 = vld [vmem:[%s13745_s6 + $0x210] ss:$8 sps:$4 sm:$0xff]  }
 0x14f   : > { %8230 = vmatmul.mubr.bf16.gmra.mrb[36].mxu0 %v10586_v22  ;;  %6695 = vmatprep.mubr.bf16.mxu1 %v10603_v23  ;;  %v12628_v22 = vld [vmem:[%s13745_s6 + $0xa10] ss:$8 sps:$4 sm:$0xff]   ;;  %v484_v23 = vld [vmem:[%s13737_s5 + $0x208] sm:$0xff] }
 0x150   : > { %8239 = vmatprep.mubr.bf16.mxu0 %v10619_v24  ;;  %v500_v24 = vld [vmem:[%s13737_s5 + $0x288] sm:$0xff] }
 0x151   : > { %v10349_v33 = vcombine.high %v484_v23, %v500_v24 }
 0x156   : > { %6696 = vmatmul.mubr.bf16.gmra.mrb[40].mxu1 %v10602_v29  ;;  %v10316_v29 = vcombine.low %v452_v9, %v468_v10  ;;  %v12661_v9 = vld [vmem:[%s13745_s6 + $0x270] ss:$8 sps:$4 sm:$0xff]  }
 0x157   : > { %8240 = vmatmul.mubr.bf16.gmra.mrb[40].mxu0 %v10618_v30  ;;  %6705 = vmatprep.mubr.bf16.mxu1 %v10635_v31  ;;  %v10332_v30 = vcombine.low %v460_v11, %v476_v12  ;;  %v12631_v31 = vld [vmem:[%s13745_s6 + $0x220] ss:$8 sps:$4 sm:$0xff]   ;;  %v12664_v10 = vld [vmem:[%s13745_s6 + $0xa70] ss:$8 sps:$4 sm:$0xff]   ;;  %v12669_v11 = vld [vmem:[%s13745_s6 + $0x284] ss:$8 sps:$4 sm:$0xff]  }
 0x158   : > { %8249 = vmatprep.mubr.bf16.mxu0 %v10651_v32  ;;  %v12634_v32 = vld [vmem:[%s13745_s6 + $0xa20] ss:$8 sps:$4 sm:$0xff]   ;;  %v12672_v12 = vld [vmem:[%s13745_s6 + $0xa84] ss:$8 sps:$4 sm:$0xff]  }
 0x15e   : > { %6706 = vmatmul.mubr.bf16.gmra.mrb[44].mxu1 %v10634_v37  ;;  %v516_v37 = vld [vmem:[%s13737_s5 + $0x308] sm:$0xff] }
 0x15f   : > { %8250 = vmatmul.mubr.bf16.gmra.mrb[44].mxu0 %v10650_v38  ;;  %6715 = vmatprep.mubr.bf16.mxu1 %v10667_v39  ;;  %v532_v38 = vld [vmem:[%s13737_s5 + $0x388] sm:$0xff] }
 0x160   : > { %8259 = vmatprep.mubr.bf16.mxu0 %v10683_v40  ;;  %v524_v39 = vld [vmem:[%s13737_s5 + $0x348] sm:$0xff]  ;;  %v10381_v49 = vcombine.high %v516_v37, %v532_v38 }
 0x161   : > { %v540_v40 = vld [vmem:[%s13737_s5 + $0x3c8] sm:$0xff] }
 0x162   : > { %v10397_v50 = vcombine.high %v524_v39, %v540_v40 }
 0x166   : > { %6716 = vmatmul.mubr.bf16.gmra.mrb[48].mxu1 %v10666_v45  ;;  %v10348_v45 = vcombine.low %v484_v23, %v500_v24  ;;  %v620_v23 = vld [vmem:[%s13737_s5 + $0x648] sm:$0xff] }
 0x167   : > { %8260 = vmatmul.mubr.bf16.gmra.mrb[48].mxu0 %v10682_v46  ;;  %6725 = vmatprep.mubr.bf16.mxu1 %v10699_v47  ;;  %v10364_v46 = vcombine.low %v492_v25, %v508_v26  ;;  %v12643_v47 = vld [vmem:[%s13745_s6 + $0x240] ss:$8 sps:$4 sm:$0xff]   ;;  %v12673_v25 = vld [vmem:[%s13745_s6 + $0x290] ss:$8 sps:$4 sm:$0xff]  }
 0x168   : > { %8269 = vmatprep.mubr.bf16.mxu0 %v10715_v48  ;;  %v12646_v48 = vld [vmem:[%s13745_s6 + $0xa40] ss:$8 sps:$4 sm:$0xff]   ;;  %v12676_v26 = vld [vmem:[%s13745_s6 + $0xa90] ss:$8 sps:$4 sm:$0xff]  }
 0x169   : > { %v636_v24 = vld [vmem:[%s13737_s5 + $0x6c8] sm:$0xff] }
 0x16e   : > { %6726 = vmatmul.mubr.bf16.gmra.mrb[52].mxu1 %v10698_v53  ;;  %v548_v53 = vld [vmem:[%s13737_s5 + $0x408] sm:$0xff] }
 0x16f   : > { %8270 = vmatmul.mubr.bf16.gmra.mrb[52].mxu0 %v10714_v54  ;;  %6735 = vmatprep.mubr.bf16.mxu1 %v10731_v55  ;;  %v564_v54 = vld [vmem:[%s13737_s5 + $0x488] sm:$0xff] }
 0x170   : > { %8279 = vmatprep.mubr.bf16.mxu0 %v10747_v56  ;;  %v556_v55 = vld [vmem:[%s13737_s5 + $0x448] sm:$0xff]  ;;  %v10413_v1 = vcombine.high %v548_v53, %v564_v54 }
 0x171   : > { %v572_v56 = vld [vmem:[%s13737_s5 + $0x4c8] sm:$0xff] }
 0x172   : > { %v10429_v2 = vcombine.high %v556_v55, %v572_v56 }
 0x176   : > { %6736 = vmatmul.mubr.bf16.gmra.mrb[56].mxu1 %v10730_v61  ;;  %v10380_v61 = vcombine.low %v516_v37, %v532_v38  ;;  %v644_v37 = vld [vmem:[%s13737_s5 + $0x708] sm:$0xff] }
 0x177   : > { %8280 = vmatmul.mubr.bf16.gmra.mrb[56].mxu0 %v10746_v62  ;;  %6745 = vmatprep.mubr.bf16.mxu1 %v10763_v63  ;;  %v10396_v62 = vcombine.low %v524_v39, %v540_v40  ;;  %v12655_v63 = vld [vmem:[%s13745_s6 + $0x260] ss:$8 sps:$4 sm:$0xff]  }
 0x178   : > { %8289 = vmatprep.mubr.bf16.mxu0 %v10779_v0  ;;  %v12658_v0 = vld [vmem:[%s13745_s6 + $0xa60] ss:$8 sps:$4 sm:$0xff]  }
 0x179   : > { %v660_v38 = vld [vmem:[%s13737_s5 + $0x788] sm:$0xff] }
 0x17a   : > { %v652_v39 = vld [vmem:[%s13737_s5 + $0x748] sm:$0xff] }
 0x17b   : > { %v668_v40 = vld [vmem:[%s13737_s5 + $0x7c8] sm:$0xff] }
 0x17e   : > { %6746 = vmatmul.mubr.bf16.gmra.mrb[60].mxu1 %v10762_v5  ;;  %v580_v5 = vld [vmem:[%s13737_s5 + $0x508] sm:$0xff] }
 0x17f   : > { %8290 = vmatmul.mubr.bf16.gmra.mrb[60].mxu0 %v10778_v6  ;;  %6788 = vmatprep.mubr.bf16.mxu1 %v10285_v7  ;;  %v596_v6 = vld [vmem:[%s13737_s5 + $0x588] sm:$0xff] }
 0x180   : > { %8332 = vmatprep.mubr.bf16.mxu0 %v10301_v8  ;;  %v588_v7 = vld [vmem:[%s13737_s5 + $0x548] sm:$0xff] }
 0x181   : > { %v604_v8 = vld [vmem:[%s13737_s5 + $0x5c8] sm:$0xff] }
 0x186   : > { %6789 = vmatmul.mubr.bf16.vlgmr.msra.gmra.mrb[0].mxu1 %v10284_v15  ;;  %v12667_v15 = vld [vmem:[%s13745_s6 + $0x280] ss:$8 sps:$4 sm:$0xff]  }
 0x187   : > { %8333 = vmatmul.mubr.bf16.vlgmr.msra.gmra.mrb[0].mxu0 %v10300_v16  ;;  %6950 = vmatpush1.bf16.msra.mxu1 %v12619_v13  ;;  %v10412_v13 = vcombine.low %v548_v53, %v564_v54  ;;  %v12670_v16 = vld [vmem:[%s13745_s6 + $0xa80] ss:$8 sps:$4 sm:$0xff]  }
 0x188   : > { %8494 = vmatpush1.bf16.msra.mxu0 %v12622_v14  ;;  %6798 = vmatprep.mubr.bf16.mxu1 %v10317_v19  ;;  %v10428_v14 = vcombine.low %v556_v55, %v572_v56  ;;  %v12675_v19 = vld [vmem:[%s13745_s6 + $0x294] ss:$8 sps:$4 sm:$0xff]   ;;  %v676_v53 = vld [vmem:[%s13737_s5 + $0x808] sm:$0xff] }
 0x189   : > { %8342 = vmatprep.mubr.bf16.mxu0 %v10333_v20  ;;  %6951 = vmatprep.subr.bf16.mxu1 %v12627_v17  ;;  %v10445_v17 = vcombine.high %v580_v5, %v596_v6  ;;  %v12678_v20 = vld [vmem:[%s13745_s6 + $0xa94] ss:$8 sps:$4 sm:$0xff]   ;;  %v692_v54 = vld [vmem:[%s13737_s5 + $0x888] sm:$0xff] }
 0x18a   : > { %8495 = vmatprep.subr.bf16.mxu0 %v12630_v18  ;;  %v10461_v18 = vcombine.high %v588_v7, %v604_v8  ;;  %v684_v55 = vld [vmem:[%s13737_s5 + $0x848] sm:$0xff] }
 0x18b   : > { %6952 = vmatpush1.bf16.msra.mxu1 %v12625_v21  ;;  %v612_v21 = vld [vmem:[%s13737_s5 + $0x608] sm:$0xff] }
 0x18c   : > { %8496 = vmatpush1.bf16.msra.mxu0 %v12628_v22  ;;  %6953 = vmatprep.subr.bf16.mxu1 %v12633_v27  ;;  %v628_v22 = vld [vmem:[%s13737_s5 + $0x688] sm:$0xff] }
 0x18d   : > { %8497 = vmatprep.subr.bf16.mxu0 %v12636_v28  ;;  %v12681_v27 = vld [vmem:[%s13745_s6 + $0x2a4] ss:$8 sps:$4 sm:$0xff]  }
 0x18e   : > { %6799 = vmatmul.mubr.bf16.gmra.mrb[4].mxu1 %v10316_v29  ;;  %v12684_v28 = vld [vmem:[%s13745_s6 + $0xaa4] ss:$8 sps:$4 sm:$0xff]   ;;  %v10444_v29 = vcombine.low %v580_v5, %v596_v6 }
 0x18f   : > { %8343 = vmatmul.mubr.bf16.gmra.mrb[4].mxu0 %v10332_v30  ;;  %6808 = vmatprep.mubr.bf16.mxu1 %v10349_v33  ;;  %v10460_v30 = vcombine.low %v588_v7, %v604_v8  ;;  %v10477_v33 = vcombine.high %v612_v21, %v628_v22  ;;  %v700_v56 = vld [vmem:[%s13737_s5 + $0x8c8] sm:$0xff] }
 0x190   : > { %8352 = vmatprep.mubr.bf16.mxu0 %v10365_v34  ;;  %6954 = vmatpush1.bf16.msra.mxu1 %v12631_v31  ;;  %v12679_v31 = vld [vmem:[%s13745_s6 + $0x2a0] ss:$8 sps:$4 sm:$0xff]   ;;  %v10493_v34 = vcombine.high %v620_v23, %v636_v24 }
 0x191   : > { %8498 = vmatpush1.bf16.msra.mxu0 %v12634_v32  ;;  %6955 = vmatprep.subr.bf16.mxu1 %v12639_v35  ;;  %v12682_v32 = vld [vmem:[%s13745_s6 + $0xaa0] ss:$8 sps:$4 sm:$0xff]   ;;  %v12687_v35 = vld [vmem:[%s13745_s6 + $0x2b4] ss:$8 sps:$4 sm:$0xff]  }
 0x192   : > { %8499 = vmatprep.subr.bf16.mxu0 %v12642_v36  ;;  %v12690_v36 = vld [vmem:[%s13745_s6 + $0xab4] ss:$8 sps:$4 sm:$0xff]   ;;  %v708_v5 = vld [vmem:[%s13737_s5 + $0x908] sm:$0xff] }
 0x193   : > { %v724_v6 = vld [vmem:[%s13737_s5 + $0x988] sm:$0xff] }
 0x194   : > { %6956 = vmatpush1.bf16.msra.mxu1 %v12637_v41  ;;  %v12685_v41 = vld [vmem:[%s13745_s6 + $0x2b0] ss:$8 sps:$4 sm:$0xff]   ;;  %v716_v7 = vld [vmem:[%s13737_s5 + $0x948] sm:$0xff] }
 0x195   : > { %8500 = vmatpush1.bf16.msra.mxu0 %v12640_v42  ;;  %6957 = vmatprep.subr.bf16.mxu1 %v12645_v43  ;;  %v12688_v42 = vld [vmem:[%s13745_s6 + $0xab0] ss:$8 sps:$4 sm:$0xff]   ;;  %v12693_v43 = vld [vmem:[%s13745_s6 + $0x2c4] ss:$8 sps:$4 sm:$0xff]  }
 0x196   : > { %8501 = vmatprep.subr.bf16.mxu0 %v12648_v44  ;;  %6809 = vmatmul.mubr.bf16.gmra.mrb[8].mxu1 %v10348_v45  ;;  %v12696_v44 = vld [vmem:[%s13745_s6 + $0xac4] ss:$8 sps:$4 sm:$0xff]   ;;  %v10476_v45 = vcombine.low %v612_v21, %v628_v22  ;;  %v10572_v21 = vcombine.low %v708_v5, %v724_v6 }
 0x197   : > { %8353 = vmatmul.mubr.bf16.gmra.mrb[8].mxu0 %v10364_v46  ;;  %6818 = vmatprep.mubr.bf16.mxu1 %v10381_v49  ;;  %v10492_v46 = vcombine.low %v620_v23, %v636_v24  ;;  %v10509_v49 = vcombine.high %v644_v37, %v660_v38  ;;  %v732_v8 = vld [vmem:[%s13737_s5 + $0x9c8] sm:$0xff] }
 0x198   : > { %8362 = vmatprep.mubr.bf16.mxu0 %v10397_v50  ;;  %6958 = vmatpush1.bf16.msra.mxu1 %v12643_v47  ;;  %v12691_v47 = vld [vmem:[%s13745_s6 + $0x2c0] ss:$8 sps:$4 sm:$0xff]   ;;  %v10525_v50 = vcombine.high %v652_v39, %v668_v40  ;;  %v10588_v22 = vcombine.low %v716_v7, %v732_v8 }
 0x199   : > { %8502 = vmatpush1.bf16.msra.mxu0 %v12646_v48  ;;  %6959 = vmatprep.subr.bf16.mxu1 %v12651_v51  ;;  %v12694_v48 = vld [vmem:[%s13745_s6 + $0xac0] ss:$8 sps:$4 sm:$0xff]   ;;  %v12699_v51 = vld [vmem:[%s13745_s6 + $0x2d4] ss:$8 sps:$4 sm:$0xff]  }
 0x19a   : > { %8503 = vmatprep.subr.bf16.mxu0 %v12654_v52  ;;  %v12702_v52 = vld [vmem:[%s13745_s6 + $0xad4] ss:$8 sps:$4 sm:$0xff]  }
 0x19c   : > { %6960 = vmatpush1.bf16.msra.mxu1 %v12649_v57  ;;  %v12697_v57 = vld [vmem:[%s13745_s6 + $0x2d0] ss:$8 sps:$4 sm:$0xff]  }
 0x19d   : > { %8504 = vmatpush1.bf16.msra.mxu0 %v12652_v58  ;;  %6961 = vmatprep.subr.bf16.mxu1 %v12657_v59  ;;  %v12700_v58 = vld [vmem:[%s13745_s6 + $0xad0] ss:$8 sps:$4 sm:$0xff]   ;;  %v12705_v59 = vld [vmem:[%s13745_s6 + $0x2e4] ss:$8 sps:$4 sm:$0xff]  }
 0x19e   : > { %8505 = vmatprep.subr.bf16.mxu0 %v12660_v60  ;;  %6819 = vmatmul.mubr.bf16.gmra.mrb[12].mxu1 %v10380_v61  ;;  %v12708_v60 = vld [vmem:[%s13745_s6 + $0xae4] ss:$8 sps:$4 sm:$0xff]   ;;  %v10508_v61 = vcombine.low %v644_v37, %v660_v38 }
 0x19f   : > { %8363 = vmatmul.mubr.bf16.gmra.mrb[12].mxu0 %v10396_v62  ;;  %6828 = vmatprep.mubr.bf16.mxu1 %v10413_v1  ;;  %v10524_v62 = vcombine.low %v652_v39, %v668_v40  ;;  %v10541_v1 = vcombine.high %v676_v53, %v692_v54 }
 0x1a0   : > { %8372 = vmatprep.mubr.bf16.mxu0 %v10429_v2  ;;  %6962 = vmatpush1.bf16.msra.mxu1 %v12655_v63  ;;  %v12703_v63 = vld [vmem:[%s13745_s6 + $0x2e0] ss:$8 sps:$4 sm:$0xff]   ;;  %v10557_v2 = vcombine.high %v684_v55, %v700_v56 }
 0x1a1   : > { %8506 = vmatpush1.bf16.msra.mxu0 %v12658_v0  ;;  %6963 = vmatprep.subr.bf16.mxu1 %v12663_v3  ;;  %v12706_v0 = vld [vmem:[%s13745_s6 + $0xae0] ss:$8 sps:$4 sm:$0xff]   ;;  %v12711_v3 = vld [vmem:[%s13745_s6 + $0x2f4] ss:$8 sps:$4 sm:$0xff]  }
 0x1a2   : > { %8507 = vmatprep.subr.bf16.mxu0 %v12666_v4  ;;  %v12714_v4 = vld [vmem:[%s13745_s6 + $0xaf4] ss:$8 sps:$4 sm:$0xff]  }
 0x1a4   : > { %6964 = vmatpush1.bf16.msra.mxu1 %v12661_v9  ;;  %v12709_v9 = vld [vmem:[%s13745_s6 + $0x2f0] ss:$8 sps:$4 sm:$0xff]  }
 0x1a5   : > { %8508 = vmatpush1.bf16.msra.mxu0 %v12664_v10  ;;  %6965 = vmatprep.subr.bf16.mxu1 %v12669_v11  ;;  %v12712_v10 = vld [vmem:[%s13745_s6 + $0xaf0] ss:$8 sps:$4 sm:$0xff]   ;;  %v12717_v11 = vld [vmem:[%s13745_s6 + $0x304] ss:$8 sps:$4 sm:$0xff]  }
 0x1a6   : > { %8509 = vmatprep.subr.bf16.mxu0 %v12672_v12  ;;  %6829 = vmatmul.mubr.bf16.gmra.mrb[16].mxu1 %v10412_v13  ;;  %v12720_v12 = vld [vmem:[%s13745_s6 + $0xb04] ss:$8 sps:$4 sm:$0xff]   ;;  %v10540_v13 = vcombine.low %v676_v53, %v692_v54 }
 0x1a7   : > { %8373 = vmatmul.mubr.bf16.gmra.mrb[16].mxu0 %v10428_v14  ;;  %6838 = vmatprep.mubr.bf16.mxu1 %v10445_v17  ;;  %v10556_v14 = vcombine.low %v684_v55, %v700_v56  ;;  %v740_v17 = vld [vmem:[%s13737_s5 + $0xa08] sm:$0xff] }
 0x1a8   : > { %8382 = vmatprep.mubr.bf16.mxu0 %v10461_v18  ;;  %6966 = vmatpush1.bf16.msra.mxu1 %v12667_v15  ;;  %v10573_v15 = vcombine.high %v708_v5, %v724_v6  ;;  %v756_v18 = vld [vmem:[%s13737_s5 + $0xa88] sm:$0xff] }
 0x1a9   : > { %8510 = vmatpush1.bf16.msra.mxu0 %v12670_v16  ;;  %6967 = vmatprep.subr.bf16.mxu1 %v12675_v19  ;;  %v10589_v16 = vcombine.high %v716_v7, %v732_v8  ;;  %v748_v19 = vld [vmem:[%s13737_s5 + $0xa48] sm:$0xff]  ;;  %v10605_v23 = vcombine.high %v740_v17, %v756_v18 }
 0x1aa   : > { %8511 = vmatprep.subr.bf16.mxu0 %v12678_v20  ;;  %v764_v20 = vld [vmem:[%s13737_s5 + $0xac8] sm:$0xff] }
 0x1ab   : > { %v10621_v24 = vcombine.high %v748_v19, %v764_v20 }
 0x1ac   : > { %6968 = vmatpush1.bf16.msra.mxu1 %v12673_v25  ;;  %v772_v25 = vld [vmem:[%s13737_s5 + $0xb08] sm:$0xff] }
 0x1ad   : > { %8512 = vmatpush1.bf16.msra.mxu0 %v12676_v26  ;;  %6969 = vmatprep.subr.bf16.mxu1 %v12681_v27  ;;  %v788_v26 = vld [vmem:[%s13737_s5 + $0xb88] sm:$0xff] }
 0x1ae   : > { %8513 = vmatprep.subr.bf16.mxu0 %v12684_v28  ;;  %6839 = vmatmul.mubr.bf16.gmra.mrb[20].mxu1 %v10444_v29  ;;  %v780_v27 = vld [vmem:[%s13737_s5 + $0xb48] sm:$0xff]  ;;  %v10604_v29 = vcombine.low %v740_v17, %v756_v18  ;;  %v10636_v37 = vcombine.low %v772_v25, %v788_v26 }
 0x1af   : > { %8383 = vmatmul.mubr.bf16.gmra.mrb[20].mxu0 %v10460_v30  ;;  %6848 = vmatprep.mubr.bf16.mxu1 %v10477_v33  ;;  %v796_v28 = vld [vmem:[%s13737_s5 + $0xbc8] sm:$0xff]  ;;  %v10620_v30 = vcombine.low %v748_v19, %v764_v20  ;;  %v12723_v19 = vld [vmem:[%s13745_s6 + $0x314] ss:$8 sps:$4 sm:$0xff]  }
 0x1b0   : > { %8392 = vmatprep.mubr.bf16.mxu0 %v10493_v34  ;;  %6970 = vmatpush1.bf16.msra.mxu1 %v12679_v31  ;;  %v10637_v31 = vcombine.high %v772_v25, %v788_v26  ;;  %v804_v33 = vld [vmem:[%s13737_s5 + $0xc08] sm:$0xff]  ;;  %v10652_v38 = vcombine.low %v780_v27, %v796_v28  ;;  %v12726_v20 = vld [vmem:[%s13745_s6 + $0xb14] ss:$8 sps:$4 sm:$0xff]  }
 0x1b1   : > { %8514 = vmatpush1.bf16.msra.mxu0 %v12682_v32  ;;  %6971 = vmatprep.subr.bf16.mxu1 %v12687_v35  ;;  %v10653_v32 = vcombine.high %v780_v27, %v796_v28  ;;  %v820_v34 = vld [vmem:[%s13737_s5 + $0xc88] sm:$0xff]  ;;  %v493_v25 = vld [vmem:[%s13737_s5 + $0x250] sm:$0xff] }
 0x1b2   : > { %8515 = vmatprep.subr.bf16.mxu0 %v12690_v36  ;;  %v812_v35 = vld [vmem:[%s13737_s5 + $0xc48] sm:$0xff]  ;;  %v10669_v39 = vcombine.high %v804_v33, %v820_v34  ;;  %v509_v26 = vld [vmem:[%s13737_s5 + $0x2d0] sm:$0xff] }
 0x1b3   : > { %v828_v36 = vld [vmem:[%s13737_s5 + $0xcc8] sm:$0xff] }
 0x1b4   : > { %6972 = vmatpush1.bf16.msra.mxu1 %v12685_v41  ;;  %v10685_v40 = vcombine.high %v812_v35, %v828_v36  ;;  %v836_v41 = vld [vmem:[%s13737_s5 + $0xd08] sm:$0xff] }
 0x1b5   : > { %8516 = vmatpush1.bf16.msra.mxu0 %v12688_v42  ;;  %6973 = vmatprep.subr.bf16.mxu1 %v12693_v43  ;;  %v852_v42 = vld [vmem:[%s13737_s5 + $0xd88] sm:$0xff] }
 0x1b6   : > { %8517 = vmatprep.subr.bf16.mxu0 %v12696_v44  ;;  %6849 = vmatmul.mubr.bf16.gmra.mrb[24].mxu1 %v10476_v45  ;;  %v844_v43 = vld [vmem:[%s13737_s5 + $0xd48] sm:$0xff]  ;;  %v10668_v45 = vcombine.low %v804_v33, %v820_v34  ;;  %v10700_v53 = vcombine.low %v836_v41, %v852_v42 }
 0x1b7   : > { %8393 = vmatmul.mubr.bf16.gmra.mrb[24].mxu0 %v10492_v46  ;;  %6858 = vmatprep.mubr.bf16.mxu1 %v10509_v49  ;;  %v860_v44 = vld [vmem:[%s13737_s5 + $0xdc8] sm:$0xff]  ;;  %v10684_v46 = vcombine.low %v812_v35, %v828_v36  ;;  %v12735_v35 = vld [vmem:[%s13745_s6 + $0x334] ss:$8 sps:$4 sm:$0xff]  }
 0x1b8   : > { %8402 = vmatprep.mubr.bf16.mxu0 %v10525_v50  ;;  %6974 = vmatpush1.bf16.msra.mxu1 %v12691_v47  ;;  %v10701_v47 = vcombine.high %v836_v41, %v852_v42  ;;  %v868_v49 = vld [vmem:[%s13737_s5 + $0xe08] sm:$0xff]  ;;  %v10716_v54 = vcombine.low %v844_v43, %v860_v44  ;;  %v12738_v36 = vld [vmem:[%s13745_s6 + $0xb34] ss:$8 sps:$4 sm:$0xff]   ;;  %v12733_v41 = vld [vmem:[%s13745_s6 + $0x330] ss:$8 sps:$4 sm:$0xff]  }
 0x1b9   : > { %8518 = vmatpush1.bf16.msra.mxu0 %v12694_v48  ;;  %6975 = vmatprep.subr.bf16.mxu1 %v12699_v51  ;;  %v10717_v48 = vcombine.high %v844_v43, %v860_v44  ;;  %v884_v50 = vld [vmem:[%s13737_s5 + $0xe88] sm:$0xff]  ;;  %v12736_v42 = vld [vmem:[%s13745_s6 + $0xb30] ss:$8 sps:$4 sm:$0xff]  }
 0x1ba   : > { %8519 = vmatprep.subr.bf16.mxu0 %v12702_v52  ;;  %v876_v51 = vld [vmem:[%s13737_s5 + $0xe48] sm:$0xff]  ;;  %v10733_v55 = vcombine.high %v868_v49, %v884_v50 }
 0x1bb   : > { %v892_v52 = vld [vmem:[%s13737_s5 + $0xec8] sm:$0xff] }
 0x1bc   : > { %6976 = vmatpush1.bf16.msra.mxu1 %v12697_v57  ;;  %v10749_v56 = vcombine.high %v876_v51, %v892_v52  ;;  %v900_v57 = vld [vmem:[%s13737_s5 + $0xf08] sm:$0xff] }
 0x1bd   : > { %8520 = vmatpush1.bf16.msra.mxu0 %v12700_v58  ;;  %6977 = vmatprep.subr.bf16.mxu1 %v12705_v59  ;;  %v916_v58 = vld [vmem:[%s13737_s5 + $0xf88] sm:$0xff] }
 0x1be   : > { %8521 = vmatprep.subr.bf16.mxu0 %v12708_v60  ;;  %6859 = vmatmul.mubr.bf16.gmra.mrb[28].mxu1 %v10508_v61  ;;  %v908_v59 = vld [vmem:[%s13737_s5 + $0xf48] sm:$0xff]  ;;  %v10732_v61 = vcombine.low %v868_v49, %v884_v50  ;;  %v10764_v5 = vcombine.low %v900_v57, %v916_v58 }
 0x1bf   : > { %8403 = vmatmul.mubr.bf16.gmra.mrb[28].mxu0 %v10524_v62  ;;  %6868 = vmatprep.mubr.bf16.mxu1 %v10541_v1  ;;  %v924_v60 = vld [vmem:[%s13737_s5 + $0xfc8] sm:$0xff]  ;;  %v10748_v62 = vcombine.low %v876_v51, %v892_v52  ;;  %v421_v1 = vld [vmem:[%s13737_s5 + $0x10] sm:$0xff] }
 0x1c0   : > { %8412 = vmatprep.mubr.bf16.mxu0 %v10557_v2  ;;  %6978 = vmatpush1.bf16.msra.mxu1 %v12703_v63  ;;  %v10765_v63 = vcombine.high %v900_v57, %v916_v58  ;;  %v437_v2 = vld [vmem:[%s13737_s5 + $0x90] sm:$0xff]  ;;  %v10780_v6 = vcombine.low %v908_v59, %v924_v60  ;;  %v12729_v27 = vld [vmem:[%s13745_s6 + $0x324] ss:$8 sps:$4 sm:$0xff]   ;;  %v12727_v33 = vld [vmem:[%s13745_s6 + $0x320] ss:$8 sps:$4 sm:$0xff]  }
 0x1c1   : > { %8522 = vmatpush1.bf16.msra.mxu0 %v12706_v0  ;;  %6979 = vmatprep.subr.bf16.mxu1 %v12711_v3  ;;  %v10781_v0 = vcombine.high %v908_v59, %v924_v60  ;;  %v429_v3 = vld [vmem:[%s13737_s5 + $0x50] sm:$0xff]  ;;  %v10287_v7 = vcombine.high %v421_v1, %v437_v2  ;;  %v12732_v28 = vld [vmem:[%s13745_s6 + $0xb24] ss:$8 sps:$4 sm:$0xff]   ;;  %v12730_v34 = vld [vmem:[%s13745_s6 + $0xb20] ss:$8 sps:$4 sm:$0xff]  }
 0x1c2   : > { %8523 = vmatprep.subr.bf16.mxu0 %v12714_v4  ;;  %v445_v4 = vld [vmem:[%s13737_s5 + $0xd0] sm:$0xff]  ;;  %v12741_v43 = vld [vmem:[%s13745_s6 + $0x344] ss:$8 sps:$4 sm:$0xff]   ;;  %v12739_v49 = vld [vmem:[%s13745_s6 + $0x340] ss:$8 sps:$4 sm:$0xff]  }
 0x1c3   : > { %v10303_v8 = vcombine.high %v429_v3, %v445_v4  ;;  %v12744_v44 = vld [vmem:[%s13745_s6 + $0xb44] ss:$8 sps:$4 sm:$0xff]   ;;  %v12742_v50 = vld [vmem:[%s13745_s6 + $0xb40] ss:$8 sps:$4 sm:$0xff]   ;;  %v12747_v51 = vld [vmem:[%s13745_s6 + $0x354] ss:$8 sps:$4 sm:$0xff]  }
 0x1c4   : > { %6980 = vmatpush1.bf16.msra.mxu1 %v12709_v9  ;;  %v453_v9 = vld [vmem:[%s13737_s5 + $0x110] sm:$0xff]  ;;  %v12753_v59 = vld [vmem:[%s13745_s6 + $0x364] ss:$8 sps:$4 sm:$0xff]  }
 0x1c5   : > { %8524 = vmatpush1.bf16.msra.mxu0 %v12712_v10  ;;  %7142 = vmatprep.subr.bf16.mxu1 %v12717_v11  ;;  %v469_v10 = vld [vmem:[%s13737_s5 + $0x190] sm:$0xff]  ;;  %v12756_v60 = vld [vmem:[%s13745_s6 + $0xb64] ss:$8 sps:$4 sm:$0xff]  }
 0x1c6   : > { %8686 = vmatprep.subr.bf16.mxu0 %v12720_v12  ;;  %6869 = vmatmul.mubr.bf16.gmra.mrb[32].mxu1 %v10540_v13  ;;  %v461_v11 = vld [vmem:[%s13737_s5 + $0x150] sm:$0xff]  ;;  %v12715_v13 = vld [vmem:[%s13745_s6 + $0x300] ss:$8 sps:$4 sm:$0xff]   ;;  %v10319_v17 = vcombine.high %v453_v9, %v469_v10 }
 0x1c7   : > { %8413 = vmatmul.mubr.bf16.gmra.mrb[32].mxu0 %v10556_v14  ;;  %6878 = vmatprep.mubr.bf16.mxu1 %v10573_v15  ;;  %v477_v12 = vld [vmem:[%s13737_s5 + $0x1d0] sm:$0xff]  ;;  %v12718_v14 = vld [vmem:[%s13745_s6 + $0xb00] ss:$8 sps:$4 sm:$0xff]   ;;  %v10286_v15 = vcombine.low %v421_v1, %v437_v2 }
 0x1c8   : > { %8422 = vmatprep.mubr.bf16.mxu0 %v10589_v16  ;;  %v10302_v16 = vcombine.low %v429_v3, %v445_v4  ;;  %v10335_v18 = vcombine.high %v461_v11, %v477_v12  ;;  %v12750_v52 = vld [vmem:[%s13745_s6 + $0xb54] ss:$8 sps:$4 sm:$0xff]   ;;  %v12745_v57 = vld [vmem:[%s13745_s6 + $0x350] ss:$8 sps:$4 sm:$0xff]   ;;  %v12751_v1 = vld [vmem:[%s13745_s6 + $0x360] ss:$8 sps:$4 sm:$0xff]  }
 0x1c9   : > { %v12748_v58 = vld [vmem:[%s13745_s6 + $0xb50] ss:$8 sps:$4 sm:$0xff]   ;;  %v12754_v2 = vld [vmem:[%s13745_s6 + $0xb60] ss:$8 sps:$4 sm:$0xff]   ;;  %v12759_v3 = vld [vmem:[%s13745_s6 + $0x374] ss:$8 sps:$4 sm:$0xff]  }
 0x1ca   : > { %v12762_v4 = vld [vmem:[%s13745_s6 + $0xb74] ss:$8 sps:$4 sm:$0xff]  }
 0x1ce   : > { %6879 = vmatmul.mubr.bf16.gmra.mrb[36].mxu1 %v10572_v21  ;;  %v12721_v21 = vld [vmem:[%s13745_s6 + $0x310] ss:$8 sps:$4 sm:$0xff]  }
 0x1cf   : > { %8423 = vmatmul.mubr.bf16.gmra.mrb[36].mxu0 %v10588_v22  ;;  %6888 = vmatprep.mubr.bf16.mxu1 %v10605_v23  ;;  %v12724_v22 = vld [vmem:[%s13745_s6 + $0xb10] ss:$8 sps:$4 sm:$0xff]  }
 0x1d0   : > { %8432 = vmatprep.mubr.bf16.mxu0 %v10621_v24  ;;  %v485_v23 = vld [vmem:[%s13737_s5 + $0x210] sm:$0xff] }
 0x1d1   : > { %v501_v24 = vld [vmem:[%s13737_s5 + $0x290] sm:$0xff] }
 0x1d6   : > { %6889 = vmatmul.mubr.bf16.gmra.mrb[40].mxu1 %v10604_v29  ;;  %v10318_v29 = vcombine.low %v453_v9, %v469_v10  ;;  %v12757_v9 = vld [vmem:[%s13745_s6 + $0x370] ss:$8 sps:$4 sm:$0xff]  }
 0x1d7   : > { %8433 = vmatmul.mubr.bf16.gmra.mrb[40].mxu0 %v10620_v30  ;;  %6898 = vmatprep.mubr.bf16.mxu1 %v10637_v31  ;;  %v10334_v30 = vcombine.low %v461_v11, %v477_v12  ;;  %v10351_v31 = vcombine.high %v485_v23, %v501_v24  ;;  %v12760_v10 = vld [vmem:[%s13745_s6 + $0xb70] ss:$8 sps:$4 sm:$0xff]   ;;  %v12765_v11 = vld [vmem:[%s13745_s6 + $0x384] ss:$8 sps:$4 sm:$0xff]  }
 0x1d8   : > { %8442 = vmatprep.mubr.bf16.mxu0 %v10653_v32  ;;  %v10367_v32 = vcombine.high %v493_v25, %v509_v26  ;;  %v12768_v12 = vld [vmem:[%s13745_s6 + $0xb84] ss:$8 sps:$4 sm:$0xff]  }
 0x1de   : > { %6899 = vmatmul.mubr.bf16.gmra.mrb[44].mxu1 %v10636_v37  ;;  %v517_v37 = vld [vmem:[%s13737_s5 + $0x310] sm:$0xff] }
 0x1df   : > { %8443 = vmatmul.mubr.bf16.gmra.mrb[44].mxu0 %v10652_v38  ;;  %6908 = vmatprep.mubr.bf16.mxu1 %v10669_v39  ;;  %v533_v38 = vld [vmem:[%s13737_s5 + $0x390] sm:$0xff] }
 0x1e0   : > { %8452 = vmatprep.mubr.bf16.mxu0 %v10685_v40  ;;  %v525_v39 = vld [vmem:[%s13737_s5 + $0x350] sm:$0xff] }
 0x1e1   : > { %v541_v40 = vld [vmem:[%s13737_s5 + $0x3d0] sm:$0xff] }
 0x1e6   : > { %6909 = vmatmul.mubr.bf16.gmra.mrb[48].mxu1 %v10668_v45  ;;  %v10350_v45 = vcombine.low %v485_v23, %v501_v24  ;;  %v621_v23 = vld [vmem:[%s13737_s5 + $0x650] sm:$0xff] }
 0x1e7   : > { %8453 = vmatmul.mubr.bf16.gmra.mrb[48].mxu0 %v10684_v46  ;;  %6918 = vmatprep.mubr.bf16.mxu1 %v10701_v47  ;;  %v10366_v46 = vcombine.low %v493_v25, %v509_v26  ;;  %v10383_v47 = vcombine.high %v517_v37, %v533_v38  ;;  %v637_v24 = vld [vmem:[%s13737_s5 + $0x6d0] sm:$0xff] }
 0x1e8   : > { %8462 = vmatprep.mubr.bf16.mxu0 %v10717_v48  ;;  %v10399_v48 = vcombine.high %v525_v39, %v541_v40  ;;  %v12769_v25 = vld [vmem:[%s13745_s6 + $0x390] ss:$8 sps:$4 sm:$0xff]  }
 0x1e9   : > { %v12772_v26 = vld [vmem:[%s13745_s6 + $0xb90] ss:$8 sps:$4 sm:$0xff]  }
 0x1ee   : > { %6919 = vmatmul.mubr.bf16.gmra.mrb[52].mxu1 %v10700_v53  ;;  %v549_v53 = vld [vmem:[%s13737_s5 + $0x410] sm:$0xff] }
 0x1ef   : > { %8463 = vmatmul.mubr.bf16.gmra.mrb[52].mxu0 %v10716_v54  ;;  %6928 = vmatprep.mubr.bf16.mxu1 %v10733_v55  ;;  %v565_v54 = vld [vmem:[%s13737_s5 + $0x490] sm:$0xff] }
 0x1f0   : > { %8472 = vmatprep.mubr.bf16.mxu0 %v10749_v56  ;;  %v557_v55 = vld [vmem:[%s13737_s5 + $0x450] sm:$0xff] }
 0x1f1   : > { %v573_v56 = vld [vmem:[%s13737_s5 + $0x4d0] sm:$0xff] }
 0x1f6   : > { %6929 = vmatmul.mubr.bf16.gmra.mrb[56].mxu1 %v10732_v61  ;;  %v10382_v61 = vcombine.low %v517_v37, %v533_v38  ;;  %v645_v37 = vld [vmem:[%s13737_s5 + $0x710] sm:$0xff] }
 0x1f7   : > { %8473 = vmatmul.mubr.bf16.gmra.mrb[56].mxu0 %v10748_v62  ;;  %6938 = vmatprep.mubr.bf16.mxu1 %v10765_v63  ;;  %v10398_v62 = vcombine.low %v525_v39, %v541_v40  ;;  %v10415_v63 = vcombine.high %v549_v53, %v565_v54  ;;  %v661_v38 = vld [vmem:[%s13737_s5 + $0x790] sm:$0xff] }
 0x1f8   : > { %8482 = vmatprep.mubr.bf16.mxu0 %v10781_v0  ;;  %v10431_v0 = vcombine.high %v557_v55, %v573_v56  ;;  %v653_v39 = vld [vmem:[%s13737_s5 + $0x750] sm:$0xff] }
 0x1f9   : > { %v669_v40 = vld [vmem:[%s13737_s5 + $0x7d0] sm:$0xff] }
 0x1fe   : > { %6939 = vmatmul.mubr.bf16.gmra.mrb[60].mxu1 %v10764_v5  ;;  %v581_v5 = vld [vmem:[%s13737_s5 + $0x510] sm:$0xff] }
 0x1ff   : > { %8483 = vmatmul.mubr.bf16.gmra.mrb[60].mxu0 %v10780_v6  ;;  %6981 = vmatprep.mubr.bf16.mxu1 %v10287_v7  ;;  %v597_v6 = vld [vmem:[%s13737_s5 + $0x590] sm:$0xff] }
 0x200   : > { %8525 = vmatprep.mubr.bf16.mxu0 %v10303_v8  ;;  %v589_v7 = vld [vmem:[%s13737_s5 + $0x550] sm:$0xff] }
 0x201   : > { %v605_v8 = vld [vmem:[%s13737_s5 + $0x5d0] sm:$0xff] }
 0x206   : > { %6982 = vmatmul.mubr.bf16.vlgmr.msra.gmra.mrb[0].mxu1 %v10286_v15  ;;  %v10447_v15 = vcombine.high %v581_v5, %v597_v6 }
 0x207   : > { %8526 = vmatmul.mubr.bf16.vlgmr.msra.gmra.mrb[0].mxu0 %v10302_v16  ;;  %7143 = vmatpush1.bf16.msra.mxu1 %v12715_v13  ;;  %v10414_v13 = vcombine.low %v549_v53, %v565_v54  ;;  %v10463_v16 = vcombine.high %v589_v7, %v605_v8  ;;  %v677_v53 = vld [vmem:[%s13737_s5 + $0x810] sm:$0xff] }
 0x208   : > { %8687 = vmatpush1.bf16.msra.mxu0 %v12718_v14  ;;  %6991 = vmatprep.mubr.bf16.mxu1 %v10319_v17  ;;  %v10430_v14 = vcombine.low %v557_v55, %v573_v56  ;;  %v12763_v17 = vld [vmem:[%s13745_s6 + $0x380] ss:$8 sps:$4 sm:$0xff]   ;;  %v693_v54 = vld [vmem:[%s13737_s5 + $0x890] sm:$0xff] }
 0x209   : > { %8535 = vmatprep.mubr.bf16.mxu0 %v10335_v18  ;;  %7144 = vmatprep.subr.bf16.mxu1 %v12723_v19  ;;  %v12766_v18 = vld [vmem:[%s13745_s6 + $0xb80] ss:$8 sps:$4 sm:$0xff]   ;;  %v12771_v19 = vld [vmem:[%s13745_s6 + $0x394] ss:$8 sps:$4 sm:$0xff]  }
 0x20a   : > { %8688 = vmatprep.subr.bf16.mxu0 %v12726_v20  ;;  %v12774_v20 = vld [vmem:[%s13745_s6 + $0xb94] ss:$8 sps:$4 sm:$0xff]  }
 0x20b   : > { %7145 = vmatpush1.bf16.msra.mxu1 %v12721_v21  ;;  %v613_v21 = vld [vmem:[%s13737_s5 + $0x610] sm:$0xff] }
 0x20c   : > { %8689 = vmatpush1.bf16.msra.mxu0 %v12724_v22  ;;  %7146 = vmatprep.subr.bf16.mxu1 %v12729_v27  ;;  %v629_v22 = vld [vmem:[%s13737_s5 + $0x690] sm:$0xff]  ;;  %v12777_v27 = vld [vmem:[%s13745_s6 + $0x3a4] ss:$8 sps:$4 sm:$0xff]  }
 0x20d   : > { %8690 = vmatprep.subr.bf16.mxu0 %v12732_v28  ;;  %v12780_v28 = vld [vmem:[%s13745_s6 + $0xba4] ss:$8 sps:$4 sm:$0xff]   ;;  %v685_v55 = vld [vmem:[%s13737_s5 + $0x850] sm:$0xff] }
 0x20e   : > { %6992 = vmatmul.mubr.bf16.gmra.mrb[4].mxu1 %v10318_v29  ;;  %v10446_v29 = vcombine.low %v581_v5, %v597_v6  ;;  %v701_v56 = vld [vmem:[%s13737_s5 + $0x8d0] sm:$0xff] }
 0x20f   : > { %8536 = vmatmul.mubr.bf16.gmra.mrb[4].mxu0 %v10334_v30  ;;  %7001 = vmatprep.mubr.bf16.mxu1 %v10351_v31  ;;  %v10462_v30 = vcombine.low %v589_v7, %v605_v8  ;;  %v10479_v31 = vcombine.high %v613_v21, %v629_v22  ;;  %v709_v5 = vld [vmem:[%s13737_s5 + $0x910] sm:$0xff] }
 0x210   : > { %8545 = vmatprep.mubr.bf16.mxu0 %v10367_v32  ;;  %7147 = vmatpush1.bf16.msra.mxu1 %v12727_v33  ;;  %v10495_v32 = vcombine.high %v621_v23, %v637_v24  ;;  %v12775_v33 = vld [vmem:[%s13745_s6 + $0x3a0] ss:$8 sps:$4 sm:$0xff]   ;;  %v725_v6 = vld [vmem:[%s13737_s5 + $0x990] sm:$0xff] }
 0x211   : > { %8691 = vmatpush1.bf16.msra.mxu0 %v12730_v34  ;;  %7148 = vmatprep.subr.bf16.mxu1 %v12735_v35  ;;  %v12778_v34 = vld [vmem:[%s13745_s6 + $0xba0] ss:$8 sps:$4 sm:$0xff]   ;;  %v12783_v35 = vld [vmem:[%s13745_s6 + $0x3b4] ss:$8 sps:$4 sm:$0xff]  }
 0x212   : > { %8692 = vmatprep.subr.bf16.mxu0 %v12738_v36  ;;  %v12786_v36 = vld [vmem:[%s13745_s6 + $0xbb4] ss:$8 sps:$4 sm:$0xff]  }
 0x213   : > { %v717_v7 = vld [vmem:[%s13737_s5 + $0x950] sm:$0xff] }
 0x214   : > { %7149 = vmatpush1.bf16.msra.mxu1 %v12733_v41  ;;  %v12781_v41 = vld [vmem:[%s13745_s6 + $0x3b0] ss:$8 sps:$4 sm:$0xff]  }
 0x215   : > { %8693 = vmatpush1.bf16.msra.mxu0 %v12736_v42  ;;  %7150 = vmatprep.subr.bf16.mxu1 %v12741_v43  ;;  %v12784_v42 = vld [vmem:[%s13745_s6 + $0xbb0] ss:$8 sps:$4 sm:$0xff]   ;;  %v12789_v43 = vld [vmem:[%s13745_s6 + $0x3c4] ss:$8 sps:$4 sm:$0xff]  }
 0x216   : > { %8694 = vmatprep.subr.bf16.mxu0 %v12744_v44  ;;  %7002 = vmatmul.mubr.bf16.gmra.mrb[8].mxu1 %v10350_v45  ;;  %v12792_v44 = vld [vmem:[%s13745_s6 + $0xbc4] ss:$8 sps:$4 sm:$0xff]   ;;  %v10478_v45 = vcombine.low %v613_v21, %v629_v22  ;;  %v733_v8 = vld [vmem:[%s13737_s5 + $0x9d0] sm:$0xff]  ;;  %v10574_v21 = vcombine.low %v709_v5, %v725_v6 }
 0x217   : > { %8546 = vmatmul.mubr.bf16.gmra.mrb[8].mxu0 %v10366_v46  ;;  %7011 = vmatprep.mubr.bf16.mxu1 %v10383_v47  ;;  %v10494_v46 = vcombine.low %v621_v23, %v637_v24  ;;  %v10511_v47 = vcombine.high %v645_v37, %v661_v38  ;;  %v10590_v22 = vcombine.low %v717_v7, %v733_v8 }
 0x218   : > { %8555 = vmatprep.mubr.bf16.mxu0 %v10399_v48  ;;  %7151 = vmatpush1.bf16.msra.mxu1 %v12739_v49  ;;  %v10527_v48 = vcombine.high %v653_v39, %v669_v40  ;;  %v12787_v49 = vld [vmem:[%s13745_s6 + $0x3c0] ss:$8 sps:$4 sm:$0xff]  }
 0x219   : > { %8695 = vmatpush1.bf16.msra.mxu0 %v12742_v50  ;;  %7152 = vmatprep.subr.bf16.mxu1 %v12747_v51  ;;  %v12790_v50 = vld [vmem:[%s13745_s6 + $0xbc0] ss:$8 sps:$4 sm:$0xff]   ;;  %v12795_v51 = vld [vmem:[%s13745_s6 + $0x3d4] ss:$8 sps:$4 sm:$0xff]  }
 0x21a   : > { %8696 = vmatprep.subr.bf16.mxu0 %v12750_v52  ;;  %v12798_v52 = vld [vmem:[%s13745_s6 + $0xbd4] ss:$8 sps:$4 sm:$0xff]  }
 0x21c   : > { %7153 = vmatpush1.bf16.msra.mxu1 %v12745_v57  ;;  %v12793_v57 = vld [vmem:[%s13745_s6 + $0x3d0] ss:$8 sps:$4 sm:$0xff]  }
 0x21d   : > { %8697 = vmatpush1.bf16.msra.mxu0 %v12748_v58  ;;  %7154 = vmatprep.subr.bf16.mxu1 %v12753_v59  ;;  %v12796_v58 = vld [vmem:[%s13745_s6 + $0xbd0] ss:$8 sps:$4 sm:$0xff]   ;;  %v12801_v59 = vld [vmem:[%s13745_s6 + $0x3e4] ss:$8 sps:$4 sm:$0xff]  }
 0x21e   : > { %8698 = vmatprep.subr.bf16.mxu0 %v12756_v60  ;;  %7012 = vmatmul.mubr.bf16.gmra.mrb[12].mxu1 %v10382_v61  ;;  %v12804_v60 = vld [vmem:[%s13745_s6 + $0xbe4] ss:$8 sps:$4 sm:$0xff]   ;;  %v10510_v61 = vcombine.low %v645_v37, %v661_v38 }
 0x21f   : > { %8556 = vmatmul.mubr.bf16.gmra.mrb[12].mxu0 %v10398_v62  ;;  %7021 = vmatprep.mubr.bf16.mxu1 %v10415_v63  ;;  %v10526_v62 = vcombine.low %v653_v39, %v669_v40  ;;  %v10543_v63 = vcombine.high %v677_v53, %v693_v54 }
 0x220   : > { %8565 = vmatprep.mubr.bf16.mxu0 %v10431_v0  ;;  %7155 = vmatpush1.bf16.msra.mxu1 %v12751_v1  ;;  %v10559_v0 = vcombine.high %v685_v55, %v701_v56  ;;  %v12799_v1 = vld [vmem:[%s13745_s6 + $0x3e0] ss:$8 sps:$4 sm:$0xff]  }
 0x221   : > { %8699 = vmatpush1.bf16.msra.mxu0 %v12754_v2  ;;  %7156 = vmatprep.subr.bf16.mxu1 %v12759_v3  ;;  %v12802_v2 = vld [vmem:[%s13745_s6 + $0xbe0] ss:$8 sps:$4 sm:$0xff]   ;;  %v12807_v3 = vld [vmem:[%s13745_s6 + $0x3f4] ss:$8 sps:$4 sm:$0xff]  }
 0x222   : > { %8700 = vmatprep.subr.bf16.mxu0 %v12762_v4  ;;  %v12810_v4 = vld [vmem:[%s13745_s6 + $0xbf4] ss:$8 sps:$4 sm:$0xff]  }
 0x224   : > { %7157 = vmatpush1.bf16.msra.mxu1 %v12757_v9  ;;  %v12805_v9 = vld [vmem:[%s13745_s6 + $0x3f0] ss:$8 sps:$4 sm:$0xff]  }
 0x225   : > { %8701 = vmatpush1.bf16.msra.mxu0 %v12760_v10  ;;  %7158 = vmatprep.subr.bf16.mxu1 %v12765_v11  ;;  %v12808_v10 = vld [vmem:[%s13745_s6 + $0xbf0] ss:$8 sps:$4 sm:$0xff]   ;;  %v12813_v11 = vld [vmem:[%s13745_s6 + $0x404] ss:$8 sps:$4 sm:$0xff]  }
 0x226   : > { %8702 = vmatprep.subr.bf16.mxu0 %v12768_v12  ;;  %7022 = vmatmul.mubr.bf16.gmra.mrb[16].mxu1 %v10414_v13  ;;  %v12816_v12 = vld [vmem:[%s13745_s6 + $0xc04] ss:$8 sps:$4 sm:$0xff]   ;;  %v10542_v13 = vcombine.low %v677_v53, %v693_v54 }
 0x227   : > { %8566 = vmatmul.mubr.bf16.gmra.mrb[16].mxu0 %v10430_v14  ;;  %7031 = vmatprep.mubr.bf16.mxu1 %v10447_v15  ;;  %v10558_v14 = vcombine.low %v685_v55, %v701_v56  ;;  %v10575_v15 = vcombine.high %v709_v5, %v725_v6 }
 0x228   : > { %8575 = vmatprep.mubr.bf16.mxu0 %v10463_v16  ;;  %7159 = vmatpush1.bf16.msra.mxu1 %v12763_v17  ;;  %v10591_v16 = vcombine.high %v717_v7, %v733_v8  ;;  %v741_v17 = vld [vmem:[%s13737_s5 + $0xa10] sm:$0xff] }
 0x229   : > { %8703 = vmatpush1.bf16.msra.mxu0 %v12766_v18  ;;  %7160 = vmatprep.subr.bf16.mxu1 %v12771_v19  ;;  %v757_v18 = vld [vmem:[%s13737_s5 + $0xa90] sm:$0xff] }
 0x22a   : > { %8704 = vmatprep.subr.bf16.mxu0 %v12774_v20  ;;  %v749_v19 = vld [vmem:[%s13737_s5 + $0xa50] sm:$0xff]  ;;  %v10607_v23 = vcombine.high %v741_v17, %v757_v18 }
 0x22b   : > { %v765_v20 = vld [vmem:[%s13737_s5 + $0xad0] sm:$0xff] }
 0x22c   : > { %7161 = vmatpush1.bf16.msra.mxu1 %v12769_v25  ;;  %v10623_v24 = vcombine.high %v749_v19, %v765_v20  ;;  %v773_v25 = vld [vmem:[%s13737_s5 + $0xb10] sm:$0xff] }
 0x22d   : > { %8705 = vmatpush1.bf16.msra.mxu0 %v12772_v26  ;;  %7162 = vmatprep.subr.bf16.mxu1 %v12777_v27  ;;  %v789_v26 = vld [vmem:[%s13737_s5 + $0xb90] sm:$0xff] }
 0x22e   : > { %8706 = vmatprep.subr.bf16.mxu0 %v12780_v28  ;;  %7032 = vmatmul.mubr.bf16.gmra.mrb[20].mxu1 %v10446_v29  ;;  %v781_v27 = vld [vmem:[%s13737_s5 + $0xb50] sm:$0xff]  ;;  %v10606_v29 = vcombine.low %v741_v17, %v757_v18  ;;  %v10638_v37 = vcombine.low %v773_v25, %v789_v26 }
 0x22f   : > { %8576 = vmatmul.mubr.bf16.gmra.mrb[20].mxu0 %v10462_v30  ;;  %7041 = vmatprep.mubr.bf16.mxu1 %v10479_v31  ;;  %v797_v28 = vld [vmem:[%s13737_s5 + $0xbd0] sm:$0xff]  ;;  %v10622_v30 = vcombine.low %v749_v19, %v765_v20  ;;  %v10639_v31 = vcombine.high %v773_v25, %v789_v26  ;;  %v494_v25 = vld [vmem:[%s13737_s5 + $0x258] sm:$0xff] }
 0x230   : > { %8585 = vmatprep.mubr.bf16.mxu0 %v10495_v32  ;;  %7163 = vmatpush1.bf16.msra.mxu1 %v12775_v33  ;;  %v10655_v32 = vcombine.high %v781_v27, %v797_v28  ;;  %v805_v33 = vld [vmem:[%s13737_s5 + $0xc10] sm:$0xff]  ;;  %v10654_v38 = vcombine.low %v781_v27, %v797_v28  ;;  %v510_v26 = vld [vmem:[%s13737_s5 + $0x2d8] sm:$0xff]  ;;  %v12825_v27 = vld [vmem:[%s13745_s6 + $0x424] ss:$8 sps:$4 sm:$0xff]  }
 0x231   : > { %8707 = vmatpush1.bf16.msra.mxu0 %v12778_v34  ;;  %7164 = vmatprep.subr.bf16.mxu1 %v12783_v35  ;;  %v821_v34 = vld [vmem:[%s13737_s5 + $0xc90] sm:$0xff]  ;;  %v12828_v28 = vld [vmem:[%s13745_s6 + $0xc24] ss:$8 sps:$4 sm:$0xff]  }
 0x232   : > { %8708 = vmatprep.subr.bf16.mxu0 %v12786_v36  ;;  %v813_v35 = vld [vmem:[%s13737_s5 + $0xc50] sm:$0xff]  ;;  %v10671_v39 = vcombine.high %v805_v33, %v821_v34 }
 0x233   : > { %v829_v36 = vld [vmem:[%s13737_s5 + $0xcd0] sm:$0xff] }
 0x234   : > { %7165 = vmatpush1.bf16.msra.mxu1 %v12781_v41  ;;  %v10687_v40 = vcombine.high %v813_v35, %v829_v36  ;;  %v837_v41 = vld [vmem:[%s13737_s5 + $0xd10] sm:$0xff] }
 0x235   : > { %8709 = vmatpush1.bf16.msra.mxu0 %v12784_v42  ;;  %7166 = vmatprep.subr.bf16.mxu1 %v12789_v43  ;;  %v853_v42 = vld [vmem:[%s13737_s5 + $0xd90] sm:$0xff] }
 0x236   : > { %8710 = vmatprep.subr.bf16.mxu0 %v12792_v44  ;;  %7042 = vmatmul.mubr.bf16.gmra.mrb[24].mxu1 %v10478_v45  ;;  %v845_v43 = vld [vmem:[%s13737_s5 + $0xd50] sm:$0xff]  ;;  %v10670_v45 = vcombine.low %v805_v33, %v821_v34  ;;  %v10702_v53 = vcombine.low %v837_v41, %v853_v42  ;;  %v12823_v33 = vld [vmem:[%s13745_s6 + $0x420] ss:$8 sps:$4 sm:$0xff]  }
 0x237   : > { %8586 = vmatmul.mubr.bf16.gmra.mrb[24].mxu0 %v10494_v46  ;;  %7051 = vmatprep.mubr.bf16.mxu1 %v10511_v47  ;;  %v861_v44 = vld [vmem:[%s13737_s5 + $0xdd0] sm:$0xff]  ;;  %v10686_v46 = vcombine.low %v813_v35, %v829_v36  ;;  %v10703_v47 = vcombine.high %v837_v41, %v853_v42  ;;  %v12826_v34 = vld [vmem:[%s13745_s6 + $0xc20] ss:$8 sps:$4 sm:$0xff]  }
 0x238   : > { %8595 = vmatprep.mubr.bf16.mxu0 %v10527_v48  ;;  %7167 = vmatpush1.bf16.msra.mxu1 %v12787_v49  ;;  %v10719_v48 = vcombine.high %v845_v43, %v861_v44  ;;  %v869_v49 = vld [vmem:[%s13737_s5 + $0xe10] sm:$0xff]  ;;  %v10718_v54 = vcombine.low %v845_v43, %v861_v44  ;;  %v12837_v43 = vld [vmem:[%s13745_s6 + $0x444] ss:$8 sps:$4 sm:$0xff]  }
 0x239   : > { %8711 = vmatpush1.bf16.msra.mxu0 %v12790_v50  ;;  %7168 = vmatprep.subr.bf16.mxu1 %v12795_v51  ;;  %v885_v50 = vld [vmem:[%s13737_s5 + $0xe90] sm:$0xff]  ;;  %v12840_v44 = vld [vmem:[%s13745_s6 + $0xc44] ss:$8 sps:$4 sm:$0xff]  }
 0x23a   : > { %8712 = vmatprep.subr.bf16.mxu0 %v12798_v52  ;;  %v877_v51 = vld [vmem:[%s13737_s5 + $0xe50] sm:$0xff]  ;;  %v10735_v55 = vcombine.high %v869_v49, %v885_v50 }
 0x23b   : > { %v893_v52 = vld [vmem:[%s13737_s5 + $0xed0] sm:$0xff] }
 0x23c   : > { %7169 = vmatpush1.bf16.msra.mxu1 %v12793_v57  ;;  %v10751_v56 = vcombine.high %v877_v51, %v893_v52  ;;  %v901_v57 = vld [vmem:[%s13737_s5 + $0xf10] sm:$0xff] }
 0x23d   : > { %8713 = vmatpush1.bf16.msra.mxu0 %v12796_v58  ;;  %7170 = vmatprep.subr.bf16.mxu1 %v12801_v59  ;;  %v917_v58 = vld [vmem:[%s13737_s5 + $0xf90] sm:$0xff] }
 0x23e   : > { %8714 = vmatprep.subr.bf16.mxu0 %v12804_v60  ;;  %7052 = vmatmul.mubr.bf16.gmra.mrb[28].mxu1 %v10510_v61  ;;  %v909_v59 = vld [vmem:[%s13737_s5 + $0xf50] sm:$0xff]  ;;  %v10734_v61 = vcombine.low %v869_v49, %v885_v50  ;;  %v10766_v5 = vcombine.low %v901_v57, %v917_v58  ;;  %v12835_v49 = vld [vmem:[%s13745_s6 + $0x440] ss:$8 sps:$4 sm:$0xff]  }
 0x23f   : > { %8596 = vmatmul.mubr.bf16.gmra.mrb[28].mxu0 %v10526_v62  ;;  %7061 = vmatprep.mubr.bf16.mxu1 %v10543_v63  ;;  %v925_v60 = vld [vmem:[%s13737_s5 + $0xfd0] sm:$0xff]  ;;  %v10750_v62 = vcombine.low %v877_v51, %v893_v52  ;;  %v10767_v63 = vcombine.high %v901_v57, %v917_v58  ;;  %v12838_v50 = vld [vmem:[%s13745_s6 + $0xc40] ss:$8 sps:$4 sm:$0xff]  }
 0x240   : > { %8605 = vmatprep.mubr.bf16.mxu0 %v10559_v0  ;;  %7171 = vmatpush1.bf16.msra.mxu1 %v12799_v1  ;;  %v10783_v0 = vcombine.high %v909_v59, %v925_v60  ;;  %v422_v1 = vld [vmem:[%s13737_s5 + $0x18] sm:$0xff]  ;;  %v10782_v6 = vcombine.low %v909_v59, %v925_v60  ;;  %v12849_v59 = vld [vmem:[%s13745_s6 + $0x464] ss:$8 sps:$4 sm:$0xff]  }
 0x241   : > { %8715 = vmatpush1.bf16.msra.mxu0 %v12802_v2  ;;  %7172 = vmatprep.subr.bf16.mxu1 %v12807_v3  ;;  %v438_v2 = vld [vmem:[%s13737_s5 + $0x98] sm:$0xff]  ;;  %v12852_v60 = vld [vmem:[%s13745_s6 + $0xc64] ss:$8 sps:$4 sm:$0xff]  }
 0x242   : > { %8716 = vmatprep.subr.bf16.mxu0 %v12810_v4  ;;  %v430_v3 = vld [vmem:[%s13737_s5 + $0x58] sm:$0xff]  ;;  %v10289_v7 = vcombine.high %v422_v1, %v438_v2 }
 0x243   : > { %v446_v4 = vld [vmem:[%s13737_s5 + $0xd8] sm:$0xff] }
 0x244   : > { %7173 = vmatpush1.bf16.msra.mxu1 %v12805_v9  ;;  %v10305_v8 = vcombine.high %v430_v3, %v446_v4  ;;  %v454_v9 = vld [vmem:[%s13737_s5 + $0x118] sm:$0xff] }
 0x245   : > { %8717 = vmatpush1.bf16.msra.mxu0 %v12808_v10  ;;  %7335 = vmatprep.subr.bf16.mxu1 %v12813_v11  ;;  %v470_v10 = vld [vmem:[%s13737_s5 + $0x198] sm:$0xff] }
 0x246   : > { %8879 = vmatprep.subr.bf16.mxu0 %v12816_v12  ;;  %7062 = vmatmul.mubr.bf16.gmra.mrb[32].mxu1 %v10542_v13  ;;  %v462_v11 = vld [vmem:[%s13737_s5 + $0x158] sm:$0xff]  ;;  %v10288_v13 = vcombine.low %v422_v1, %v438_v2  ;;  %v10321_v17 = vcombine.high %v454_v9, %v470_v10  ;;  %v12847_v1 = vld [vmem:[%s13745_s6 + $0x460] ss:$8 sps:$4 sm:$0xff]  }
 0x247   : > { %8606 = vmatmul.mubr.bf16.gmra.mrb[32].mxu0 %v10558_v14  ;;  %7071 = vmatprep.mubr.bf16.mxu1 %v10575_v15  ;;  %v478_v12 = vld [vmem:[%s13737_s5 + $0x1d8] sm:$0xff]  ;;  %v10304_v14 = vcombine.low %v430_v3, %v446_v4  ;;  %v12811_v15 = vld [vmem:[%s13745_s6 + $0x400] ss:$8 sps:$4 sm:$0xff]  }
 0x248   : > { %8615 = vmatprep.mubr.bf16.mxu0 %v10591_v16  ;;  %v12814_v16 = vld [vmem:[%s13745_s6 + $0xc00] ss:$8 sps:$4 sm:$0xff]   ;;  %v10337_v18 = vcombine.high %v462_v11, %v478_v12  ;;  %v12819_v19 = vld [vmem:[%s13745_s6 + $0x414] ss:$8 sps:$4 sm:$0xff]   ;;  %v12829_v41 = vld [vmem:[%s13745_s6 + $0x430] ss:$8 sps:$4 sm:$0xff]  }
 0x249   : > { %v12822_v20 = vld [vmem:[%s13745_s6 + $0xc14] ss:$8 sps:$4 sm:$0xff]   ;;  %v12832_v42 = vld [vmem:[%s13745_s6 + $0xc30] ss:$8 sps:$4 sm:$0xff]   ;;  %v12850_v2 = vld [vmem:[%s13745_s6 + $0xc60] ss:$8 sps:$4 sm:$0xff]  }
 0x24a   : > { %v12831_v35 = vld [vmem:[%s13745_s6 + $0x434] ss:$8 sps:$4 sm:$0xff]   ;;  %v12841_v57 = vld [vmem:[%s13745_s6 + $0x450] ss:$8 sps:$4 sm:$0xff]  }
 0x24b   : > { %v12834_v36 = vld [vmem:[%s13745_s6 + $0xc34] ss:$8 sps:$4 sm:$0xff]   ;;  %v12844_v58 = vld [vmem:[%s13745_s6 + $0xc50] ss:$8 sps:$4 sm:$0xff]  }
 0x24c   : > { %v12843_v51 = vld [vmem:[%s13745_s6 + $0x454] ss:$8 sps:$4 sm:$0xff]  }
 0x24d   : > { %v12846_v52 = vld [vmem:[%s13745_s6 + $0xc54] ss:$8 sps:$4 sm:$0xff]  }
 0x24e   : > { %7072 = vmatmul.mubr.bf16.gmra.mrb[36].mxu1 %v10574_v21  ;;  %v12817_v21 = vld [vmem:[%s13745_s6 + $0x410] ss:$8 sps:$4 sm:$0xff]   ;;  %v12855_v3 = vld [vmem:[%s13745_s6 + $0x474] ss:$8 sps:$4 sm:$0xff]  }
 0x24f   : > { %8616 = vmatmul.mubr.bf16.gmra.mrb[36].mxu0 %v10590_v22  ;;  %7081 = vmatprep.mubr.bf16.mxu1 %v10607_v23  ;;  %v12820_v22 = vld [vmem:[%s13745_s6 + $0xc10] ss:$8 sps:$4 sm:$0xff]   ;;  %v12858_v4 = vld [vmem:[%s13745_s6 + $0xc74] ss:$8 sps:$4 sm:$0xff]  }
 0x250   : > { %8625 = vmatprep.mubr.bf16.mxu0 %v10623_v24  ;;  %v486_v23 = vld [vmem:[%s13737_s5 + $0x218] sm:$0xff] }
 0x251   : > { %v502_v24 = vld [vmem:[%s13737_s5 + $0x298] sm:$0xff] }
 0x256   : > { %7082 = vmatmul.mubr.bf16.gmra.mrb[40].mxu1 %v10606_v29  ;;  %v10320_v29 = vcombine.low %v454_v9, %v470_v10  ;;  %v12853_v9 = vld [vmem:[%s13745_s6 + $0x470] ss:$8 sps:$4 sm:$0xff]  }
 0x257   : > { %8626 = vmatmul.mubr.bf16.gmra.mrb[40].mxu0 %v10622_v30  ;;  %7091 = vmatprep.mubr.bf16.mxu1 %v10639_v31  ;;  %v10336_v30 = vcombine.low %v462_v11, %v478_v12  ;;  %v10353_v31 = vcombine.high %v486_v23, %v502_v24  ;;  %v12856_v10 = vld [vmem:[%s13745_s6 + $0xc70] ss:$8 sps:$4 sm:$0xff]   ;;  %v12861_v11 = vld [vmem:[%s13745_s6 + $0x484] ss:$8 sps:$4 sm:$0xff]  }
 0x258   : > { %8635 = vmatprep.mubr.bf16.mxu0 %v10655_v32  ;;  %v10369_v32 = vcombine.high %v494_v25, %v510_v26  ;;  %v12864_v12 = vld [vmem:[%s13745_s6 + $0xc84] ss:$8 sps:$4 sm:$0xff]  }
 0x25e   : > { %7092 = vmatmul.mubr.bf16.gmra.mrb[44].mxu1 %v10638_v37  ;;  %v518_v37 = vld [vmem:[%s13737_s5 + $0x318] sm:$0xff] }
 0x25f   : > { %8636 = vmatmul.mubr.bf16.gmra.mrb[44].mxu0 %v10654_v38  ;;  %7101 = vmatprep.mubr.bf16.mxu1 %v10671_v39  ;;  %v534_v38 = vld [vmem:[%s13737_s5 + $0x398] sm:$0xff] }
 0x260   : > { %8645 = vmatprep.mubr.bf16.mxu0 %v10687_v40  ;;  %v526_v39 = vld [vmem:[%s13737_s5 + $0x358] sm:$0xff] }
 0x261   : > { %v542_v40 = vld [vmem:[%s13737_s5 + $0x3d8] sm:$0xff] }
 0x266   : > { %7102 = vmatmul.mubr.bf16.gmra.mrb[48].mxu1 %v10670_v45  ;;  %v10352_v45 = vcombine.low %v486_v23, %v502_v24  ;;  %v622_v23 = vld [vmem:[%s13737_s5 + $0x658] sm:$0xff] }
 0x267   : > { %8646 = vmatmul.mubr.bf16.gmra.mrb[48].mxu0 %v10686_v46  ;;  %7111 = vmatprep.mubr.bf16.mxu1 %v10703_v47  ;;  %v10368_v46 = vcombine.low %v494_v25, %v510_v26  ;;  %v10385_v47 = vcombine.high %v518_v37, %v534_v38  ;;  %v638_v24 = vld [vmem:[%s13737_s5 + $0x6d8] sm:$0xff] }
 0x268   : > { %8655 = vmatprep.mubr.bf16.mxu0 %v10719_v48  ;;  %v10401_v48 = vcombine.high %v526_v39, %v542_v40  ;;  %v12865_v25 = vld [vmem:[%s13745_s6 + $0x490] ss:$8 sps:$4 sm:$0xff]  }
 0x269   : > { %v12868_v26 = vld [vmem:[%s13745_s6 + $0xc90] ss:$8 sps:$4 sm:$0xff]  }
 0x26e   : > { %7112 = vmatmul.mubr.bf16.gmra.mrb[52].mxu1 %v10702_v53  ;;  %v550_v53 = vld [vmem:[%s13737_s5 + $0x418] sm:$0xff] }
 0x26f   : > { %8656 = vmatmul.mubr.bf16.gmra.mrb[52].mxu0 %v10718_v54  ;;  %7121 = vmatprep.mubr.bf16.mxu1 %v10735_v55  ;;  %v566_v54 = vld [vmem:[%s13737_s5 + $0x498] sm:$0xff] }
 0x270   : > { %8665 = vmatprep.mubr.bf16.mxu0 %v10751_v56  ;;  %v558_v55 = vld [vmem:[%s13737_s5 + $0x458] sm:$0xff] }
 0x271   : > { %v574_v56 = vld [vmem:[%s13737_s5 + $0x4d8] sm:$0xff] }
 0x276   : > { %7122 = vmatmul.mubr.bf16.gmra.mrb[56].mxu1 %v10734_v61  ;;  %v10384_v61 = vcombine.low %v518_v37, %v534_v38  ;;  %v646_v37 = vld [vmem:[%s13737_s5 + $0x718] sm:$0xff] }
 0x277   : > { %8666 = vmatmul.mubr.bf16.gmra.mrb[56].mxu0 %v10750_v62  ;;  %7131 = vmatprep.mubr.bf16.mxu1 %v10767_v63  ;;  %v10400_v62 = vcombine.low %v526_v39, %v542_v40  ;;  %v10417_v63 = vcombine.high %v550_v53, %v566_v54  ;;  %v662_v38 = vld [vmem:[%s13737_s5 + $0x798] sm:$0xff] }
 0x278   : > { %8675 = vmatprep.mubr.bf16.mxu0 %v10783_v0  ;;  %v10433_v0 = vcombine.high %v558_v55, %v574_v56  ;;  %v654_v39 = vld [vmem:[%s13737_s5 + $0x758] sm:$0xff] }
 0x279   : > { %v670_v40 = vld [vmem:[%s13737_s5 + $0x7d8] sm:$0xff] }
 0x27e   : > { %7132 = vmatmul.mubr.bf16.gmra.mrb[60].mxu1 %v10766_v5  ;;  %v582_v5 = vld [vmem:[%s13737_s5 + $0x518] sm:$0xff] }
 0x27f   : > { %8676 = vmatmul.mubr.bf16.gmra.mrb[60].mxu0 %v10782_v6  ;;  %7174 = vmatprep.mubr.bf16.mxu1 %v10289_v7  ;;  %v598_v6 = vld [vmem:[%s13737_s5 + $0x598] sm:$0xff] }
 0x280   : > { %8718 = vmatprep.mubr.bf16.mxu0 %v10305_v8  ;;  %v590_v7 = vld [vmem:[%s13737_s5 + $0x558] sm:$0xff] }
 0x281   : > { %v606_v8 = vld [vmem:[%s13737_s5 + $0x5d8] sm:$0xff] }
 0x286   : > { %7175 = vmatmul.mubr.bf16.vlgmr.msra.gmra.mrb[0].mxu1 %v10288_v13  ;;  %v10416_v13 = vcombine.low %v550_v53, %v566_v54  ;;  %v678_v53 = vld [vmem:[%s13737_s5 + $0x818] sm:$0xff] }
 0x287   : > { %8719 = vmatmul.mubr.bf16.vlgmr.msra.gmra.mrb[0].mxu0 %v10304_v14  ;;  %7336 = vmatpush1.bf16.msra.mxu1 %v12811_v15  ;;  %v10432_v14 = vcombine.low %v558_v55, %v574_v56  ;;  %v10449_v15 = vcombine.high %v582_v5, %v598_v6  ;;  %v694_v54 = vld [vmem:[%s13737_s5 + $0x898] sm:$0xff] }
 0x288   : > { %8880 = vmatpush1.bf16.msra.mxu0 %v12814_v16  ;;  %7184 = vmatprep.mubr.bf16.mxu1 %v10321_v17  ;;  %v10465_v16 = vcombine.high %v590_v7, %v606_v8  ;;  %v12859_v17 = vld [vmem:[%s13745_s6 + $0x480] ss:$8 sps:$4 sm:$0xff]   ;;  %v686_v55 = vld [vmem:[%s13737_s5 + $0x858] sm:$0xff] }
 0x289   : > { %8728 = vmatprep.mubr.bf16.mxu0 %v10337_v18  ;;  %7337 = vmatprep.subr.bf16.mxu1 %v12819_v19  ;;  %v12862_v18 = vld [vmem:[%s13745_s6 + $0xc80] ss:$8 sps:$4 sm:$0xff]   ;;  %v12867_v19 = vld [vmem:[%s13745_s6 + $0x494] ss:$8 sps:$4 sm:$0xff]  }
 0x28a   : > { %8881 = vmatprep.subr.bf16.mxu0 %v12822_v20  ;;  %v12870_v20 = vld [vmem:[%s13745_s6 + $0xc94] ss:$8 sps:$4 sm:$0xff]  }
 0x28b   : > { %7338 = vmatpush1.bf16.msra.mxu1 %v12817_v21  ;;  %v614_v21 = vld [vmem:[%s13737_s5 + $0x618] sm:$0xff] }
 0x28c   : > { %8882 = vmatpush1.bf16.msra.mxu0 %v12820_v22  ;;  %7339 = vmatprep.subr.bf16.mxu1 %v12825_v27  ;;  %v630_v22 = vld [vmem:[%s13737_s5 + $0x698] sm:$0xff]  ;;  %v12873_v27 = vld [vmem:[%s13745_s6 + $0x4a4] ss:$8 sps:$4 sm:$0xff]  }
 0x28d   : > { %8883 = vmatprep.subr.bf16.mxu0 %v12828_v28  ;;  %v12876_v28 = vld [vmem:[%s13745_s6 + $0xca4] ss:$8 sps:$4 sm:$0xff]   ;;  %v702_v56 = vld [vmem:[%s13737_s5 + $0x8d8] sm:$0xff] }
 0x28e   : > { %7185 = vmatmul.mubr.bf16.gmra.mrb[4].mxu1 %v10320_v29  ;;  %v10448_v29 = vcombine.low %v582_v5, %v598_v6  ;;  %v710_v5 = vld [vmem:[%s13737_s5 + $0x918] sm:$0xff] }
 0x28f   : > { %8729 = vmatmul.mubr.bf16.gmra.mrb[4].mxu0 %v10336_v30  ;;  %7194 = vmatprep.mubr.bf16.mxu1 %v10353_v31  ;;  %v10464_v30 = vcombine.low %v590_v7, %v606_v8  ;;  %v10481_v31 = vcombine.high %v614_v21, %v630_v22  ;;  %v726_v6 = vld [vmem:[%s13737_s5 + $0x998] sm:$0xff] }
 0x290   : > { %8738 = vmatprep.mubr.bf16.mxu0 %v10369_v32  ;;  %7340 = vmatpush1.bf16.msra.mxu1 %v12823_v33  ;;  %v10497_v32 = vcombine.high %v622_v23, %v638_v24  ;;  %v12871_v33 = vld [vmem:[%s13745_s6 + $0x4a0] ss:$8 sps:$4 sm:$0xff]   ;;  %v718_v7 = vld [vmem:[%s13737_s5 + $0x958] sm:$0xff] }
 0x291   : > { %8884 = vmatpush1.bf16.msra.mxu0 %v12826_v34  ;;  %7341 = vmatprep.subr.bf16.mxu1 %v12831_v35  ;;  %v12874_v34 = vld [vmem:[%s13745_s6 + $0xca0] ss:$8 sps:$4 sm:$0xff]   ;;  %v12879_v35 = vld [vmem:[%s13745_s6 + $0x4b4] ss:$8 sps:$4 sm:$0xff]  }
 0x292   : > { %8885 = vmatprep.subr.bf16.mxu0 %v12834_v36  ;;  %v12882_v36 = vld [vmem:[%s13745_s6 + $0xcb4] ss:$8 sps:$4 sm:$0xff]  }
 0x293   : > { %v734_v8 = vld [vmem:[%s13737_s5 + $0x9d8] sm:$0xff] }
 0x294   : > { %7342 = vmatpush1.bf16.msra.mxu1 %v12829_v41  ;;  %v12877_v41 = vld [vmem:[%s13745_s6 + $0x4b0] ss:$8 sps:$4 sm:$0xff]  }
 0x295   : > { %8886 = vmatpush1.bf16.msra.mxu0 %v12832_v42  ;;  %7343 = vmatprep.subr.bf16.mxu1 %v12837_v43  ;;  %v12880_v42 = vld [vmem:[%s13745_s6 + $0xcb0] ss:$8 sps:$4 sm:$0xff]   ;;  %v12885_v43 = vld [vmem:[%s13745_s6 + $0x4c4] ss:$8 sps:$4 sm:$0xff]  }
 0x296   : > { %8887 = vmatprep.subr.bf16.mxu0 %v12840_v44  ;;  %7195 = vmatmul.mubr.bf16.gmra.mrb[8].mxu1 %v10352_v45  ;;  %v12888_v44 = vld [vmem:[%s13745_s6 + $0xcc4] ss:$8 sps:$4 sm:$0xff]   ;;  %v10480_v45 = vcombine.low %v614_v21, %v630_v22  ;;  %v10576_v21 = vcombine.low %v710_v5, %v726_v6  ;;  %v10592_v22 = vcombine.low %v718_v7, %v734_v8 }
 0x297   : > { %8739 = vmatmul.mubr.bf16.gmra.mrb[8].mxu0 %v10368_v46  ;;  %7204 = vmatprep.mubr.bf16.mxu1 %v10385_v47  ;;  %v10496_v46 = vcombine.low %v622_v23, %v638_v24  ;;  %v10513_v47 = vcombine.high %v646_v37, %v662_v38 }
 0x298   : > { %8748 = vmatprep.mubr.bf16.mxu0 %v10401_v48  ;;  %7344 = vmatpush1.bf16.msra.mxu1 %v12835_v49  ;;  %v10529_v48 = vcombine.high %v654_v39, %v670_v40  ;;  %v12883_v49 = vld [vmem:[%s13745_s6 + $0x4c0] ss:$8 sps:$4 sm:$0xff]  }
 0x299   : > { %8888 = vmatpush1.bf16.msra.mxu0 %v12838_v50  ;;  %7345 = vmatprep.subr.bf16.mxu1 %v12843_v51  ;;  %v12886_v50 = vld [vmem:[%s13745_s6 + $0xcc0] ss:$8 sps:$4 sm:$0xff]   ;;  %v12891_v51 = vld [vmem:[%s13745_s6 + $0x4d4] ss:$8 sps:$4 sm:$0xff]  }
 0x29a   : > { %8889 = vmatprep.subr.bf16.mxu0 %v12846_v52  ;;  %v12894_v52 = vld [vmem:[%s13745_s6 + $0xcd4] ss:$8 sps:$4 sm:$0xff]  }
 0x29c   : > { %7346 = vmatpush1.bf16.msra.mxu1 %v12841_v57  ;;  %v12889_v57 = vld [vmem:[%s13745_s6 + $0x4d0] ss:$8 sps:$4 sm:$0xff]  }
 0x29d   : > { %8890 = vmatpush1.bf16.msra.mxu0 %v12844_v58  ;;  %7347 = vmatprep.subr.bf16.mxu1 %v12849_v59  ;;  %v12892_v58 = vld [vmem:[%s13745_s6 + $0xcd0] ss:$8 sps:$4 sm:$0xff]   ;;  %v12897_v59 = vld [vmem:[%s13745_s6 + $0x4e4] ss:$8 sps:$4 sm:$0xff]  }
 0x29e   : > { %8891 = vmatprep.subr.bf16.mxu0 %v12852_v60  ;;  %7205 = vmatmul.mubr.bf16.gmra.mrb[12].mxu1 %v10384_v61  ;;  %v12900_v60 = vld [vmem:[%s13745_s6 + $0xce4] ss:$8 sps:$4 sm:$0xff]   ;;  %v10512_v61 = vcombine.low %v646_v37, %v662_v38 }
 0x29f   : > { %8749 = vmatmul.mubr.bf16.gmra.mrb[12].mxu0 %v10400_v62  ;;  %7214 = vmatprep.mubr.bf16.mxu1 %v10417_v63  ;;  %v10528_v62 = vcombine.low %v654_v39, %v670_v40  ;;  %v10545_v63 = vcombine.high %v678_v53, %v694_v54 }
 0x2a0   : > { %8758 = vmatprep.mubr.bf16.mxu0 %v10433_v0  ;;  %7348 = vmatpush1.bf16.msra.mxu1 %v12847_v1  ;;  %v10561_v0 = vcombine.high %v686_v55, %v702_v56  ;;  %v12895_v1 = vld [vmem:[%s13745_s6 + $0x4e0] ss:$8 sps:$4 sm:$0xff]  }
 0x2a1   : > { %8892 = vmatpush1.bf16.msra.mxu0 %v12850_v2  ;;  %7349 = vmatprep.subr.bf16.mxu1 %v12855_v3  ;;  %v12898_v2 = vld [vmem:[%s13745_s6 + $0xce0] ss:$8 sps:$4 sm:$0xff]   ;;  %v12903_v3 = vld [vmem:[%s13745_s6 + $0x4f4] ss:$8 sps:$4 sm:$0xff]  }
 0x2a2   : > { %8893 = vmatprep.subr.bf16.mxu0 %v12858_v4  ;;  %v12906_v4 = vld [vmem:[%s13745_s6 + $0xcf4] ss:$8 sps:$4 sm:$0xff]  }
 0x2a4   : > { %7350 = vmatpush1.bf16.msra.mxu1 %v12853_v9  ;;  %v12901_v9 = vld [vmem:[%s13745_s6 + $0x4f0] ss:$8 sps:$4 sm:$0xff]  }
 0x2a5   : > { %8894 = vmatpush1.bf16.msra.mxu0 %v12856_v10  ;;  %7351 = vmatprep.subr.bf16.mxu1 %v12861_v11  ;;  %v12904_v10 = vld [vmem:[%s13745_s6 + $0xcf0] ss:$8 sps:$4 sm:$0xff]   ;;  %v12909_v11 = vld [vmem:[%s13745_s6 + $0x504] ss:$8 sps:$4 sm:$0xff]  }
 0x2a6   : > { %8895 = vmatprep.subr.bf16.mxu0 %v12864_v12  ;;  %7215 = vmatmul.mubr.bf16.gmra.mrb[16].mxu1 %v10416_v13  ;;  %v12912_v12 = vld [vmem:[%s13745_s6 + $0xd04] ss:$8 sps:$4 sm:$0xff]   ;;  %v10544_v13 = vcombine.low %v678_v53, %v694_v54 }
 0x2a7   : > { %8759 = vmatmul.mubr.bf16.gmra.mrb[16].mxu0 %v10432_v14  ;;  %7224 = vmatprep.mubr.bf16.mxu1 %v10449_v15  ;;  %v10560_v14 = vcombine.low %v686_v55, %v702_v56  ;;  %v10577_v15 = vcombine.high %v710_v5, %v726_v6 }
 0x2a8   : > { %8768 = vmatprep.mubr.bf16.mxu0 %v10465_v16  ;;  %7352 = vmatpush1.bf16.msra.mxu1 %v12859_v17  ;;  %v10593_v16 = vcombine.high %v718_v7, %v734_v8  ;;  %v742_v17 = vld [vmem:[%s13737_s5 + $0xa18] sm:$0xff] }
 0x2a9   : > { %8896 = vmatpush1.bf16.msra.mxu0 %v12862_v18  ;;  %7353 = vmatprep.subr.bf16.mxu1 %v12867_v19  ;;  %v758_v18 = vld [vmem:[%s13737_s5 + $0xa98] sm:$0xff] }
 0x2aa   : > { %8897 = vmatprep.subr.bf16.mxu0 %v12870_v20  ;;  %v750_v19 = vld [vmem:[%s13737_s5 + $0xa58] sm:$0xff]  ;;  %v10609_v23 = vcombine.high %v742_v17, %v758_v18 }
 0x2ab   : > { %v766_v20 = vld [vmem:[%s13737_s5 + $0xad8] sm:$0xff] }
 0x2ac   : > { %7354 = vmatpush1.bf16.msra.mxu1 %v12865_v25  ;;  %v10625_v24 = vcombine.high %v750_v19, %v766_v20  ;;  %v774_v25 = vld [vmem:[%s13737_s5 + $0xb18] sm:$0xff] }
 0x2ad   : > { %8898 = vmatpush1.bf16.msra.mxu0 %v12868_v26  ;;  %7355 = vmatprep.subr.bf16.mxu1 %v12873_v27  ;;  %v790_v26 = vld [vmem:[%s13737_s5 + $0xb98] sm:$0xff] }
 0x2ae   : > { %8899 = vmatprep.subr.bf16.mxu0 %v12876_v28  ;;  %7225 = vmatmul.mubr.bf16.gmra.mrb[20].mxu1 %v10448_v29  ;;  %v782_v27 = vld [vmem:[%s13737_s5 + $0xb58] sm:$0xff]  ;;  %v10608_v29 = vcombine.low %v742_v17, %v758_v18  ;;  %v10640_v37 = vcombine.low %v774_v25, %v790_v26 }
 0x2af   : > { %8769 = vmatmul.mubr.bf16.gmra.mrb[20].mxu0 %v10464_v30  ;;  %7234 = vmatprep.mubr.bf16.mxu1 %v10481_v31  ;;  %v798_v28 = vld [vmem:[%s13737_s5 + $0xbd8] sm:$0xff]  ;;  %v10624_v30 = vcombine.low %v750_v19, %v766_v20  ;;  %v10641_v31 = vcombine.high %v774_v25, %v790_v26  ;;  %v495_v25 = vld [vmem:[%s13737_s5 + $0x260] sm:$0xff] }
 0x2b0   : > { %8778 = vmatprep.mubr.bf16.mxu0 %v10497_v32  ;;  %7356 = vmatpush1.bf16.msra.mxu1 %v12871_v33  ;;  %v10657_v32 = vcombine.high %v782_v27, %v798_v28  ;;  %v806_v33 = vld [vmem:[%s13737_s5 + $0xc18] sm:$0xff]  ;;  %v10656_v38 = vcombine.low %v782_v27, %v798_v28  ;;  %v511_v26 = vld [vmem:[%s13737_s5 + $0x2e0] sm:$0xff] }
 0x2b1   : > { %8900 = vmatpush1.bf16.msra.mxu0 %v12874_v34  ;;  %7357 = vmatprep.subr.bf16.mxu1 %v12879_v35  ;;  %v822_v34 = vld [vmem:[%s13737_s5 + $0xc98] sm:$0xff]  ;;  %v12921_v27 = vld [vmem:[%s13745_s6 + $0x524] ss:$8 sps:$4 sm:$0xff]  }
 0x2b2   : > { %8901 = vmatprep.subr.bf16.mxu0 %v12882_v36  ;;  %v814_v35 = vld [vmem:[%s13737_s5 + $0xc58] sm:$0xff]  ;;  %v10673_v39 = vcombine.high %v806_v33, %v822_v34  ;;  %v12924_v28 = vld [vmem:[%s13745_s6 + $0xd24] ss:$8 sps:$4 sm:$0xff]  }
 0x2b3   : > { %v830_v36 = vld [vmem:[%s13737_s5 + $0xcd8] sm:$0xff] }
 0x2b4   : > { %7358 = vmatpush1.bf16.msra.mxu1 %v12877_v41  ;;  %v10689_v40 = vcombine.high %v814_v35, %v830_v36  ;;  %v838_v41 = vld [vmem:[%s13737_s5 + $0xd18] sm:$0xff] }
 0x2b5   : > { %8902 = vmatpush1.bf16.msra.mxu0 %v12880_v42  ;;  %7359 = vmatprep.subr.bf16.mxu1 %v12885_v43  ;;  %v854_v42 = vld [vmem:[%s13737_s5 + $0xd98] sm:$0xff] }
 0x2b6   : > { %8903 = vmatprep.subr.bf16.mxu0 %v12888_v44  ;;  %7235 = vmatmul.mubr.bf16.gmra.mrb[24].mxu1 %v10480_v45  ;;  %v846_v43 = vld [vmem:[%s13737_s5 + $0xd58] sm:$0xff]  ;;  %v10672_v45 = vcombine.low %v806_v33, %v822_v34  ;;  %v10704_v53 = vcombine.low %v838_v41, %v854_v42  ;;  %v12919_v33 = vld [vmem:[%s13745_s6 + $0x520] ss:$8 sps:$4 sm:$0xff]  }
 0x2b7   : > { %8779 = vmatmul.mubr.bf16.gmra.mrb[24].mxu0 %v10496_v46  ;;  %7244 = vmatprep.mubr.bf16.mxu1 %v10513_v47  ;;  %v862_v44 = vld [vmem:[%s13737_s5 + $0xdd8] sm:$0xff]  ;;  %v10688_v46 = vcombine.low %v814_v35, %v830_v36  ;;  %v10705_v47 = vcombine.high %v838_v41, %v854_v42  ;;  %v12922_v34 = vld [vmem:[%s13745_s6 + $0xd20] ss:$8 sps:$4 sm:$0xff]  }
 0x2b8   : > { %8788 = vmatprep.mubr.bf16.mxu0 %v10529_v48  ;;  %7360 = vmatpush1.bf16.msra.mxu1 %v12883_v49  ;;  %v10721_v48 = vcombine.high %v846_v43, %v862_v44  ;;  %v870_v49 = vld [vmem:[%s13737_s5 + $0xe18] sm:$0xff]  ;;  %v10720_v54 = vcombine.low %v846_v43, %v862_v44  ;;  %v12933_v43 = vld [vmem:[%s13745_s6 + $0x544] ss:$8 sps:$4 sm:$0xff]  }
 0x2b9   : > { %8904 = vmatpush1.bf16.msra.mxu0 %v12886_v50  ;;  %7361 = vmatprep.subr.bf16.mxu1 %v12891_v51  ;;  %v886_v50 = vld [vmem:[%s13737_s5 + $0xe98] sm:$0xff]  ;;  %v12936_v44 = vld [vmem:[%s13745_s6 + $0xd44] ss:$8 sps:$4 sm:$0xff]  }
 0x2ba   : > { %8905 = vmatprep.subr.bf16.mxu0 %v12894_v52  ;;  %v878_v51 = vld [vmem:[%s13737_s5 + $0xe58] sm:$0xff]  ;;  %v10737_v55 = vcombine.high %v870_v49, %v886_v50 }
 0x2bb   : > { %v894_v52 = vld [vmem:[%s13737_s5 + $0xed8] sm:$0xff] }
 0x2bc   : > { %7362 = vmatpush1.bf16.msra.mxu1 %v12889_v57  ;;  %v10753_v56 = vcombine.high %v878_v51, %v894_v52  ;;  %v902_v57 = vld [vmem:[%s13737_s5 + $0xf18] sm:$0xff] }
 0x2bd   : > { %8906 = vmatpush1.bf16.msra.mxu0 %v12892_v58  ;;  %7363 = vmatprep.subr.bf16.mxu1 %v12897_v59  ;;  %v918_v58 = vld [vmem:[%s13737_s5 + $0xf98] sm:$0xff] }
 0x2be   : > { %8907 = vmatprep.subr.bf16.mxu0 %v12900_v60  ;;  %7245 = vmatmul.mubr.bf16.gmra.mrb[28].mxu1 %v10512_v61  ;;  %v910_v59 = vld [vmem:[%s13737_s5 + $0xf58] sm:$0xff]  ;;  %v10736_v61 = vcombine.low %v870_v49, %v886_v50  ;;  %v10768_v5 = vcombine.low %v902_v57, %v918_v58  ;;  %v12931_v49 = vld [vmem:[%s13745_s6 + $0x540] ss:$8 sps:$4 sm:$0xff]  }
 0x2bf   : > { %8789 = vmatmul.mubr.bf16.gmra.mrb[28].mxu0 %v10528_v62  ;;  %7254 = vmatprep.mubr.bf16.mxu1 %v10545_v63  ;;  %v926_v60 = vld [vmem:[%s13737_s5 + $0xfd8] sm:$0xff]  ;;  %v10752_v62 = vcombine.low %v878_v51, %v894_v52  ;;  %v10769_v63 = vcombine.high %v902_v57, %v918_v58  ;;  %v12934_v50 = vld [vmem:[%s13745_s6 + $0xd40] ss:$8 sps:$4 sm:$0xff]  }
 0x2c0   : > { %8798 = vmatprep.mubr.bf16.mxu0 %v10561_v0  ;;  %7364 = vmatpush1.bf16.msra.mxu1 %v12895_v1  ;;  %v10785_v0 = vcombine.high %v910_v59, %v926_v60  ;;  %v423_v1 = vld [vmem:[%s13737_s5 + $0x20] sm:$0xff]  ;;  %v10784_v6 = vcombine.low %v910_v59, %v926_v60  ;;  %v12915_v19 = vld [vmem:[%s13745_s6 + $0x514] ss:$8 sps:$4 sm:$0xff]   ;;  %v12925_v41 = vld [vmem:[%s13745_s6 + $0x530] ss:$8 sps:$4 sm:$0xff]  }
 0x2c1   : > { %8908 = vmatpush1.bf16.msra.mxu0 %v12898_v2  ;;  %7365 = vmatprep.subr.bf16.mxu1 %v12903_v3  ;;  %v439_v2 = vld [vmem:[%s13737_s5 + $0xa0] sm:$0xff]  ;;  %v12918_v20 = vld [vmem:[%s13745_s6 + $0xd14] ss:$8 sps:$4 sm:$0xff]   ;;  %v12928_v42 = vld [vmem:[%s13745_s6 + $0xd30] ss:$8 sps:$4 sm:$0xff]  }
 0x2c2   : > { %8909 = vmatprep.subr.bf16.mxu0 %v12906_v4  ;;  %v431_v3 = vld [vmem:[%s13737_s5 + $0x60] sm:$0xff]  ;;  %v10291_v7 = vcombine.high %v423_v1, %v439_v2  ;;  %v12927_v35 = vld [vmem:[%s13745_s6 + $0x534] ss:$8 sps:$4 sm:$0xff]   ;;  %v12937_v57 = vld [vmem:[%s13745_s6 + $0x550] ss:$8 sps:$4 sm:$0xff]  }
 0x2c3   : > { %v447_v4 = vld [vmem:[%s13737_s5 + $0xe0] sm:$0xff]  ;;  %v12930_v36 = vld [vmem:[%s13745_s6 + $0xd34] ss:$8 sps:$4 sm:$0xff]   ;;  %v12940_v58 = vld [vmem:[%s13745_s6 + $0xd50] ss:$8 sps:$4 sm:$0xff]  }
 0x2c4   : > { %7366 = vmatpush1.bf16.msra.mxu1 %v12901_v9  ;;  %v10307_v8 = vcombine.high %v431_v3, %v447_v4  ;;  %v455_v9 = vld [vmem:[%s13737_s5 + $0x120] sm:$0xff]  ;;  %v12939_v51 = vld [vmem:[%s13745_s6 + $0x554] ss:$8 sps:$4 sm:$0xff]  }
 0x2c5   : > { %8910 = vmatpush1.bf16.msra.mxu0 %v12904_v10  ;;  %7528 = vmatprep.subr.bf16.mxu1 %v12909_v11  ;;  %v471_v10 = vld [vmem:[%s13737_s5 + $0x1a0] sm:$0xff]  ;;  %v12942_v52 = vld [vmem:[%s13745_s6 + $0xd54] ss:$8 sps:$4 sm:$0xff]  }
 0x2c6   : > { %9072 = vmatprep.subr.bf16.mxu0 %v12912_v12  ;;  %7255 = vmatmul.mubr.bf16.gmra.mrb[32].mxu1 %v10544_v13  ;;  %v463_v11 = vld [vmem:[%s13737_s5 + $0x160] sm:$0xff]  ;;  %v10290_v13 = vcombine.low %v423_v1, %v439_v2  ;;  %v10323_v17 = vcombine.high %v455_v9, %v471_v10 }
 0x2c7   : > { %8799 = vmatmul.mubr.bf16.gmra.mrb[32].mxu0 %v10560_v14  ;;  %7264 = vmatprep.mubr.bf16.mxu1 %v10577_v15  ;;  %v479_v12 = vld [vmem:[%s13737_s5 + $0x1e0] sm:$0xff]  ;;  %v10306_v14 = vcombine.low %v431_v3, %v447_v4  ;;  %v12951_v3 = vld [vmem:[%s13745_s6 + $0x574] ss:$8 sps:$4 sm:$0xff]  }
 0x2c8   : > { %8808 = vmatprep.mubr.bf16.mxu0 %v10593_v16  ;;  %v12907_v15 = vld [vmem:[%s13745_s6 + $0x500] ss:$8 sps:$4 sm:$0xff]   ;;  %v10339_v18 = vcombine.high %v463_v11, %v479_v12  ;;  %v12945_v59 = vld [vmem:[%s13745_s6 + $0x564] ss:$8 sps:$4 sm:$0xff]   ;;  %v12954_v4 = vld [vmem:[%s13745_s6 + $0xd74] ss:$8 sps:$4 sm:$0xff]  }
 0x2c9   : > { %v12910_v16 = vld [vmem:[%s13745_s6 + $0xd00] ss:$8 sps:$4 sm:$0xff]   ;;  %v12948_v60 = vld [vmem:[%s13745_s6 + $0xd64] ss:$8 sps:$4 sm:$0xff]  }
 0x2ca   : > { %v12943_v1 = vld [vmem:[%s13745_s6 + $0x560] ss:$8 sps:$4 sm:$0xff]  }
 0x2cb   : > { %v12946_v2 = vld [vmem:[%s13745_s6 + $0xd60] ss:$8 sps:$4 sm:$0xff]  }
 0x2ce   : > { %7265 = vmatmul.mubr.bf16.gmra.mrb[36].mxu1 %v10576_v21  ;;  %v12913_v21 = vld [vmem:[%s13745_s6 + $0x510] ss:$8 sps:$4 sm:$0xff]  }
 0x2cf   : > { %8809 = vmatmul.mubr.bf16.gmra.mrb[36].mxu0 %v10592_v22  ;;  %7274 = vmatprep.mubr.bf16.mxu1 %v10609_v23  ;;  %v12916_v22 = vld [vmem:[%s13745_s6 + $0xd10] ss:$8 sps:$4 sm:$0xff]   ;;  %v487_v23 = vld [vmem:[%s13737_s5 + $0x220] sm:$0xff] }
 0x2d0   : > { %8818 = vmatprep.mubr.bf16.mxu0 %v10625_v24  ;;  %v503_v24 = vld [vmem:[%s13737_s5 + $0x2a0] sm:$0xff] }
 0x2d6   : > { %7275 = vmatmul.mubr.bf16.gmra.mrb[40].mxu1 %v10608_v29  ;;  %v10322_v29 = vcombine.low %v455_v9, %v471_v10  ;;  %v12949_v9 = vld [vmem:[%s13745_s6 + $0x570] ss:$8 sps:$4 sm:$0xff]  }
 0x2d7   : > { %8819 = vmatmul.mubr.bf16.gmra.mrb[40].mxu0 %v10624_v30  ;;  %7284 = vmatprep.mubr.bf16.mxu1 %v10641_v31  ;;  %v10338_v30 = vcombine.low %v463_v11, %v479_v12  ;;  %v10355_v31 = vcombine.high %v487_v23, %v503_v24  ;;  %v12952_v10 = vld [vmem:[%s13745_s6 + $0xd70] ss:$8 sps:$4 sm:$0xff]   ;;  %v12957_v11 = vld [vmem:[%s13745_s6 + $0x584] ss:$8 sps:$4 sm:$0xff]  }
 0x2d8   : > { %8828 = vmatprep.mubr.bf16.mxu0 %v10657_v32  ;;  %v10371_v32 = vcombine.high %v495_v25, %v511_v26  ;;  %v12960_v12 = vld [vmem:[%s13745_s6 + $0xd84] ss:$8 sps:$4 sm:$0xff]  }
 0x2de   : > { %7285 = vmatmul.mubr.bf16.gmra.mrb[44].mxu1 %v10640_v37  ;;  %v519_v37 = vld [vmem:[%s13737_s5 + $0x320] sm:$0xff] }
 0x2df   : > { %8829 = vmatmul.mubr.bf16.gmra.mrb[44].mxu0 %v10656_v38  ;;  %7294 = vmatprep.mubr.bf16.mxu1 %v10673_v39  ;;  %v535_v38 = vld [vmem:[%s13737_s5 + $0x3a0] sm:$0xff] }
 0x2e0   : > { %8838 = vmatprep.mubr.bf16.mxu0 %v10689_v40  ;;  %v527_v39 = vld [vmem:[%s13737_s5 + $0x360] sm:$0xff] }
 0x2e1   : > { %v543_v40 = vld [vmem:[%s13737_s5 + $0x3e0] sm:$0xff] }
 0x2e6   : > { %7295 = vmatmul.mubr.bf16.gmra.mrb[48].mxu1 %v10672_v45  ;;  %v10354_v45 = vcombine.low %v487_v23, %v503_v24  ;;  %v623_v23 = vld [vmem:[%s13737_s5 + $0x660] sm:$0xff] }
 0x2e7   : > { %8839 = vmatmul.mubr.bf16.gmra.mrb[48].mxu0 %v10688_v46  ;;  %7304 = vmatprep.mubr.bf16.mxu1 %v10705_v47  ;;  %v10370_v46 = vcombine.low %v495_v25, %v511_v26  ;;  %v10387_v47 = vcombine.high %v519_v37, %v535_v38  ;;  %v639_v24 = vld [vmem:[%s13737_s5 + $0x6e0] sm:$0xff]  ;;  %v12961_v25 = vld [vmem:[%s13745_s6 + $0x590] ss:$8 sps:$4 sm:$0xff]  }
 0x2e8   : > { %8848 = vmatprep.mubr.bf16.mxu0 %v10721_v48  ;;  %v10403_v48 = vcombine.high %v527_v39, %v543_v40  ;;  %v12964_v26 = vld [vmem:[%s13745_s6 + $0xd90] ss:$8 sps:$4 sm:$0xff]  }
 0x2ee   : > { %7305 = vmatmul.mubr.bf16.gmra.mrb[52].mxu1 %v10704_v53  ;;  %v551_v53 = vld [vmem:[%s13737_s5 + $0x420] sm:$0xff] }
 0x2ef   : > { %8849 = vmatmul.mubr.bf16.gmra.mrb[52].mxu0 %v10720_v54  ;;  %7314 = vmatprep.mubr.bf16.mxu1 %v10737_v55  ;;  %v567_v54 = vld [vmem:[%s13737_s5 + $0x4a0] sm:$0xff] }
 0x2f0   : > { %8858 = vmatprep.mubr.bf16.mxu0 %v10753_v56  ;;  %v559_v55 = vld [vmem:[%s13737_s5 + $0x460] sm:$0xff] }
 0x2f1   : > { %v575_v56 = vld [vmem:[%s13737_s5 + $0x4e0] sm:$0xff] }
 0x2f6   : > { %7315 = vmatmul.mubr.bf16.gmra.mrb[56].mxu1 %v10736_v61  ;;  %v10386_v61 = vcombine.low %v519_v37, %v535_v38  ;;  %v647_v37 = vld [vmem:[%s13737_s5 + $0x720] sm:$0xff] }
 0x2f7   : > { %8859 = vmatmul.mubr.bf16.gmra.mrb[56].mxu0 %v10752_v62  ;;  %7324 = vmatprep.mubr.bf16.mxu1 %v10769_v63  ;;  %v10402_v62 = vcombine.low %v527_v39, %v543_v40  ;;  %v10419_v63 = vcombine.high %v551_v53, %v567_v54  ;;  %v663_v38 = vld [vmem:[%s13737_s5 + $0x7a0] sm:$0xff] }
 0x2f8   : > { %8868 = vmatprep.mubr.bf16.mxu0 %v10785_v0  ;;  %v10435_v0 = vcombine.high %v559_v55, %v575_v56  ;;  %v655_v39 = vld [vmem:[%s13737_s5 + $0x760] sm:$0xff] }
 0x2f9   : > { %v671_v40 = vld [vmem:[%s13737_s5 + $0x7e0] sm:$0xff] }
 0x2fe   : > { %7325 = vmatmul.mubr.bf16.gmra.mrb[60].mxu1 %v10768_v5  ;;  %v583_v5 = vld [vmem:[%s13737_s5 + $0x520] sm:$0xff] }
 0x2ff   : > { %8869 = vmatmul.mubr.bf16.gmra.mrb[60].mxu0 %v10784_v6  ;;  %7367 = vmatprep.mubr.bf16.mxu1 %v10291_v7  ;;  %v599_v6 = vld [vmem:[%s13737_s5 + $0x5a0] sm:$0xff] }
 0x300   : > { %8911 = vmatprep.mubr.bf16.mxu0 %v10307_v8  ;;  %v591_v7 = vld [vmem:[%s13737_s5 + $0x560] sm:$0xff] }
 0x301   : > { %v607_v8 = vld [vmem:[%s13737_s5 + $0x5e0] sm:$0xff] }
 0x306   : > { %7368 = vmatmul.mubr.bf16.vlgmr.msra.gmra.mrb[0].mxu1 %v10290_v13  ;;  %v10418_v13 = vcombine.low %v551_v53, %v567_v54  ;;  %v679_v53 = vld [vmem:[%s13737_s5 + $0x820] sm:$0xff] }
 0x307   : > { %8912 = vmatmul.mubr.bf16.vlgmr.msra.gmra.mrb[0].mxu0 %v10306_v14  ;;  %7529 = vmatpush1.bf16.msra.mxu1 %v12907_v15  ;;  %v10434_v14 = vcombine.low %v559_v55, %v575_v56  ;;  %v10451_v15 = vcombine.high %v583_v5, %v599_v6  ;;  %v695_v54 = vld [vmem:[%s13737_s5 + $0x8a0] sm:$0xff] }
 0x308   : > { %9073 = vmatpush1.bf16.msra.mxu0 %v12910_v16  ;;  %7377 = vmatprep.mubr.bf16.mxu1 %v10323_v17  ;;  %v10467_v16 = vcombine.high %v591_v7, %v607_v8  ;;  %v12955_v17 = vld [vmem:[%s13745_s6 + $0x580] ss:$8 sps:$4 sm:$0xff]  }
 0x309   : > { %8921 = vmatprep.mubr.bf16.mxu0 %v10339_v18  ;;  %7530 = vmatprep.subr.bf16.mxu1 %v12915_v19  ;;  %v12958_v18 = vld [vmem:[%s13745_s6 + $0xd80] ss:$8 sps:$4 sm:$0xff]   ;;  %v12963_v19 = vld [vmem:[%s13745_s6 + $0x594] ss:$8 sps:$4 sm:$0xff]  }
 0x30a   : > { %9074 = vmatprep.subr.bf16.mxu0 %v12918_v20  ;;  %v12966_v20 = vld [vmem:[%s13745_s6 + $0xd94] ss:$8 sps:$4 sm:$0xff]   ;;  %v687_v55 = vld [vmem:[%s13737_s5 + $0x860] sm:$0xff] }
 0x30b   : > { %7531 = vmatpush1.bf16.msra.mxu1 %v12913_v21  ;;  %v615_v21 = vld [vmem:[%s13737_s5 + $0x620] sm:$0xff] }
 0x30c   : > { %9075 = vmatpush1.bf16.msra.mxu0 %v12916_v22  ;;  %7532 = vmatprep.subr.bf16.mxu1 %v12921_v27  ;;  %v631_v22 = vld [vmem:[%s13737_s5 + $0x6a0] sm:$0xff] }
 0x30d   : > { %9076 = vmatprep.subr.bf16.mxu0 %v12924_v28  ;;  %v12969_v27 = vld [vmem:[%s13745_s6 + $0x5a4] ss:$8 sps:$4 sm:$0xff]  }
 0x30e   : > { %7378 = vmatmul.mubr.bf16.gmra.mrb[4].mxu1 %v10322_v29  ;;  %v12972_v28 = vld [vmem:[%s13745_s6 + $0xda4] ss:$8 sps:$4 sm:$0xff]   ;;  %v10450_v29 = vcombine.low %v583_v5, %v599_v6 }
 0x30f   : > { %8922 = vmatmul.mubr.bf16.gmra.mrb[4].mxu0 %v10338_v30  ;;  %7387 = vmatprep.mubr.bf16.mxu1 %v10355_v31  ;;  %v10466_v30 = vcombine.low %v591_v7, %v607_v8  ;;  %v10483_v31 = vcombine.high %v615_v21, %v631_v22  ;;  %v703_v56 = vld [vmem:[%s13737_s5 + $0x8e0] sm:$0xff] }
 0x310   : > { %8931 = vmatprep.mubr.bf16.mxu0 %v10371_v32  ;;  %7533 = vmatpush1.bf16.msra.mxu1 %v12919_v33  ;;  %v10499_v32 = vcombine.high %v623_v23, %v639_v24  ;;  %v12967_v33 = vld [vmem:[%s13745_s6 + $0x5a0] ss:$8 sps:$4 sm:$0xff]  }
 0x311   : > { %9077 = vmatpush1.bf16.msra.mxu0 %v12922_v34  ;;  %7534 = vmatprep.subr.bf16.mxu1 %v12927_v35  ;;  %v12970_v34 = vld [vmem:[%s13745_s6 + $0xda0] ss:$8 sps:$4 sm:$0xff]   ;;  %v12975_v35 = vld [vmem:[%s13745_s6 + $0x5b4] ss:$8 sps:$4 sm:$0xff]  }
 0x312   : > { %9078 = vmatprep.subr.bf16.mxu0 %v12930_v36  ;;  %v12978_v36 = vld [vmem:[%s13745_s6 + $0xdb4] ss:$8 sps:$4 sm:$0xff]   ;;  %v711_v5 = vld [vmem:[%s13737_s5 + $0x920] sm:$0xff] }
 0x313   : > { %v727_v6 = vld [vmem:[%s13737_s5 + $0x9a0] sm:$0xff] }
 0x314   : > { %7535 = vmatpush1.bf16.msra.mxu1 %v12925_v41  ;;  %v12973_v41 = vld [vmem:[%s13745_s6 + $0x5b0] ss:$8 sps:$4 sm:$0xff]   ;;  %v719_v7 = vld [vmem:[%s13737_s5 + $0x960] sm:$0xff] }
 0x315   : > { %9079 = vmatpush1.bf16.msra.mxu0 %v12928_v42  ;;  %7536 = vmatprep.subr.bf16.mxu1 %v12933_v43  ;;  %v12976_v42 = vld [vmem:[%s13745_s6 + $0xdb0] ss:$8 sps:$4 sm:$0xff]   ;;  %v12981_v43 = vld [vmem:[%s13745_s6 + $0x5c4] ss:$8 sps:$4 sm:$0xff]  }
 0x316   : > { %9080 = vmatprep.subr.bf16.mxu0 %v12936_v44  ;;  %7388 = vmatmul.mubr.bf16.gmra.mrb[8].mxu1 %v10354_v45  ;;  %v12984_v44 = vld [vmem:[%s13745_s6 + $0xdc4] ss:$8 sps:$4 sm:$0xff]   ;;  %v10482_v45 = vcombine.low %v615_v21, %v631_v22  ;;  %v10578_v21 = vcombine.low %v711_v5, %v727_v6 }
 0x317   : > { %8932 = vmatmul.mubr.bf16.gmra.mrb[8].mxu0 %v10370_v46  ;;  %7397 = vmatprep.mubr.bf16.mxu1 %v10387_v47  ;;  %v10498_v46 = vcombine.low %v623_v23, %v639_v24  ;;  %v10515_v47 = vcombine.high %v647_v37, %v663_v38  ;;  %v735_v8 = vld [vmem:[%s13737_s5 + $0x9e0] sm:$0xff] }
 0x318   : > { %8941 = vmatprep.mubr.bf16.mxu0 %v10403_v48  ;;  %7537 = vmatpush1.bf16.msra.mxu1 %v12931_v49  ;;  %v10531_v48 = vcombine.high %v655_v39, %v671_v40  ;;  %v12979_v49 = vld [vmem:[%s13745_s6 + $0x5c0] ss:$8 sps:$4 sm:$0xff]   ;;  %v10594_v22 = vcombine.low %v719_v7, %v735_v8 }
 0x319   : > { %9081 = vmatpush1.bf16.msra.mxu0 %v12934_v50  ;;  %7538 = vmatprep.subr.bf16.mxu1 %v12939_v51  ;;  %v12982_v50 = vld [vmem:[%s13745_s6 + $0xdc0] ss:$8 sps:$4 sm:$0xff]   ;;  %v12987_v51 = vld [vmem:[%s13745_s6 + $0x5d4] ss:$8 sps:$4 sm:$0xff]  }
 0x31a   : > { %9082 = vmatprep.subr.bf16.mxu0 %v12942_v52  ;;  %v12990_v52 = vld [vmem:[%s13745_s6 + $0xdd4] ss:$8 sps:$4 sm:$0xff]  }
 0x31c   : > { %7539 = vmatpush1.bf16.msra.mxu1 %v12937_v57  ;;  %v12985_v57 = vld [vmem:[%s13745_s6 + $0x5d0] ss:$8 sps:$4 sm:$0xff]  }
 0x31d   : > { %9083 = vmatpush1.bf16.msra.mxu0 %v12940_v58  ;;  %7540 = vmatprep.subr.bf16.mxu1 %v12945_v59  ;;  %v12988_v58 = vld [vmem:[%s13745_s6 + $0xdd0] ss:$8 sps:$4 sm:$0xff]   ;;  %v12993_v59 = vld [vmem:[%s13745_s6 + $0x5e4] ss:$8 sps:$4 sm:$0xff]  }
 0x31e   : > { %9084 = vmatprep.subr.bf16.mxu0 %v12948_v60  ;;  %7398 = vmatmul.mubr.bf16.gmra.mrb[12].mxu1 %v10386_v61  ;;  %v12996_v60 = vld [vmem:[%s13745_s6 + $0xde4] ss:$8 sps:$4 sm:$0xff]   ;;  %v10514_v61 = vcombine.low %v647_v37, %v663_v38 }
 0x31f   : > { %8942 = vmatmul.mubr.bf16.gmra.mrb[12].mxu0 %v10402_v62  ;;  %7407 = vmatprep.mubr.bf16.mxu1 %v10419_v63  ;;  %v10530_v62 = vcombine.low %v655_v39, %v671_v40  ;;  %v10547_v63 = vcombine.high %v679_v53, %v695_v54 }
 0x320   : > { %8951 = vmatprep.mubr.bf16.mxu0 %v10435_v0  ;;  %7541 = vmatpush1.bf16.msra.mxu1 %v12943_v1  ;;  %v10563_v0 = vcombine.high %v687_v55, %v703_v56  ;;  %v12991_v1 = vld [vmem:[%s13745_s6 + $0x5e0] ss:$8 sps:$4 sm:$0xff]  }
 0x321   : > { %9085 = vmatpush1.bf16.msra.mxu0 %v12946_v2  ;;  %7542 = vmatprep.subr.bf16.mxu1 %v12951_v3  ;;  %v12994_v2 = vld [vmem:[%s13745_s6 + $0xde0] ss:$8 sps:$4 sm:$0xff]   ;;  %v12999_v3 = vld [vmem:[%s13745_s6 + $0x5f4] ss:$8 sps:$4 sm:$0xff]  }
 0x322   : > { %9086 = vmatprep.subr.bf16.mxu0 %v12954_v4  ;;  %v13002_v4 = vld [vmem:[%s13745_s6 + $0xdf4] ss:$8 sps:$4 sm:$0xff]  }
 0x324   : > { %7543 = vmatpush1.bf16.msra.mxu1 %v12949_v9  ;;  %v12997_v9 = vld [vmem:[%s13745_s6 + $0x5f0] ss:$8 sps:$4 sm:$0xff]  }
 0x325   : > { %9087 = vmatpush1.bf16.msra.mxu0 %v12952_v10  ;;  %7544 = vmatprep.subr.bf16.mxu1 %v12957_v11  ;;  %v13000_v10 = vld [vmem:[%s13745_s6 + $0xdf0] ss:$8 sps:$4 sm:$0xff]   ;;  %v13005_v11 = vld [vmem:[%s13745_s6 + $0x604] ss:$8 sps:$4 sm:$0xff]  }
 0x326   : > { %9088 = vmatprep.subr.bf16.mxu0 %v12960_v12  ;;  %7408 = vmatmul.mubr.bf16.gmra.mrb[16].mxu1 %v10418_v13  ;;  %v13008_v12 = vld [vmem:[%s13745_s6 + $0xe04] ss:$8 sps:$4 sm:$0xff]   ;;  %v10546_v13 = vcombine.low %v679_v53, %v695_v54 }
 0x327   : > { %8952 = vmatmul.mubr.bf16.gmra.mrb[16].mxu0 %v10434_v14  ;;  %7417 = vmatprep.mubr.bf16.mxu1 %v10451_v15  ;;  %v10562_v14 = vcombine.low %v687_v55, %v703_v56  ;;  %v10579_v15 = vcombine.high %v711_v5, %v727_v6 }
 0x328   : > { %8961 = vmatprep.mubr.bf16.mxu0 %v10467_v16  ;;  %7545 = vmatpush1.bf16.msra.mxu1 %v12955_v17  ;;  %v10595_v16 = vcombine.high %v719_v7, %v735_v8  ;;  %v743_v17 = vld [vmem:[%s13737_s5 + $0xa20] sm:$0xff] }
 0x329   : > { %9089 = vmatpush1.bf16.msra.mxu0 %v12958_v18  ;;  %7546 = vmatprep.subr.bf16.mxu1 %v12963_v19  ;;  %v759_v18 = vld [vmem:[%s13737_s5 + $0xaa0] sm:$0xff] }
 0x32a   : > { %9090 = vmatprep.subr.bf16.mxu0 %v12966_v20  ;;  %v751_v19 = vld [vmem:[%s13737_s5 + $0xa60] sm:$0xff]  ;;  %v10611_v23 = vcombine.high %v743_v17, %v759_v18 }
 0x32b   : > { %v767_v20 = vld [vmem:[%s13737_s5 + $0xae0] sm:$0xff] }
 0x32c   : > { %7547 = vmatpush1.bf16.msra.mxu1 %v12961_v25  ;;  %v10627_v24 = vcombine.high %v751_v19, %v767_v20  ;;  %v775_v25 = vld [vmem:[%s13737_s5 + $0xb20] sm:$0xff] }
 0x32d   : > { %9091 = vmatpush1.bf16.msra.mxu0 %v12964_v26  ;;  %7548 = vmatprep.subr.bf16.mxu1 %v12969_v27  ;;  %v791_v26 = vld [vmem:[%s13737_s5 + $0xba0] sm:$0xff] }
 0x32e   : > { %9092 = vmatprep.subr.bf16.mxu0 %v12972_v28  ;;  %7418 = vmatmul.mubr.bf16.gmra.mrb[20].mxu1 %v10450_v29  ;;  %v783_v27 = vld [vmem:[%s13737_s5 + $0xb60] sm:$0xff]  ;;  %v10610_v29 = vcombine.low %v743_v17, %v759_v18  ;;  %v10642_v37 = vcombine.low %v775_v25, %v791_v26 }
 0x32f   : > { %8962 = vmatmul.mubr.bf16.gmra.mrb[20].mxu0 %v10466_v30  ;;  %7427 = vmatprep.mubr.bf16.mxu1 %v10483_v31  ;;  %v799_v28 = vld [vmem:[%s13737_s5 + $0xbe0] sm:$0xff]  ;;  %v10626_v30 = vcombine.low %v751_v19, %v767_v20  ;;  %v10643_v31 = vcombine.high %v775_v25, %v791_v26  ;;  %v13011_v19 = vld [vmem:[%s13745_s6 + $0x614] ss:$8 sps:$4 sm:$0xff]   ;;  %v496_v25 = vld [vmem:[%s13737_s5 + $0x268] sm:$0xff] }
 0x330   : > { %8971 = vmatprep.mubr.bf16.mxu0 %v10499_v32  ;;  %7549 = vmatpush1.bf16.msra.mxu1 %v12967_v33  ;;  %v10659_v32 = vcombine.high %v783_v27, %v799_v28  ;;  %v807_v33 = vld [vmem:[%s13737_s5 + $0xc20] sm:$0xff]  ;;  %v10658_v38 = vcombine.low %v783_v27, %v799_v28  ;;  %v13014_v20 = vld [vmem:[%s13745_s6 + $0xe14] ss:$8 sps:$4 sm:$0xff]   ;;  %v512_v26 = vld [vmem:[%s13737_s5 + $0x2e8] sm:$0xff] }
 0x331   : > { %9093 = vmatpush1.bf16.msra.mxu0 %v12970_v34  ;;  %7550 = vmatprep.subr.bf16.mxu1 %v12975_v35  ;;  %v823_v34 = vld [vmem:[%s13737_s5 + $0xca0] sm:$0xff] }
 0x332   : > { %9094 = vmatprep.subr.bf16.mxu0 %v12978_v36  ;;  %v815_v35 = vld [vmem:[%s13737_s5 + $0xc60] sm:$0xff]  ;;  %v10675_v39 = vcombine.high %v807_v33, %v823_v34 }
 0x333   : > { %v831_v36 = vld [vmem:[%s13737_s5 + $0xce0] sm:$0xff] }
 0x334   : > { %7551 = vmatpush1.bf16.msra.mxu1 %v12973_v41  ;;  %v10691_v40 = vcombine.high %v815_v35, %v831_v36  ;;  %v839_v41 = vld [vmem:[%s13737_s5 + $0xd20] sm:$0xff] }
 0x335   : > { %9095 = vmatpush1.bf16.msra.mxu0 %v12976_v42  ;;  %7552 = vmatprep.subr.bf16.mxu1 %v12981_v43  ;;  %v855_v42 = vld [vmem:[%s13737_s5 + $0xda0] sm:$0xff] }
 0x336   : > { %9096 = vmatprep.subr.bf16.mxu0 %v12984_v44  ;;  %7428 = vmatmul.mubr.bf16.gmra.mrb[24].mxu1 %v10482_v45  ;;  %v847_v43 = vld [vmem:[%s13737_s5 + $0xd60] sm:$0xff]  ;;  %v10674_v45 = vcombine.low %v807_v33, %v823_v34  ;;  %v10706_v53 = vcombine.low %v839_v41, %v855_v42 }
 0x337   : > { %8972 = vmatmul.mubr.bf16.gmra.mrb[24].mxu0 %v10498_v46  ;;  %7437 = vmatprep.mubr.bf16.mxu1 %v10515_v47  ;;  %v863_v44 = vld [vmem:[%s13737_s5 + $0xde0] sm:$0xff]  ;;  %v10690_v46 = vcombine.low %v815_v35, %v831_v36  ;;  %v10707_v47 = vcombine.high %v839_v41, %v855_v42  ;;  %v13023_v35 = vld [vmem:[%s13745_s6 + $0x634] ss:$8 sps:$4 sm:$0xff]   ;;  %v13021_v41 = vld [vmem:[%s13745_s6 + $0x630] ss:$8 sps:$4 sm:$0xff]  }
 0x338   : > { %8981 = vmatprep.mubr.bf16.mxu0 %v10531_v48  ;;  %7553 = vmatpush1.bf16.msra.mxu1 %v12979_v49  ;;  %v10723_v48 = vcombine.high %v847_v43, %v863_v44  ;;  %v871_v49 = vld [vmem:[%s13737_s5 + $0xe20] sm:$0xff]  ;;  %v10722_v54 = vcombine.low %v847_v43, %v863_v44  ;;  %v13026_v36 = vld [vmem:[%s13745_s6 + $0xe34] ss:$8 sps:$4 sm:$0xff]   ;;  %v13024_v42 = vld [vmem:[%s13745_s6 + $0xe30] ss:$8 sps:$4 sm:$0xff]  }
 0x339   : > { %9097 = vmatpush1.bf16.msra.mxu0 %v12982_v50  ;;  %7554 = vmatprep.subr.bf16.mxu1 %v12987_v51  ;;  %v887_v50 = vld [vmem:[%s13737_s5 + $0xea0] sm:$0xff] }
 0x33a   : > { %9098 = vmatprep.subr.bf16.mxu0 %v12990_v52  ;;  %v879_v51 = vld [vmem:[%s13737_s5 + $0xe60] sm:$0xff]  ;;  %v10739_v55 = vcombine.high %v871_v49, %v887_v50 }
 0x33b   : > { %v895_v52 = vld [vmem:[%s13737_s5 + $0xee0] sm:$0xff] }
 0x33c   : > { %7555 = vmatpush1.bf16.msra.mxu1 %v12985_v57  ;;  %v10755_v56 = vcombine.high %v879_v51, %v895_v52  ;;  %v903_v57 = vld [vmem:[%s13737_s5 + $0xf20] sm:$0xff] }
 0x33d   : > { %9099 = vmatpush1.bf16.msra.mxu0 %v12988_v58  ;;  %7556 = vmatprep.subr.bf16.mxu1 %v12993_v59  ;;  %v919_v58 = vld [vmem:[%s13737_s5 + $0xfa0] sm:$0xff] }
 0x33e   : > { %9100 = vmatprep.subr.bf16.mxu0 %v12996_v60  ;;  %7438 = vmatmul.mubr.bf16.gmra.mrb[28].mxu1 %v10514_v61  ;;  %v911_v59 = vld [vmem:[%s13737_s5 + $0xf60] sm:$0xff]  ;;  %v10738_v61 = vcombine.low %v871_v49, %v887_v50  ;;  %v10770_v5 = vcombine.low %v903_v57, %v919_v58 }
 0x33f   : > { %8982 = vmatmul.mubr.bf16.gmra.mrb[28].mxu0 %v10530_v62  ;;  %7447 = vmatprep.mubr.bf16.mxu1 %v10547_v63  ;;  %v927_v60 = vld [vmem:[%s13737_s5 + $0xfe0] sm:$0xff]  ;;  %v10754_v62 = vcombine.low %v879_v51, %v895_v52  ;;  %v10771_v63 = vcombine.high %v903_v57, %v919_v58  ;;  %v13035_v51 = vld [vmem:[%s13745_s6 + $0x654] ss:$8 sps:$4 sm:$0xff]   ;;  %v13033_v57 = vld [vmem:[%s13745_s6 + $0x650] ss:$8 sps:$4 sm:$0xff]  }
 0x340   : > { %8991 = vmatprep.mubr.bf16.mxu0 %v10563_v0  ;;  %7557 = vmatpush1.bf16.msra.mxu1 %v12991_v1  ;;  %v10787_v0 = vcombine.high %v911_v59, %v927_v60  ;;  %v424_v1 = vld [vmem:[%s13737_s5 + $0x28] sm:$0xff]  ;;  %v10786_v6 = vcombine.low %v911_v59, %v927_v60  ;;  %v13038_v52 = vld [vmem:[%s13745_s6 + $0xe54] ss:$8 sps:$4 sm:$0xff]   ;;  %v13036_v58 = vld [vmem:[%s13745_s6 + $0xe50] ss:$8 sps:$4 sm:$0xff]  }
 0x341   : > { %9101 = vmatpush1.bf16.msra.mxu0 %v12994_v2  ;;  %7558 = vmatprep.subr.bf16.mxu1 %v12999_v3  ;;  %v440_v2 = vld [vmem:[%s13737_s5 + $0xa8] sm:$0xff] }
 0x342   : > { %9102 = vmatprep.subr.bf16.mxu0 %v13002_v4  ;;  %v432_v3 = vld [vmem:[%s13737_s5 + $0x68] sm:$0xff]  ;;  %v10293_v7 = vcombine.high %v424_v1, %v440_v2 }
 0x343   : > { %v448_v4 = vld [vmem:[%s13737_s5 + $0xe8] sm:$0xff] }
 0x344   : > { %7559 = vmatpush1.bf16.msra.mxu1 %v12997_v9  ;;  %v10309_v8 = vcombine.high %v432_v3, %v448_v4  ;;  %v456_v9 = vld [vmem:[%s13737_s5 + $0x128] sm:$0xff] }
 0x345   : > { %9103 = vmatpush1.bf16.msra.mxu0 %v13000_v10  ;;  %7721 = vmatprep.subr.bf16.mxu1 %v13005_v11  ;;  %v472_v10 = vld [vmem:[%s13737_s5 + $0x1a8] sm:$0xff] }
 0x346   : > { %9265 = vmatprep.subr.bf16.mxu0 %v13008_v12  ;;  %7448 = vmatmul.mubr.bf16.gmra.mrb[32].mxu1 %v10546_v13  ;;  %v464_v11 = vld [vmem:[%s13737_s5 + $0x168] sm:$0xff]  ;;  %v10292_v13 = vcombine.low %v424_v1, %v440_v2  ;;  %v10325_v17 = vcombine.high %v456_v9, %v472_v10 }
 0x347   : > { %8992 = vmatmul.mubr.bf16.gmra.mrb[32].mxu0 %v10562_v14  ;;  %7457 = vmatprep.mubr.bf16.mxu1 %v10579_v15  ;;  %v480_v12 = vld [vmem:[%s13737_s5 + $0x1e8] sm:$0xff]  ;;  %v10308_v14 = vcombine.low %v432_v3, %v448_v4  ;;  %v13047_v3 = vld [vmem:[%s13745_s6 + $0x674] ss:$8 sps:$4 sm:$0xff]  }
 0x348   : > { %9001 = vmatprep.mubr.bf16.mxu0 %v10595_v16  ;;  %v13003_v15 = vld [vmem:[%s13745_s6 + $0x600] ss:$8 sps:$4 sm:$0xff]   ;;  %v10341_v18 = vcombine.high %v464_v11, %v480_v12  ;;  %v13017_v27 = vld [vmem:[%s13745_s6 + $0x624] ss:$8 sps:$4 sm:$0xff]   ;;  %v13050_v4 = vld [vmem:[%s13745_s6 + $0xe74] ss:$8 sps:$4 sm:$0xff]  }
 0x349   : > { %v13006_v16 = vld [vmem:[%s13745_s6 + $0xe00] ss:$8 sps:$4 sm:$0xff]   ;;  %v13020_v28 = vld [vmem:[%s13745_s6 + $0xe24] ss:$8 sps:$4 sm:$0xff]  }
 0x34a   : > { %v13015_v33 = vld [vmem:[%s13745_s6 + $0x620] ss:$8 sps:$4 sm:$0xff]   ;;  %v13029_v43 = vld [vmem:[%s13745_s6 + $0x644] ss:$8 sps:$4 sm:$0xff]  }
 0x34b   : > { %v13018_v34 = vld [vmem:[%s13745_s6 + $0xe20] ss:$8 sps:$4 sm:$0xff]   ;;  %v13032_v44 = vld [vmem:[%s13745_s6 + $0xe44] ss:$8 sps:$4 sm:$0xff]  }
 0x34c   : > { %v13027_v49 = vld [vmem:[%s13745_s6 + $0x640] ss:$8 sps:$4 sm:$0xff]   ;;  %v13041_v59 = vld [vmem:[%s13745_s6 + $0x664] ss:$8 sps:$4 sm:$0xff]  }
 0x34d   : > { %v13030_v50 = vld [vmem:[%s13745_s6 + $0xe40] ss:$8 sps:$4 sm:$0xff]   ;;  %v13044_v60 = vld [vmem:[%s13745_s6 + $0xe64] ss:$8 sps:$4 sm:$0xff]  }
 0x34e   : > { %7458 = vmatmul.mubr.bf16.gmra.mrb[36].mxu1 %v10578_v21  ;;  %v13009_v21 = vld [vmem:[%s13745_s6 + $0x610] ss:$8 sps:$4 sm:$0xff]   ;;  %v13039_v1 = vld [vmem:[%s13745_s6 + $0x660] ss:$8 sps:$4 sm:$0xff]  }
 0x34f   : > { %9002 = vmatmul.mubr.bf16.gmra.mrb[36].mxu0 %v10594_v22  ;;  %7467 = vmatprep.mubr.bf16.mxu1 %v10611_v23  ;;  %v13012_v22 = vld [vmem:[%s13745_s6 + $0xe10] ss:$8 sps:$4 sm:$0xff]   ;;  %v488_v23 = vld [vmem:[%s13737_s5 + $0x228] sm:$0xff] }
 0x350   : > { %9011 = vmatprep.mubr.bf16.mxu0 %v10627_v24  ;;  %v504_v24 = vld [vmem:[%s13737_s5 + $0x2a8] sm:$0xff] }
 0x351   : > { %v13042_v2 = vld [vmem:[%s13745_s6 + $0xe60] ss:$8 sps:$4 sm:$0xff]  }
 0x356   : > { %7468 = vmatmul.mubr.bf16.gmra.mrb[40].mxu1 %v10610_v29  ;;  %v10324_v29 = vcombine.low %v456_v9, %v472_v10  ;;  %v13045_v9 = vld [vmem:[%s13745_s6 + $0x670] ss:$8 sps:$4 sm:$0xff]  }
 0x357   : > { %9012 = vmatmul.mubr.bf16.gmra.mrb[40].mxu0 %v10626_v30  ;;  %7477 = vmatprep.mubr.bf16.mxu1 %v10643_v31  ;;  %v10340_v30 = vcombine.low %v464_v11, %v480_v12  ;;  %v10357_v31 = vcombine.high %v488_v23, %v504_v24  ;;  %v13048_v10 = vld [vmem:[%s13745_s6 + $0xe70] ss:$8 sps:$4 sm:$0xff]   ;;  %v13053_v11 = vld [vmem:[%s13745_s6 + $0x684] ss:$8 sps:$4 sm:$0xff]  }
 0x358   : > { %9021 = vmatprep.mubr.bf16.mxu0 %v10659_v32  ;;  %v10373_v32 = vcombine.high %v496_v25, %v512_v26  ;;  %v13056_v12 = vld [vmem:[%s13745_s6 + $0xe84] ss:$8 sps:$4 sm:$0xff]  }
 0x35e   : > { %7478 = vmatmul.mubr.bf16.gmra.mrb[44].mxu1 %v10642_v37  ;;  %v520_v37 = vld [vmem:[%s13737_s5 + $0x328] sm:$0xff] }
 0x35f   : > { %9022 = vmatmul.mubr.bf16.gmra.mrb[44].mxu0 %v10658_v38  ;;  %7487 = vmatprep.mubr.bf16.mxu1 %v10675_v39  ;;  %v536_v38 = vld [vmem:[%s13737_s5 + $0x3a8] sm:$0xff] }
 0x360   : > { %9031 = vmatprep.mubr.bf16.mxu0 %v10691_v40  ;;  %v528_v39 = vld [vmem:[%s13737_s5 + $0x368] sm:$0xff] }
 0x361   : > { %v544_v40 = vld [vmem:[%s13737_s5 + $0x3e8] sm:$0xff] }
 0x366   : > { %7488 = vmatmul.mubr.bf16.gmra.mrb[48].mxu1 %v10674_v45  ;;  %v10356_v45 = vcombine.low %v488_v23, %v504_v24  ;;  %v624_v23 = vld [vmem:[%s13737_s5 + $0x668] sm:$0xff] }
 0x367   : > { %9032 = vmatmul.mubr.bf16.gmra.mrb[48].mxu0 %v10690_v46  ;;  %7497 = vmatprep.mubr.bf16.mxu1 %v10707_v47  ;;  %v10372_v46 = vcombine.low %v496_v25, %v512_v26  ;;  %v10389_v47 = vcombine.high %v520_v37, %v536_v38  ;;  %v640_v24 = vld [vmem:[%s13737_s5 + $0x6e8] sm:$0xff]  ;;  %v13057_v25 = vld [vmem:[%s13745_s6 + $0x690] ss:$8 sps:$4 sm:$0xff]  }
 0x368   : > { %9041 = vmatprep.mubr.bf16.mxu0 %v10723_v48  ;;  %v10405_v48 = vcombine.high %v528_v39, %v544_v40  ;;  %v13060_v26 = vld [vmem:[%s13745_s6 + $0xe90] ss:$8 sps:$4 sm:$0xff]  }
 0x36e   : > { %7498 = vmatmul.mubr.bf16.gmra.mrb[52].mxu1 %v10706_v53  ;;  %v552_v53 = vld [vmem:[%s13737_s5 + $0x428] sm:$0xff] }
 0x36f   : > { %9042 = vmatmul.mubr.bf16.gmra.mrb[52].mxu0 %v10722_v54  ;;  %7507 = vmatprep.mubr.bf16.mxu1 %v10739_v55  ;;  %v568_v54 = vld [vmem:[%s13737_s5 + $0x4a8] sm:$0xff] }
 0x370   : > { %9051 = vmatprep.mubr.bf16.mxu0 %v10755_v56  ;;  %v560_v55 = vld [vmem:[%s13737_s5 + $0x468] sm:$0xff] }
 0x371   : > { %v576_v56 = vld [vmem:[%s13737_s5 + $0x4e8] sm:$0xff] }
 0x376   : > { %7508 = vmatmul.mubr.bf16.gmra.mrb[56].mxu1 %v10738_v61  ;;  %v10388_v61 = vcombine.low %v520_v37, %v536_v38  ;;  %v648_v37 = vld [vmem:[%s13737_s5 + $0x728] sm:$0xff] }
 0x377   : > { %9052 = vmatmul.mubr.bf16.gmra.mrb[56].mxu0 %v10754_v62  ;;  %7517 = vmatprep.mubr.bf16.mxu1 %v10771_v63  ;;  %v10404_v62 = vcombine.low %v528_v39, %v544_v40  ;;  %v10421_v63 = vcombine.high %v552_v53, %v568_v54  ;;  %v664_v38 = vld [vmem:[%s13737_s5 + $0x7a8] sm:$0xff] }
 0x378   : > { %9061 = vmatprep.mubr.bf16.mxu0 %v10787_v0  ;;  %v10437_v0 = vcombine.high %v560_v55, %v576_v56  ;;  %v656_v39 = vld [vmem:[%s13737_s5 + $0x768] sm:$0xff] }
 0x379   : > { %v672_v40 = vld [vmem:[%s13737_s5 + $0x7e8] sm:$0xff] }
 0x37e   : > { %7518 = vmatmul.mubr.bf16.gmra.mrb[60].mxu1 %v10770_v5  ;;  %v584_v5 = vld [vmem:[%s13737_s5 + $0x528] sm:$0xff] }
 0x37f   : > { %9062 = vmatmul.mubr.bf16.gmra.mrb[60].mxu0 %v10786_v6  ;;  %7560 = vmatprep.mubr.bf16.mxu1 %v10293_v7  ;;  %v600_v6 = vld [vmem:[%s13737_s5 + $0x5a8] sm:$0xff] }
 0x380   : > { %9104 = vmatprep.mubr.bf16.mxu0 %v10309_v8  ;;  %v592_v7 = vld [vmem:[%s13737_s5 + $0x568] sm:$0xff] }
 0x381   : > { %v608_v8 = vld [vmem:[%s13737_s5 + $0x5e8] sm:$0xff] }
 0x386   : > { %7561 = vmatmul.mubr.bf16.vlgmr.msra.gmra.mrb[0].mxu1 %v10292_v13  ;;  %v10420_v13 = vcombine.low %v552_v53, %v568_v54  ;;  %v680_v53 = vld [vmem:[%s13737_s5 + $0x828] sm:$0xff] }
 0x387   : > { %9105 = vmatmul.mubr.bf16.vlgmr.msra.gmra.mrb[0].mxu0 %v10308_v14  ;;  %7722 = vmatpush1.bf16.msra.mxu1 %v13003_v15  ;;  %v10436_v14 = vcombine.low %v560_v55, %v576_v56  ;;  %v10453_v15 = vcombine.high %v584_v5, %v600_v6  ;;  %v696_v54 = vld [vmem:[%s13737_s5 + $0x8a8] sm:$0xff] }
 0x388   : > { %9266 = vmatpush1.bf16.msra.mxu0 %v13006_v16  ;;  %7570 = vmatprep.mubr.bf16.mxu1 %v10325_v17  ;;  %v10469_v16 = vcombine.high %v592_v7, %v608_v8  ;;  %v13051_v17 = vld [vmem:[%s13745_s6 + $0x680] ss:$8 sps:$4 sm:$0xff]  }
 0x389   : > { %9114 = vmatprep.mubr.bf16.mxu0 %v10341_v18  ;;  %7723 = vmatprep.subr.bf16.mxu1 %v13011_v19  ;;  %v13054_v18 = vld [vmem:[%s13745_s6 + $0xe80] ss:$8 sps:$4 sm:$0xff]   ;;  %v13059_v19 = vld [vmem:[%s13745_s6 + $0x694] ss:$8 sps:$4 sm:$0xff]  }
 0x38a   : > { %9267 = vmatprep.subr.bf16.mxu0 %v13014_v20  ;;  %v13062_v20 = vld [vmem:[%s13745_s6 + $0xe94] ss:$8 sps:$4 sm:$0xff]   ;;  %v688_v55 = vld [vmem:[%s13737_s5 + $0x868] sm:$0xff] }
 0x38b   : > { %7724 = vmatpush1.bf16.msra.mxu1 %v13009_v21  ;;  %v616_v21 = vld [vmem:[%s13737_s5 + $0x628] sm:$0xff] }
 0x38c   : > { %9268 = vmatpush1.bf16.msra.mxu0 %v13012_v22  ;;  %7725 = vmatprep.subr.bf16.mxu1 %v13017_v27  ;;  %v632_v22 = vld [vmem:[%s13737_s5 + $0x6a8] sm:$0xff] }
 0x38d   : > { %9269 = vmatprep.subr.bf16.mxu0 %v13020_v28  ;;  %v13065_v27 = vld [vmem:[%s13745_s6 + $0x6a4] ss:$8 sps:$4 sm:$0xff]  }
 0x38e   : > { %7571 = vmatmul.mubr.bf16.gmra.mrb[4].mxu1 %v10324_v29  ;;  %v13068_v28 = vld [vmem:[%s13745_s6 + $0xea4] ss:$8 sps:$4 sm:$0xff]   ;;  %v10452_v29 = vcombine.low %v584_v5, %v600_v6 }
 0x38f   : > { %9115 = vmatmul.mubr.bf16.gmra.mrb[4].mxu0 %v10340_v30  ;;  %7580 = vmatprep.mubr.bf16.mxu1 %v10357_v31  ;;  %v10468_v30 = vcombine.low %v592_v7, %v608_v8  ;;  %v10485_v31 = vcombine.high %v616_v21, %v632_v22  ;;  %v704_v56 = vld [vmem:[%s13737_s5 + $0x8e8] sm:$0xff] }
 0x390   : > { %9124 = vmatprep.mubr.bf16.mxu0 %v10373_v32  ;;  %7726 = vmatpush1.bf16.msra.mxu1 %v13015_v33  ;;  %v10501_v32 = vcombine.high %v624_v23, %v640_v24  ;;  %v13063_v33 = vld [vmem:[%s13745_s6 + $0x6a0] ss:$8 sps:$4 sm:$0xff]  }
 0x391   : > { %9270 = vmatpush1.bf16.msra.mxu0 %v13018_v34  ;;  %7727 = vmatprep.subr.bf16.mxu1 %v13023_v35  ;;  %v13066_v34 = vld [vmem:[%s13745_s6 + $0xea0] ss:$8 sps:$4 sm:$0xff]   ;;  %v13071_v35 = vld [vmem:[%s13745_s6 + $0x6b4] ss:$8 sps:$4 sm:$0xff]  }
 0x392   : > { %9271 = vmatprep.subr.bf16.mxu0 %v13026_v36  ;;  %v13074_v36 = vld [vmem:[%s13745_s6 + $0xeb4] ss:$8 sps:$4 sm:$0xff]   ;;  %v712_v5 = vld [vmem:[%s13737_s5 + $0x928] sm:$0xff] }
 0x393   : > { %v728_v6 = vld [vmem:[%s13737_s5 + $0x9a8] sm:$0xff] }
 0x394   : > { %7728 = vmatpush1.bf16.msra.mxu1 %v13021_v41  ;;  %v13069_v41 = vld [vmem:[%s13745_s6 + $0x6b0] ss:$8 sps:$4 sm:$0xff]   ;;  %v720_v7 = vld [vmem:[%s13737_s5 + $0x968] sm:$0xff] }
 0x395   : > { %9272 = vmatpush1.bf16.msra.mxu0 %v13024_v42  ;;  %7729 = vmatprep.subr.bf16.mxu1 %v13029_v43  ;;  %v13072_v42 = vld [vmem:[%s13745_s6 + $0xeb0] ss:$8 sps:$4 sm:$0xff]   ;;  %v13077_v43 = vld [vmem:[%s13745_s6 + $0x6c4] ss:$8 sps:$4 sm:$0xff]  }
 0x396   : > { %9273 = vmatprep.subr.bf16.mxu0 %v13032_v44  ;;  %7581 = vmatmul.mubr.bf16.gmra.mrb[8].mxu1 %v10356_v45  ;;  %v13080_v44 = vld [vmem:[%s13745_s6 + $0xec4] ss:$8 sps:$4 sm:$0xff]   ;;  %v10484_v45 = vcombine.low %v616_v21, %v632_v22  ;;  %v10580_v21 = vcombine.low %v712_v5, %v728_v6 }
 0x397   : > { %9125 = vmatmul.mubr.bf16.gmra.mrb[8].mxu0 %v10372_v46  ;;  %7590 = vmatprep.mubr.bf16.mxu1 %v10389_v47  ;;  %v10500_v46 = vcombine.low %v624_v23, %v640_v24  ;;  %v10517_v47 = vcombine.high %v648_v37, %v664_v38  ;;  %v736_v8 = vld [vmem:[%s13737_s5 + $0x9e8] sm:$0xff] }
 0x398   : > { %9134 = vmatprep.mubr.bf16.mxu0 %v10405_v48  ;;  %7730 = vmatpush1.bf16.msra.mxu1 %v13027_v49  ;;  %v10533_v48 = vcombine.high %v656_v39, %v672_v40  ;;  %v13075_v49 = vld [vmem:[%s13745_s6 + $0x6c0] ss:$8 sps:$4 sm:$0xff]   ;;  %v10596_v22 = vcombine.low %v720_v7, %v736_v8 }
 0x399   : > { %9274 = vmatpush1.bf16.msra.mxu0 %v13030_v50  ;;  %7731 = vmatprep.subr.bf16.mxu1 %v13035_v51  ;;  %v13078_v50 = vld [vmem:[%s13745_s6 + $0xec0] ss:$8 sps:$4 sm:$0xff]   ;;  %v13083_v51 = vld [vmem:[%s13745_s6 + $0x6d4] ss:$8 sps:$4 sm:$0xff]  }
 0x39a   : > { %9275 = vmatprep.subr.bf16.mxu0 %v13038_v52  ;;  %v13086_v52 = vld [vmem:[%s13745_s6 + $0xed4] ss:$8 sps:$4 sm:$0xff]  }
 0x39c   : > { %7732 = vmatpush1.bf16.msra.mxu1 %v13033_v57  ;;  %v13081_v57 = vld [vmem:[%s13745_s6 + $0x6d0] ss:$8 sps:$4 sm:$0xff]  }
 0x39d   : > { %9276 = vmatpush1.bf16.msra.mxu0 %v13036_v58  ;;  %7733 = vmatprep.subr.bf16.mxu1 %v13041_v59  ;;  %v13084_v58 = vld [vmem:[%s13745_s6 + $0xed0] ss:$8 sps:$4 sm:$0xff]   ;;  %v13089_v59 = vld [vmem:[%s13745_s6 + $0x6e4] ss:$8 sps:$4 sm:$0xff]  }
 0x39e   : > { %9277 = vmatprep.subr.bf16.mxu0 %v13044_v60  ;;  %7591 = vmatmul.mubr.bf16.gmra.mrb[12].mxu1 %v10388_v61  ;;  %v13092_v60 = vld [vmem:[%s13745_s6 + $0xee4] ss:$8 sps:$4 sm:$0xff]   ;;  %v10516_v61 = vcombine.low %v648_v37, %v664_v38 }
 0x39f   : > { %9135 = vmatmul.mubr.bf16.gmra.mrb[12].mxu0 %v10404_v62  ;;  %7600 = vmatprep.mubr.bf16.mxu1 %v10421_v63  ;;  %v10532_v62 = vcombine.low %v656_v39, %v672_v40  ;;  %v10549_v63 = vcombine.high %v680_v53, %v696_v54 }
 0x3a0   : > { %9144 = vmatprep.mubr.bf16.mxu0 %v10437_v0  ;;  %7734 = vmatpush1.bf16.msra.mxu1 %v13039_v1  ;;  %v10565_v0 = vcombine.high %v688_v55, %v704_v56  ;;  %v13087_v1 = vld [vmem:[%s13745_s6 + $0x6e0] ss:$8 sps:$4 sm:$0xff]  }
 0x3a1   : > { %9278 = vmatpush1.bf16.msra.mxu0 %v13042_v2  ;;  %7735 = vmatprep.subr.bf16.mxu1 %v13047_v3  ;;  %v13090_v2 = vld [vmem:[%s13745_s6 + $0xee0] ss:$8 sps:$4 sm:$0xff]   ;;  %v13095_v3 = vld [vmem:[%s13745_s6 + $0x6f4] ss:$8 sps:$4 sm:$0xff]  }
 0x3a2   : > { %9279 = vmatprep.subr.bf16.mxu0 %v13050_v4  ;;  %v13098_v4 = vld [vmem:[%s13745_s6 + $0xef4] ss:$8 sps:$4 sm:$0xff]  }
 0x3a4   : > { %7736 = vmatpush1.bf16.msra.mxu1 %v13045_v9  ;;  %v13093_v9 = vld [vmem:[%s13745_s6 + $0x6f0] ss:$8 sps:$4 sm:$0xff]  }
 0x3a5   : > { %9280 = vmatpush1.bf16.msra.mxu0 %v13048_v10  ;;  %7737 = vmatprep.subr.bf16.mxu1 %v13053_v11  ;;  %v13096_v10 = vld [vmem:[%s13745_s6 + $0xef0] ss:$8 sps:$4 sm:$0xff]   ;;  %v13101_v11 = vld [vmem:[%s13745_s6 + $0x704] ss:$8 sps:$4 sm:$0xff]  }
 0x3a6   : > { %9281 = vmatprep.subr.bf16.mxu0 %v13056_v12  ;;  %7601 = vmatmul.mubr.bf16.gmra.mrb[16].mxu1 %v10420_v13  ;;  %v13104_v12 = vld [vmem:[%s13745_s6 + $0xf04] ss:$8 sps:$4 sm:$0xff]   ;;  %v10548_v13 = vcombine.low %v680_v53, %v696_v54 }
 0x3a7   : > { %9145 = vmatmul.mubr.bf16.gmra.mrb[16].mxu0 %v10436_v14  ;;  %7610 = vmatprep.mubr.bf16.mxu1 %v10453_v15  ;;  %v10564_v14 = vcombine.low %v688_v55, %v704_v56  ;;  %v10581_v15 = vcombine.high %v712_v5, %v728_v6 }
 0x3a8   : > { %9154 = vmatprep.mubr.bf16.mxu0 %v10469_v16  ;;  %7738 = vmatpush1.bf16.msra.mxu1 %v13051_v17  ;;  %v10597_v16 = vcombine.high %v720_v7, %v736_v8  ;;  %v744_v17 = vld [vmem:[%s13737_s5 + $0xa28] sm:$0xff] }
 0x3a9   : > { %9282 = vmatpush1.bf16.msra.mxu0 %v13054_v18  ;;  %7739 = vmatprep.subr.bf16.mxu1 %v13059_v19  ;;  %v760_v18 = vld [vmem:[%s13737_s5 + $0xaa8] sm:$0xff] }
 0x3aa   : > { %9283 = vmatprep.subr.bf16.mxu0 %v13062_v20  ;;  %v752_v19 = vld [vmem:[%s13737_s5 + $0xa68] sm:$0xff]  ;;  %v10613_v23 = vcombine.high %v744_v17, %v760_v18 }
 0x3ab   : > { %v768_v20 = vld [vmem:[%s13737_s5 + $0xae8] sm:$0xff] }
 0x3ac   : > { %7740 = vmatpush1.bf16.msra.mxu1 %v13057_v25  ;;  %v10629_v24 = vcombine.high %v752_v19, %v768_v20  ;;  %v776_v25 = vld [vmem:[%s13737_s5 + $0xb28] sm:$0xff] }
 0x3ad   : > { %9284 = vmatpush1.bf16.msra.mxu0 %v13060_v26  ;;  %7741 = vmatprep.subr.bf16.mxu1 %v13065_v27  ;;  %v792_v26 = vld [vmem:[%s13737_s5 + $0xba8] sm:$0xff] }
 0x3ae   : > { %9285 = vmatprep.subr.bf16.mxu0 %v13068_v28  ;;  %7611 = vmatmul.mubr.bf16.gmra.mrb[20].mxu1 %v10452_v29  ;;  %v784_v27 = vld [vmem:[%s13737_s5 + $0xb68] sm:$0xff]  ;;  %v10612_v29 = vcombine.low %v744_v17, %v760_v18  ;;  %v10644_v37 = vcombine.low %v776_v25, %v792_v26 }
 0x3af   : > { %9155 = vmatmul.mubr.bf16.gmra.mrb[20].mxu0 %v10468_v30  ;;  %7620 = vmatprep.mubr.bf16.mxu1 %v10485_v31  ;;  %v800_v28 = vld [vmem:[%s13737_s5 + $0xbe8] sm:$0xff]  ;;  %v10628_v30 = vcombine.low %v752_v19, %v768_v20  ;;  %v10645_v31 = vcombine.high %v776_v25, %v792_v26  ;;  %v13107_v19 = vld [vmem:[%s13745_s6 + $0x714] ss:$8 sps:$4 sm:$0xff]  }
 0x3b0   : > { %9164 = vmatprep.mubr.bf16.mxu0 %v10501_v32  ;;  %7742 = vmatpush1.bf16.msra.mxu1 %v13063_v33  ;;  %v10661_v32 = vcombine.high %v784_v27, %v800_v28  ;;  %v808_v33 = vld [vmem:[%s13737_s5 + $0xc28] sm:$0xff]  ;;  %v10660_v38 = vcombine.low %v784_v27, %v800_v28  ;;  %v13110_v20 = vld [vmem:[%s13745_s6 + $0xf14] ss:$8 sps:$4 sm:$0xff]  }
 0x3b1   : > { %9286 = vmatpush1.bf16.msra.mxu0 %v13066_v34  ;;  %7743 = vmatprep.subr.bf16.mxu1 %v13071_v35  ;;  %v824_v34 = vld [vmem:[%s13737_s5 + $0xca8] sm:$0xff]  ;;  %v497_v25 = vld [vmem:[%s13737_s5 + $0x270] sm:$0xff] }
 0x3b2   : > { %9287 = vmatprep.subr.bf16.mxu0 %v13074_v36  ;;  %v816_v35 = vld [vmem:[%s13737_s5 + $0xc68] sm:$0xff]  ;;  %v10677_v39 = vcombine.high %v808_v33, %v824_v34  ;;  %v513_v26 = vld [vmem:[%s13737_s5 + $0x2f0] sm:$0xff] }
 0x3b3   : > { %v832_v36 = vld [vmem:[%s13737_s5 + $0xce8] sm:$0xff] }
 0x3b4   : > { %7744 = vmatpush1.bf16.msra.mxu1 %v13069_v41  ;;  %v10693_v40 = vcombine.high %v816_v35, %v832_v36  ;;  %v840_v41 = vld [vmem:[%s13737_s5 + $0xd28] sm:$0xff] }
 0x3b5   : > { %9288 = vmatpush1.bf16.msra.mxu0 %v13072_v42  ;;  %7745 = vmatprep.subr.bf16.mxu1 %v13077_v43  ;;  %v856_v42 = vld [vmem:[%s13737_s5 + $0xda8] sm:$0xff] }
 0x3b6   : > { %9289 = vmatprep.subr.bf16.mxu0 %v13080_v44  ;;  %7621 = vmatmul.mubr.bf16.gmra.mrb[24].mxu1 %v10484_v45  ;;  %v848_v43 = vld [vmem:[%s13737_s5 + $0xd68] sm:$0xff]  ;;  %v10676_v45 = vcombine.low %v808_v33, %v824_v34  ;;  %v10708_v53 = vcombine.low %v840_v41, %v856_v42 }
 0x3b7   : > { %9165 = vmatmul.mubr.bf16.gmra.mrb[24].mxu0 %v10500_v46  ;;  %7630 = vmatprep.mubr.bf16.mxu1 %v10517_v47  ;;  %v864_v44 = vld [vmem:[%s13737_s5 + $0xde8] sm:$0xff]  ;;  %v10692_v46 = vcombine.low %v816_v35, %v832_v36  ;;  %v10709_v47 = vcombine.high %v840_v41, %v856_v42  ;;  %v13119_v35 = vld [vmem:[%s13745_s6 + $0x734] ss:$8 sps:$4 sm:$0xff]   ;;  %v13117_v41 = vld [vmem:[%s13745_s6 + $0x730] ss:$8 sps:$4 sm:$0xff]  }
 0x3b8   : > { %9174 = vmatprep.mubr.bf16.mxu0 %v10533_v48  ;;  %7746 = vmatpush1.bf16.msra.mxu1 %v13075_v49  ;;  %v10725_v48 = vcombine.high %v848_v43, %v864_v44  ;;  %v872_v49 = vld [vmem:[%s13737_s5 + $0xe28] sm:$0xff]  ;;  %v10724_v54 = vcombine.low %v848_v43, %v864_v44  ;;  %v13122_v36 = vld [vmem:[%s13745_s6 + $0xf34] ss:$8 sps:$4 sm:$0xff]   ;;  %v13120_v42 = vld [vmem:[%s13745_s6 + $0xf30] ss:$8 sps:$4 sm:$0xff]  }
 0x3b9   : > { %9290 = vmatpush1.bf16.msra.mxu0 %v13078_v50  ;;  %7747 = vmatprep.subr.bf16.mxu1 %v13083_v51  ;;  %v888_v50 = vld [vmem:[%s13737_s5 + $0xea8] sm:$0xff] }
 0x3ba   : > { %9291 = vmatprep.subr.bf16.mxu0 %v13086_v52  ;;  %v880_v51 = vld [vmem:[%s13737_s5 + $0xe68] sm:$0xff]  ;;  %v10741_v55 = vcombine.high %v872_v49, %v888_v50 }
 0x3bb   : > { %v896_v52 = vld [vmem:[%s13737_s5 + $0xee8] sm:$0xff] }
 0x3bc   : > { %7748 = vmatpush1.bf16.msra.mxu1 %v13081_v57  ;;  %v10757_v56 = vcombine.high %v880_v51, %v896_v52  ;;  %v904_v57 = vld [vmem:[%s13737_s5 + $0xf28] sm:$0xff] }
 0x3bd   : > { %9292 = vmatpush1.bf16.msra.mxu0 %v13084_v58  ;;  %7749 = vmatprep.subr.bf16.mxu1 %v13089_v59  ;;  %v920_v58 = vld [vmem:[%s13737_s5 + $0xfa8] sm:$0xff] }
 0x3be   : > { %9293 = vmatprep.subr.bf16.mxu0 %v13092_v60  ;;  %7631 = vmatmul.mubr.bf16.gmra.mrb[28].mxu1 %v10516_v61  ;;  %v912_v59 = vld [vmem:[%s13737_s5 + $0xf68] sm:$0xff]  ;;  %v10740_v61 = vcombine.low %v872_v49, %v888_v50  ;;  %v10772_v5 = vcombine.low %v904_v57, %v920_v58 }
 0x3bf   : > { %9175 = vmatmul.mubr.bf16.gmra.mrb[28].mxu0 %v10532_v62  ;;  %7640 = vmatprep.mubr.bf16.mxu1 %v10549_v63  ;;  %v928_v60 = vld [vmem:[%s13737_s5 + $0xfe8] sm:$0xff]  ;;  %v10756_v62 = vcombine.low %v880_v51, %v896_v52  ;;  %v10773_v63 = vcombine.high %v904_v57, %v920_v58  ;;  %v13131_v51 = vld [vmem:[%s13745_s6 + $0x754] ss:$8 sps:$4 sm:$0xff]   ;;  %v13129_v57 = vld [vmem:[%s13745_s6 + $0x750] ss:$8 sps:$4 sm:$0xff]  }
 0x3c0   : > { %9184 = vmatprep.mubr.bf16.mxu0 %v10565_v0  ;;  %7750 = vmatpush1.bf16.msra.mxu1 %v13087_v1  ;;  %v10789_v0 = vcombine.high %v912_v59, %v928_v60  ;;  %v425_v1 = vld [vmem:[%s13737_s5 + $0x30] sm:$0xff]  ;;  %v10788_v6 = vcombine.low %v912_v59, %v928_v60  ;;  %v13113_v27 = vld [vmem:[%s13745_s6 + $0x724] ss:$8 sps:$4 sm:$0xff]   ;;  %v13111_v33 = vld [vmem:[%s13745_s6 + $0x720] ss:$8 sps:$4 sm:$0xff]  }
 0x3c1   : > { %9294 = vmatpush1.bf16.msra.mxu0 %v13090_v2  ;;  %7751 = vmatprep.subr.bf16.mxu1 %v13095_v3  ;;  %v441_v2 = vld [vmem:[%s13737_s5 + $0xb0] sm:$0xff]  ;;  %v13116_v28 = vld [vmem:[%s13745_s6 + $0xf24] ss:$8 sps:$4 sm:$0xff]   ;;  %v13114_v34 = vld [vmem:[%s13745_s6 + $0xf20] ss:$8 sps:$4 sm:$0xff]  }
 0x3c2   : > { %9295 = vmatprep.subr.bf16.mxu0 %v13098_v4  ;;  %v433_v3 = vld [vmem:[%s13737_s5 + $0x70] sm:$0xff]  ;;  %v10295_v7 = vcombine.high %v425_v1, %v441_v2  ;;  %v13125_v43 = vld [vmem:[%s13745_s6 + $0x744] ss:$8 sps:$4 sm:$0xff]   ;;  %v13123_v49 = vld [vmem:[%s13745_s6 + $0x740] ss:$8 sps:$4 sm:$0xff]  }
 0x3c3   : > { %v449_v4 = vld [vmem:[%s13737_s5 + $0xf0] sm:$0xff]  ;;  %v13128_v44 = vld [vmem:[%s13745_s6 + $0xf44] ss:$8 sps:$4 sm:$0xff]   ;;  %v13126_v50 = vld [vmem:[%s13745_s6 + $0xf40] ss:$8 sps:$4 sm:$0xff]  }
 0x3c4   : > { %7752 = vmatpush1.bf16.msra.mxu1 %v13093_v9  ;;  %v10311_v8 = vcombine.high %v433_v3, %v449_v4  ;;  %v457_v9 = vld [vmem:[%s13737_s5 + $0x130] sm:$0xff]  ;;  %v13137_v59 = vld [vmem:[%s13745_s6 + $0x764] ss:$8 sps:$4 sm:$0xff]  }
 0x3c5   : > { %9296 = vmatpush1.bf16.msra.mxu0 %v13096_v10  ;;  %7914 = vmatprep.subr.bf16.mxu1 %v13101_v11  ;;  %v473_v10 = vld [vmem:[%s13737_s5 + $0x1b0] sm:$0xff]  ;;  %v13140_v60 = vld [vmem:[%s13745_s6 + $0xf64] ss:$8 sps:$4 sm:$0xff]  }
 0x3c6   : > { %9458 = vmatprep.subr.bf16.mxu0 %v13104_v12  ;;  %7641 = vmatmul.mubr.bf16.gmra.mrb[32].mxu1 %v10548_v13  ;;  %v465_v11 = vld [vmem:[%s13737_s5 + $0x170] sm:$0xff]  ;;  %v10294_v13 = vcombine.low %v425_v1, %v441_v2  ;;  %v10327_v17 = vcombine.high %v457_v9, %v473_v10  ;;  %v13135_v1 = vld [vmem:[%s13745_s6 + $0x760] ss:$8 sps:$4 sm:$0xff]  }
 0x3c7   : > { %9185 = vmatmul.mubr.bf16.gmra.mrb[32].mxu0 %v10564_v14  ;;  %7650 = vmatprep.mubr.bf16.mxu1 %v10581_v15  ;;  %v481_v12 = vld [vmem:[%s13737_s5 + $0x1f0] sm:$0xff]  ;;  %v10310_v14 = vcombine.low %v433_v3, %v449_v4  ;;  %v13099_v15 = vld [vmem:[%s13745_s6 + $0x700] ss:$8 sps:$4 sm:$0xff]  }
 0x3c8   : > { %9194 = vmatprep.mubr.bf16.mxu0 %v10597_v16  ;;  %v13102_v16 = vld [vmem:[%s13745_s6 + $0xf00] ss:$8 sps:$4 sm:$0xff]   ;;  %v10343_v18 = vcombine.high %v465_v11, %v481_v12  ;;  %v13134_v52 = vld [vmem:[%s13745_s6 + $0xf54] ss:$8 sps:$4 sm:$0xff]   ;;  %v13132_v58 = vld [vmem:[%s13745_s6 + $0xf50] ss:$8 sps:$4 sm:$0xff]  }
 0x3c9   : > { %v13138_v2 = vld [vmem:[%s13745_s6 + $0xf60] ss:$8 sps:$4 sm:$0xff]   ;;  %v13143_v3 = vld [vmem:[%s13745_s6 + $0x774] ss:$8 sps:$4 sm:$0xff]  }
 0x3ca   : > { %v13146_v4 = vld [vmem:[%s13745_s6 + $0xf74] ss:$8 sps:$4 sm:$0xff]  }
 0x3ce   : > { %7651 = vmatmul.mubr.bf16.gmra.mrb[36].mxu1 %v10580_v21  ;;  %v13105_v21 = vld [vmem:[%s13745_s6 + $0x710] ss:$8 sps:$4 sm:$0xff]  }
 0x3cf   : > { %9195 = vmatmul.mubr.bf16.gmra.mrb[36].mxu0 %v10596_v22  ;;  %7660 = vmatprep.mubr.bf16.mxu1 %v10613_v23  ;;  %v13108_v22 = vld [vmem:[%s13745_s6 + $0xf10] ss:$8 sps:$4 sm:$0xff]  }
 0x3d0   : > { %9204 = vmatprep.mubr.bf16.mxu0 %v10629_v24  ;;  %v489_v23 = vld [vmem:[%s13737_s5 + $0x230] sm:$0xff] }
 0x3d1   : > { %v505_v24 = vld [vmem:[%s13737_s5 + $0x2b0] sm:$0xff] }
 0x3d6   : > { %7661 = vmatmul.mubr.bf16.gmra.mrb[40].mxu1 %v10612_v29  ;;  %v10326_v29 = vcombine.low %v457_v9, %v473_v10  ;;  %v13141_v9 = vld [vmem:[%s13745_s6 + $0x770] ss:$8 sps:$4 sm:$0xff]  }
 0x3d7   : > { %9205 = vmatmul.mubr.bf16.gmra.mrb[40].mxu0 %v10628_v30  ;;  %7670 = vmatprep.mubr.bf16.mxu1 %v10645_v31  ;;  %v10342_v30 = vcombine.low %v465_v11, %v481_v12  ;;  %v10359_v31 = vcombine.high %v489_v23, %v505_v24  ;;  %v13144_v10 = vld [vmem:[%s13745_s6 + $0xf70] ss:$8 sps:$4 sm:$0xff]   ;;  %v13149_v11 = vld [vmem:[%s13745_s6 + $0x784] ss:$8 sps:$4 sm:$0xff]  }
 0x3d8   : > { %9214 = vmatprep.mubr.bf16.mxu0 %v10661_v32  ;;  %v10375_v32 = vcombine.high %v497_v25, %v513_v26  ;;  %v13152_v12 = vld [vmem:[%s13745_s6 + $0xf84] ss:$8 sps:$4 sm:$0xff]  }
 0x3de   : > { %7671 = vmatmul.mubr.bf16.gmra.mrb[44].mxu1 %v10644_v37  ;;  %v521_v37 = vld [vmem:[%s13737_s5 + $0x330] sm:$0xff] }
 0x3df   : > { %9215 = vmatmul.mubr.bf16.gmra.mrb[44].mxu0 %v10660_v38  ;;  %7680 = vmatprep.mubr.bf16.mxu1 %v10677_v39  ;;  %v537_v38 = vld [vmem:[%s13737_s5 + $0x3b0] sm:$0xff] }
 0x3e0   : > { %9224 = vmatprep.mubr.bf16.mxu0 %v10693_v40  ;;  %v529_v39 = vld [vmem:[%s13737_s5 + $0x370] sm:$0xff] }
 0x3e1   : > { %v545_v40 = vld [vmem:[%s13737_s5 + $0x3f0] sm:$0xff] }
 0x3e6   : > { %7681 = vmatmul.mubr.bf16.gmra.mrb[48].mxu1 %v10676_v45  ;;  %v10358_v45 = vcombine.low %v489_v23, %v505_v24  ;;  %v625_v23 = vld [vmem:[%s13737_s5 + $0x670] sm:$0xff] }
 0x3e7   : > { %9225 = vmatmul.mubr.bf16.gmra.mrb[48].mxu0 %v10692_v46  ;;  %7690 = vmatprep.mubr.bf16.mxu1 %v10709_v47  ;;  %v10374_v46 = vcombine.low %v497_v25, %v513_v26  ;;  %v10391_v47 = vcombine.high %v521_v37, %v537_v38  ;;  %v641_v24 = vld [vmem:[%s13737_s5 + $0x6f0] sm:$0xff] }
 0x3e8   : > { %9234 = vmatprep.mubr.bf16.mxu0 %v10725_v48  ;;  %v10407_v48 = vcombine.high %v529_v39, %v545_v40  ;;  %v13153_v25 = vld [vmem:[%s13745_s6 + $0x790] ss:$8 sps:$4 sm:$0xff]  }
 0x3e9   : > { %v13156_v26 = vld [vmem:[%s13745_s6 + $0xf90] ss:$8 sps:$4 sm:$0xff]  }
 0x3ee   : > { %7691 = vmatmul.mubr.bf16.gmra.mrb[52].mxu1 %v10708_v53  ;;  %v553_v53 = vld [vmem:[%s13737_s5 + $0x430] sm:$0xff] }
 0x3ef   : > { %9235 = vmatmul.mubr.bf16.gmra.mrb[52].mxu0 %v10724_v54  ;;  %7700 = vmatprep.mubr.bf16.mxu1 %v10741_v55  ;;  %v569_v54 = vld [vmem:[%s13737_s5 + $0x4b0] sm:$0xff] }
 0x3f0   : > { %9244 = vmatprep.mubr.bf16.mxu0 %v10757_v56  ;;  %v561_v55 = vld [vmem:[%s13737_s5 + $0x470] sm:$0xff] }
 0x3f1   : > { %v577_v56 = vld [vmem:[%s13737_s5 + $0x4f0] sm:$0xff] }
 0x3f6   : > { %7701 = vmatmul.mubr.bf16.gmra.mrb[56].mxu1 %v10740_v61  ;;  %v10390_v61 = vcombine.low %v521_v37, %v537_v38  ;;  %v649_v37 = vld [vmem:[%s13737_s5 + $0x730] sm:$0xff] }
 0x3f7   : > { %9245 = vmatmul.mubr.bf16.gmra.mrb[56].mxu0 %v10756_v62  ;;  %7710 = vmatprep.mubr.bf16.mxu1 %v10773_v63  ;;  %v10406_v62 = vcombine.low %v529_v39, %v545_v40  ;;  %v10423_v63 = vcombine.high %v553_v53, %v569_v54  ;;  %v665_v38 = vld [vmem:[%s13737_s5 + $0x7b0] sm:$0xff] }
 0x3f8   : > { %9254 = vmatprep.mubr.bf16.mxu0 %v10789_v0  ;;  %v10439_v0 = vcombine.high %v561_v55, %v577_v56  ;;  %v657_v39 = vld [vmem:[%s13737_s5 + $0x770] sm:$0xff] }
 0x3f9   : > { %v673_v40 = vld [vmem:[%s13737_s5 + $0x7f0] sm:$0xff] }
 0x3fe   : > { %7711 = vmatmul.mubr.bf16.gmra.mrb[60].mxu1 %v10772_v5  ;;  %v585_v5 = vld [vmem:[%s13737_s5 + $0x530] sm:$0xff] }
 0x3ff   : > { %9255 = vmatmul.mubr.bf16.gmra.mrb[60].mxu0 %v10788_v6  ;;  %7753 = vmatprep.mubr.bf16.mxu1 %v10295_v7  ;;  %v601_v6 = vld [vmem:[%s13737_s5 + $0x5b0] sm:$0xff] }
 0x400   : > { %9297 = vmatprep.mubr.bf16.mxu0 %v10311_v8  ;;  %v593_v7 = vld [vmem:[%s13737_s5 + $0x570] sm:$0xff] }
 0x401   : > { %v609_v8 = vld [vmem:[%s13737_s5 + $0x5f0] sm:$0xff] }
 0x406   : > { %7754 = vmatmul.mubr.bf16.vlgmr.msra.gmra.mrb[0].mxu1 %v10294_v13  ;;  %v10422_v13 = vcombine.low %v553_v53, %v569_v54  ;;  %v681_v53 = vld [vmem:[%s13737_s5 + $0x830] sm:$0xff] }
 0x407   : > { %9298 = vmatmul.mubr.bf16.vlgmr.msra.gmra.mrb[0].mxu0 %v10310_v14  ;;  %7915 = vmatpush1.bf16.msra.mxu1 %v13099_v15  ;;  %v10438_v14 = vcombine.low %v561_v55, %v577_v56  ;;  %v10455_v15 = vcombine.high %v585_v5, %v601_v6  ;;  %v697_v54 = vld [vmem:[%s13737_s5 + $0x8b0] sm:$0xff] }
 0x408   : > { %9459 = vmatpush1.bf16.msra.mxu0 %v13102_v16  ;;  %7763 = vmatprep.mubr.bf16.mxu1 %v10327_v17  ;;  %v10471_v16 = vcombine.high %v593_v7, %v609_v8  ;;  %v13147_v17 = vld [vmem:[%s13745_s6 + $0x780] ss:$8 sps:$4 sm:$0xff]   ;;  %v689_v55 = vld [vmem:[%s13737_s5 + $0x870] sm:$0xff] }
 0x409   : > { %9307 = vmatprep.mubr.bf16.mxu0 %v10343_v18  ;;  %7916 = vmatprep.subr.bf16.mxu1 %v13107_v19  ;;  %v13150_v18 = vld [vmem:[%s13745_s6 + $0xf80] ss:$8 sps:$4 sm:$0xff]   ;;  %v13155_v19 = vld [vmem:[%s13745_s6 + $0x794] ss:$8 sps:$4 sm:$0xff]  }
 0x40a   : > { %9460 = vmatprep.subr.bf16.mxu0 %v13110_v20  ;;  %v13158_v20 = vld [vmem:[%s13745_s6 + $0xf94] ss:$8 sps:$4 sm:$0xff]  }
 0x40b   : > { %7917 = vmatpush1.bf16.msra.mxu1 %v13105_v21  ;;  %v617_v21 = vld [vmem:[%s13737_s5 + $0x630] sm:$0xff] }
 0x40c   : > { %9461 = vmatpush1.bf16.msra.mxu0 %v13108_v22  ;;  %7918 = vmatprep.subr.bf16.mxu1 %v13113_v27  ;;  %v633_v22 = vld [vmem:[%s13737_s5 + $0x6b0] sm:$0xff]  ;;  %v13161_v27 = vld [vmem:[%s13745_s6 + $0x7a4] ss:$8 sps:$4 sm:$0xff]  }
 0x40d   : > { %9462 = vmatprep.subr.bf16.mxu0 %v13116_v28  ;;  %v13164_v28 = vld [vmem:[%s13745_s6 + $0xfa4] ss:$8 sps:$4 sm:$0xff]   ;;  %v705_v56 = vld [vmem:[%s13737_s5 + $0x8f0] sm:$0xff] }
 0x40e   : > { %7764 = vmatmul.mubr.bf16.gmra.mrb[4].mxu1 %v10326_v29  ;;  %v10454_v29 = vcombine.low %v585_v5, %v601_v6  ;;  %v713_v5 = vld [vmem:[%s13737_s5 + $0x930] sm:$0xff] }
 0x40f   : > { %9308 = vmatmul.mubr.bf16.gmra.mrb[4].mxu0 %v10342_v30  ;;  %7773 = vmatprep.mubr.bf16.mxu1 %v10359_v31  ;;  %v10470_v30 = vcombine.low %v593_v7, %v609_v8  ;;  %v10487_v31 = vcombine.high %v617_v21, %v633_v22  ;;  %v729_v6 = vld [vmem:[%s13737_s5 + $0x9b0] sm:$0xff] }
 0x410   : > { %9317 = vmatprep.mubr.bf16.mxu0 %v10375_v32  ;;  %7919 = vmatpush1.bf16.msra.mxu1 %v13111_v33  ;;  %v10503_v32 = vcombine.high %v625_v23, %v641_v24  ;;  %v13159_v33 = vld [vmem:[%s13745_s6 + $0x7a0] ss:$8 sps:$4 sm:$0xff]   ;;  %v721_v7 = vld [vmem:[%s13737_s5 + $0x970] sm:$0xff] }
 0x411   : > { %9463 = vmatpush1.bf16.msra.mxu0 %v13114_v34  ;;  %7920 = vmatprep.subr.bf16.mxu1 %v13119_v35  ;;  %v13162_v34 = vld [vmem:[%s13745_s6 + $0xfa0] ss:$8 sps:$4 sm:$0xff]   ;;  %v13167_v35 = vld [vmem:[%s13745_s6 + $0x7b4] ss:$8 sps:$4 sm:$0xff]  }
 0x412   : > { %9464 = vmatprep.subr.bf16.mxu0 %v13122_v36  ;;  %v13170_v36 = vld [vmem:[%s13745_s6 + $0xfb4] ss:$8 sps:$4 sm:$0xff]  }
 0x413   : > { %v737_v8 = vld [vmem:[%s13737_s5 + $0x9f0] sm:$0xff] }
 0x414   : > { %7921 = vmatpush1.bf16.msra.mxu1 %v13117_v41  ;;  %v13165_v41 = vld [vmem:[%s13745_s6 + $0x7b0] ss:$8 sps:$4 sm:$0xff]  }
 0x415   : > { %9465 = vmatpush1.bf16.msra.mxu0 %v13120_v42  ;;  %7922 = vmatprep.subr.bf16.mxu1 %v13125_v43  ;;  %v13168_v42 = vld [vmem:[%s13745_s6 + $0xfb0] ss:$8 sps:$4 sm:$0xff]   ;;  %v13173_v43 = vld [vmem:[%s13745_s6 + $0x7c4] ss:$8 sps:$4 sm:$0xff]  }
 0x416   : > { %9466 = vmatprep.subr.bf16.mxu0 %v13128_v44  ;;  %7774 = vmatmul.mubr.bf16.gmra.mrb[8].mxu1 %v10358_v45  ;;  %v13176_v44 = vld [vmem:[%s13745_s6 + $0xfc4] ss:$8 sps:$4 sm:$0xff]   ;;  %v10486_v45 = vcombine.low %v617_v21, %v633_v22 }
 0x417   : > { %9318 = vmatmul.mubr.bf16.gmra.mrb[8].mxu0 %v10374_v46  ;;  %7783 = vmatprep.mubr.bf16.mxu1 %v10391_v47  ;;  %v10502_v46 = vcombine.low %v625_v23, %v641_v24  ;;  %v10519_v47 = vcombine.high %v649_v37, %v665_v38  ;;  %v777_v23 = vld [vmem:[%s13737_s5 + $0xb30] sm:$0xff] }
 0x418   : > { %9327 = vmatprep.mubr.bf16.mxu0 %v10407_v48  ;;  %7923 = vmatpush1.bf16.msra.mxu1 %v13123_v49  ;;  %v10535_v48 = vcombine.high %v657_v39, %v673_v40  ;;  %v13171_v49 = vld [vmem:[%s13745_s6 + $0x7c0] ss:$8 sps:$4 sm:$0xff]   ;;  %v793_v24 = vld [vmem:[%s13737_s5 + $0xbb0] sm:$0xff] }
 0x419   : > { %9467 = vmatpush1.bf16.msra.mxu0 %v13126_v50  ;;  %7924 = vmatprep.subr.bf16.mxu1 %v13131_v51  ;;  %v13174_v50 = vld [vmem:[%s13745_s6 + $0xfc0] ss:$8 sps:$4 sm:$0xff]   ;;  %v13179_v51 = vld [vmem:[%s13745_s6 + $0x7d4] ss:$8 sps:$4 sm:$0xff]  }
 0x41a   : > { %9468 = vmatprep.subr.bf16.mxu0 %v13134_v52  ;;  %v13182_v52 = vld [vmem:[%s13745_s6 + $0xfd4] ss:$8 sps:$4 sm:$0xff]  }
 0x41c   : > { %7925 = vmatpush1.bf16.msra.mxu1 %v13129_v57  ;;  %v13177_v57 = vld [vmem:[%s13745_s6 + $0x7d0] ss:$8 sps:$4 sm:$0xff]  }
 0x41d   : > { %9469 = vmatpush1.bf16.msra.mxu0 %v13132_v58  ;;  %7926 = vmatprep.subr.bf16.mxu1 %v13137_v59  ;;  %v13180_v58 = vld [vmem:[%s13745_s6 + $0xfd0] ss:$8 sps:$4 sm:$0xff]   ;;  %v13185_v59 = vld [vmem:[%s13745_s6 + $0x7e4] ss:$8 sps:$4 sm:$0xff]  }
 0x41e   : > { %9470 = vmatprep.subr.bf16.mxu0 %v13140_v60  ;;  %7784 = vmatmul.mubr.bf16.gmra.mrb[12].mxu1 %v10390_v61  ;;  %v13188_v60 = vld [vmem:[%s13745_s6 + $0xfe4] ss:$8 sps:$4 sm:$0xff]   ;;  %v10518_v61 = vcombine.low %v649_v37, %v665_v38 }
 0x41f   : > { %9328 = vmatmul.mubr.bf16.gmra.mrb[12].mxu0 %v10406_v62  ;;  %7793 = vmatprep.mubr.bf16.mxu1 %v10423_v63  ;;  %v10534_v62 = vcombine.low %v657_v39, %v673_v40  ;;  %v10551_v63 = vcombine.high %v681_v53, %v697_v54  ;;  %v841_v39 = vld [vmem:[%s13737_s5 + $0xd30] sm:$0xff] }
 0x420   : > { %9337 = vmatprep.mubr.bf16.mxu0 %v10439_v0  ;;  %7927 = vmatpush1.bf16.msra.mxu1 %v13135_v1  ;;  %v10567_v0 = vcombine.high %v689_v55, %v705_v56  ;;  %v13183_v1 = vld [vmem:[%s13745_s6 + $0x7e0] ss:$8 sps:$4 sm:$0xff]   ;;  %v857_v40 = vld [vmem:[%s13737_s5 + $0xdb0] sm:$0xff] }
 0x421   : > { %9471 = vmatpush1.bf16.msra.mxu0 %v13138_v2  ;;  %7928 = vmatprep.subr.bf16.mxu1 %v13143_v3  ;;  %v13186_v2 = vld [vmem:[%s13745_s6 + $0xfe0] ss:$8 sps:$4 sm:$0xff]   ;;  %v13191_v3 = vld [vmem:[%s13745_s6 + $0x7f4] ss:$8 sps:$4 sm:$0xff]  }
 0x422   : > { %9472 = vmatprep.subr.bf16.mxu0 %v13146_v4  ;;  %v13194_v4 = vld [vmem:[%s13745_s6 + $0xff4] ss:$8 sps:$4 sm:$0xff]  }
 0x424   : > { %7929 = vmatpush1.bf16.msra.mxu1 %v13141_v9  ;;  %v13189_v9 = vld [vmem:[%s13745_s6 + $0x7f0] ss:$8 sps:$4 sm:$0xff]  }
 0x425   : > { %9473 = vmatpush1.bf16.msra.mxu0 %v13144_v10  ;;  %7930 = vmatprep.subr.bf16.mxu1 %v13149_v11  ;;  %v13192_v10 = vld [vmem:[%s13745_s6 + $0xff0] ss:$8 sps:$4 sm:$0xff]   ;;  %v10550_v11 = vcombine.low %v681_v53, %v697_v54 }
 0x426   : > { %9474 = vmatprep.subr.bf16.mxu0 %v13152_v12  ;;  %7794 = vmatmul.mubr.bf16.gmra.mrb[16].mxu1 %v10422_v13  ;;  %v10566_v12 = vcombine.low %v689_v55, %v705_v56  ;;  %v10583_v13 = vcombine.high %v713_v5, %v729_v6  ;;  %v905_v55 = vld [vmem:[%s13737_s5 + $0xf30] sm:$0xff] }
 0x427   : > { %9338 = vmatmul.mubr.bf16.gmra.mrb[16].mxu0 %v10438_v14  ;;  %7803 = vmatprep.mubr.bf16.mxu1 %v10455_v15  ;;  %v10599_v14 = vcombine.high %v721_v7, %v737_v8  ;;  %v745_v15 = vld [vmem:[%s13737_s5 + $0xa30] sm:$0xff] }
 0x428   : > { %9347 = vmatprep.mubr.bf16.mxu0 %v10471_v16  ;;  %7931 = vmatpush1.bf16.msra.mxu1 %v13147_v17  ;;  %v761_v16 = vld [vmem:[%s13737_s5 + $0xab0] sm:$0xff] }
 0x429   : > { %9475 = vmatpush1.bf16.msra.mxu0 %v13150_v18  ;;  %7932 = vmatprep.subr.bf16.mxu1 %v13155_v19  ;;  %v753_v17 = vld [vmem:[%s13737_s5 + $0xa70] sm:$0xff]  ;;  %v10582_v19 = vcombine.low %v713_v5, %v729_v6  ;;  %v10615_v21 = vcombine.high %v745_v15, %v761_v16 }
 0x42a   : > { %9476 = vmatprep.subr.bf16.mxu0 %v13158_v20  ;;  %v769_v18 = vld [vmem:[%s13737_s5 + $0xaf0] sm:$0xff]  ;;  %v10598_v20 = vcombine.low %v721_v7, %v737_v8  ;;  %v458_v7 = vld [vmem:[%s13737_s5 + $0x138] sm:$0xff] }
 0x42b   : > { %v10631_v22 = vcombine.high %v753_v17, %v769_v18  ;;  %v921_v56 = vld [vmem:[%s13737_s5 + $0xfb0] sm:$0xff]  ;;  %v474_v8 = vld [vmem:[%s13737_s5 + $0x1b8] sm:$0xff] }
 0x42c   : > { %7933 = vmatpush1.bf16.msra.mxu1 %v13153_v25  ;;  %v785_v25 = vld [vmem:[%s13737_s5 + $0xb70] sm:$0xff] }
 0x42d   : > { %9477 = vmatpush1.bf16.msra.mxu0 %v13156_v26  ;;  %7934 = vmatprep.subr.bf16.mxu1 %v13161_v27  ;;  %v801_v26 = vld [vmem:[%s13737_s5 + $0xbf0] sm:$0xff]  ;;  %v10614_v27 = vcombine.low %v745_v15, %v761_v16  ;;  %v490_v15 = vld [vmem:[%s13737_s5 + $0x238] sm:$0xff] }
 0x42e   : > { %9478 = vmatprep.subr.bf16.mxu0 %v13164_v28  ;;  %7804 = vmatmul.mubr.bf16.gmra.mrb[20].mxu1 %v10454_v29  ;;  %v10630_v28 = vcombine.low %v753_v17, %v769_v18  ;;  %v10647_v29 = vcombine.high %v777_v23, %v793_v24  ;;  %v506_v16 = vld [vmem:[%s13737_s5 + $0x2b8] sm:$0xff] }
 0x42f   : > { %9348 = vmatmul.mubr.bf16.gmra.mrb[20].mxu0 %v10470_v30  ;;  %7813 = vmatprep.mubr.bf16.mxu1 %v10487_v31  ;;  %v10663_v30 = vcombine.high %v785_v25, %v801_v26  ;;  %v809_v31 = vld [vmem:[%s13737_s5 + $0xc30] sm:$0xff]  ;;  %v498_v17 = vld [vmem:[%s13737_s5 + $0x278] sm:$0xff] }
 0x430   : > { %9357 = vmatprep.mubr.bf16.mxu0 %v10503_v32  ;;  %7935 = vmatpush1.bf16.msra.mxu1 %v13159_v33  ;;  %v825_v32 = vld [vmem:[%s13737_s5 + $0xcb0] sm:$0xff]  ;;  %v514_v18 = vld [vmem:[%s13737_s5 + $0x2f8] sm:$0xff] }
 0x431   : > { %9479 = vmatpush1.bf16.msra.mxu0 %v13162_v34  ;;  %7936 = vmatprep.subr.bf16.mxu1 %v13167_v35  ;;  %v817_v33 = vld [vmem:[%s13737_s5 + $0xc70] sm:$0xff]  ;;  %v10646_v35 = vcombine.low %v777_v23, %v793_v24  ;;  %v10679_v37 = vcombine.high %v809_v31, %v825_v32  ;;  %v522_v23 = vld [vmem:[%s13737_s5 + $0x338] sm:$0xff] }
 0x432   : > { %9480 = vmatprep.subr.bf16.mxu0 %v13170_v36  ;;  %v833_v34 = vld [vmem:[%s13737_s5 + $0xcf0] sm:$0xff]  ;;  %v10662_v36 = vcombine.low %v785_v25, %v801_v26  ;;  %v538_v24 = vld [vmem:[%s13737_s5 + $0x3b8] sm:$0xff] }
 0x433   : > { %v10695_v38 = vcombine.high %v817_v33, %v833_v34  ;;  %v530_v25 = vld [vmem:[%s13737_s5 + $0x378] sm:$0xff] }
 0x434   : > { %7937 = vmatpush1.bf16.msra.mxu1 %v13165_v41  ;;  %v849_v41 = vld [vmem:[%s13737_s5 + $0xd70] sm:$0xff]  ;;  %v546_v26 = vld [vmem:[%s13737_s5 + $0x3f8] sm:$0xff] }
 0x435   : > { %9481 = vmatpush1.bf16.msra.mxu0 %v13168_v42  ;;  %7938 = vmatprep.subr.bf16.mxu1 %v13173_v43  ;;  %v865_v42 = vld [vmem:[%s13737_s5 + $0xdf0] sm:$0xff]  ;;  %v10678_v43 = vcombine.low %v809_v31, %v825_v32  ;;  %v554_v31 = vld [vmem:[%s13737_s5 + $0x438] sm:$0xff] }
 0x436   : > { %9482 = vmatprep.subr.bf16.mxu0 %v13176_v44  ;;  %7814 = vmatmul.mubr.bf16.gmra.mrb[24].mxu1 %v10486_v45  ;;  %v10694_v44 = vcombine.low %v817_v33, %v833_v34  ;;  %v10711_v45 = vcombine.high %v841_v39, %v857_v40  ;;  %v570_v32 = vld [vmem:[%s13737_s5 + $0x4b8] sm:$0xff] }
 0x437   : > { %9358 = vmatmul.mubr.bf16.gmra.mrb[24].mxu0 %v10502_v46  ;;  %7823 = vmatprep.mubr.bf16.mxu1 %v10519_v47  ;;  %v10727_v46 = vcombine.high %v849_v41, %v865_v42  ;;  %v873_v47 = vld [vmem:[%s13737_s5 + $0xe30] sm:$0xff]  ;;  %v562_v33 = vld [vmem:[%s13737_s5 + $0x478] sm:$0xff] }
 0x438   : > { %9367 = vmatprep.mubr.bf16.mxu0 %v10535_v48  ;;  %7939 = vmatpush1.bf16.msra.mxu1 %v13171_v49  ;;  %v889_v48 = vld [vmem:[%s13737_s5 + $0xeb0] sm:$0xff]  ;;  %v578_v34 = vld [vmem:[%s13737_s5 + $0x4f8] sm:$0xff] }
 0x439   : > { %9483 = vmatpush1.bf16.msra.mxu0 %v13174_v50  ;;  %7940 = vmatprep.subr.bf16.mxu1 %v13179_v51  ;;  %v881_v49 = vld [vmem:[%s13737_s5 + $0xe70] sm:$0xff]  ;;  %v10710_v51 = vcombine.low %v841_v39, %v857_v40  ;;  %v10743_v53 = vcombine.high %v873_v47, %v889_v48  ;;  %v586_v39 = vld [vmem:[%s13737_s5 + $0x538] sm:$0xff] }
 0x43a   : > { %9484 = vmatprep.subr.bf16.mxu0 %v13182_v52  ;;  %v897_v50 = vld [vmem:[%s13737_s5 + $0xef0] sm:$0xff]  ;;  %v10726_v52 = vcombine.low %v849_v41, %v865_v42  ;;  %v602_v40 = vld [vmem:[%s13737_s5 + $0x5b8] sm:$0xff] }
 0x43b   : > { %v10759_v54 = vcombine.high %v881_v49, %v897_v50  ;;  %v594_v41 = vld [vmem:[%s13737_s5 + $0x578] sm:$0xff] }
 0x43c   : > { %7941 = vmatpush1.bf16.msra.mxu1 %v13177_v57  ;;  %v913_v57 = vld [vmem:[%s13737_s5 + $0xf70] sm:$0xff]  ;;  %v610_v42 = vld [vmem:[%s13737_s5 + $0x5f8] sm:$0xff] }
 0x43d   : > { %9485 = vmatpush1.bf16.msra.mxu0 %v13180_v58  ;;  %7942 = vmatprep.subr.bf16.mxu1 %v13185_v59  ;;  %v929_v58 = vld [vmem:[%s13737_s5 + $0xff0] sm:$0xff]  ;;  %v10742_v59 = vcombine.low %v873_v47, %v889_v48  ;;  %v618_v47 = vld [vmem:[%s13737_s5 + $0x638] sm:$0xff] }
 0x43e   : > { %9486 = vmatprep.subr.bf16.mxu0 %v13188_v60  ;;  %7824 = vmatmul.mubr.bf16.gmra.mrb[28].mxu1 %v10518_v61  ;;  %v10758_v60 = vcombine.low %v881_v49, %v897_v50  ;;  %v10775_v61 = vcombine.high %v905_v55, %v921_v56  ;;  %v634_v48 = vld [vmem:[%s13737_s5 + $0x6b8] sm:$0xff] }
 0x43f   : > { %9368 = vmatmul.mubr.bf16.gmra.mrb[28].mxu0 %v10534_v62  ;;  %7833 = vmatprep.mubr.bf16.mxu1 %v10551_v63  ;;  %v10791_v62 = vcombine.high %v913_v57, %v929_v58  ;;  %v426_v63 = vld [vmem:[%s13737_s5 + $0x38] sm:$0xff] }
 0x440   : > { %9377 = vmatprep.mubr.bf16.mxu0 %v10567_v0  ;;  %7943 = vmatpush1.bf16.msra.mxu1 %v13183_v1  ;;  %v442_v0 = vld [vmem:[%s13737_s5 + $0xb8] sm:$0xff] }
 0x441   : > { %9487 = vmatpush1.bf16.msra.mxu0 %v13186_v2  ;;  %7944 = vmatprep.subr.bf16.mxu1 %v13191_v3  ;;  %v434_v1 = vld [vmem:[%s13737_s5 + $0x78] sm:$0xff]  ;;  %v10774_v3 = vcombine.low %v905_v55, %v921_v56  ;;  %v10297_v5 = vcombine.high %v426_v63, %v442_v0 }
 0x442   : > { %9488 = vmatprep.subr.bf16.mxu0 %v13194_v4  ;;  %v450_v2 = vld [vmem:[%s13737_s5 + $0xf8] sm:$0xff]  ;;  %v10790_v4 = vcombine.low %v913_v57, %v929_v58 }
 0x443   : > { %v10313_v6 = vcombine.high %v434_v1, %v450_v2  ;;  %v626_v49 = vld [vmem:[%s13737_s5 + $0x678] sm:$0xff] }
 0x444   : > { %7945 = vmatpush1.bf16.msra.mxu1 %v13189_v9  ;;  %v466_v9 = vld [vmem:[%s13737_s5 + $0x178] sm:$0xff] }
 0x445   : > { %9489 = vmatpush1.bf16.msra.mxu0 %v13192_v10  ;;  %v482_v10 = vld [vmem:[%s13737_s5 + $0x1f8] sm:$0xff] }
 0x446   : > { %7834 = vmatmul.mubr.bf16.gmra.mrb[32].mxu1 %v10550_v11  ;;  %v10296_v11 = vcombine.low %v426_v63, %v442_v0  ;;  %v642_v50 = vld [vmem:[%s13737_s5 + $0x6f8] sm:$0xff] }
 0x447   : > { %9378 = vmatmul.mubr.bf16.gmra.mrb[32].mxu0 %v10566_v12  ;;  %7843 = vmatprep.mubr.bf16.mxu1 %v10583_v13  ;;  %v10312_v12 = vcombine.low %v434_v1, %v450_v2  ;;  %v10329_v13 = vcombine.high %v458_v7, %v474_v8  ;;  %v650_v55 = vld [vmem:[%s13737_s5 + $0x738] sm:$0xff] }
 0x448   : > { %9387 = vmatprep.mubr.bf16.mxu0 %v10599_v14  ;;  %v10345_v14 = vcombine.high %v466_v9, %v482_v10  ;;  %v666_v56 = vld [vmem:[%s13737_s5 + $0x7b8] sm:$0xff] }
 0x449   : > { %v658_v57 = vld [vmem:[%s13737_s5 + $0x778] sm:$0xff] }
 0x44a   : > { %v674_v58 = vld [vmem:[%s13737_s5 + $0x7f8] sm:$0xff] }
 0x44b   : > { %v682_v63 = vld [vmem:[%s13737_s5 + $0x838] sm:$0xff] }
 0x44c   : > { %v698_v0 = vld [vmem:[%s13737_s5 + $0x8b8] sm:$0xff] }
 0x44d   : > { %v690_v1 = vld [vmem:[%s13737_s5 + $0x878] sm:$0xff] }
 0x44e   : > { %7844 = vmatmul.mubr.bf16.gmra.mrb[36].mxu1 %v10582_v19  ;;  %v10328_v19 = vcombine.low %v458_v7, %v474_v8  ;;  %v706_v2 = vld [vmem:[%s13737_s5 + $0x8f8] sm:$0xff] }
 0x44f   : > { %9388 = vmatmul.mubr.bf16.gmra.mrb[36].mxu0 %v10598_v20  ;;  %7853 = vmatprep.mubr.bf16.mxu1 %v10615_v21  ;;  %v10344_v20 = vcombine.low %v466_v9, %v482_v10  ;;  %v10361_v21 = vcombine.high %v490_v15, %v506_v16  ;;  %v714_v7 = vld [vmem:[%s13737_s5 + $0x938] sm:$0xff] }
 0x450   : > { %9397 = vmatprep.mubr.bf16.mxu0 %v10631_v22  ;;  %v10377_v22 = vcombine.high %v498_v17, %v514_v18  ;;  %v730_v8 = vld [vmem:[%s13737_s5 + $0x9b8] sm:$0xff] }
 0x451   : > { %v722_v9 = vld [vmem:[%s13737_s5 + $0x978] sm:$0xff] }
 0x452   : > { %v738_v10 = vld [vmem:[%s13737_s5 + $0x9f8] sm:$0xff] }
 0x456   : > { %7854 = vmatmul.mubr.bf16.gmra.mrb[40].mxu1 %v10614_v27  ;;  %v10360_v27 = vcombine.low %v490_v15, %v506_v16  ;;  %v746_v15 = vld [vmem:[%s13737_s5 + $0xa38] sm:$0xff] }
 0x457   : > { %9398 = vmatmul.mubr.bf16.gmra.mrb[40].mxu0 %v10630_v28  ;;  %7863 = vmatprep.mubr.bf16.mxu1 %v10647_v29  ;;  %v10376_v28 = vcombine.low %v498_v17, %v514_v18  ;;  %v10393_v29 = vcombine.high %v522_v23, %v538_v24  ;;  %v762_v16 = vld [vmem:[%s13737_s5 + $0xab8] sm:$0xff] }
 0x458   : > { %9407 = vmatprep.mubr.bf16.mxu0 %v10663_v30  ;;  %v10409_v30 = vcombine.high %v530_v25, %v546_v26  ;;  %v754_v17 = vld [vmem:[%s13737_s5 + $0xa78] sm:$0xff] }
 0x459   : > { %v770_v18 = vld [vmem:[%s13737_s5 + $0xaf8] sm:$0xff] }
 0x45e   : > { %7864 = vmatmul.mubr.bf16.gmra.mrb[44].mxu1 %v10646_v35  ;;  %v10392_v35 = vcombine.low %v522_v23, %v538_v24  ;;  %v778_v23 = vld [vmem:[%s13737_s5 + $0xb38] sm:$0xff] }
 0x45f   : > { %9408 = vmatmul.mubr.bf16.gmra.mrb[44].mxu0 %v10662_v36  ;;  %7873 = vmatprep.mubr.bf16.mxu1 %v10679_v37  ;;  %v10408_v36 = vcombine.low %v530_v25, %v546_v26  ;;  %v10425_v37 = vcombine.high %v554_v31, %v570_v32  ;;  %v794_v24 = vld [vmem:[%s13737_s5 + $0xbb8] sm:$0xff] }
 0x460   : > { %9417 = vmatprep.mubr.bf16.mxu0 %v10695_v38  ;;  %v10441_v38 = vcombine.high %v562_v33, %v578_v34  ;;  %v786_v25 = vld [vmem:[%s13737_s5 + $0xb78] sm:$0xff] }
 0x461   : > { %v802_v26 = vld [vmem:[%s13737_s5 + $0xbf8] sm:$0xff] }
 0x466   : > { %7874 = vmatmul.mubr.bf16.gmra.mrb[48].mxu1 %v10678_v43  ;;  %v10424_v43 = vcombine.low %v554_v31, %v570_v32  ;;  %v810_v31 = vld [vmem:[%s13737_s5 + $0xc38] sm:$0xff] }
 0x467   : > { %9418 = vmatmul.mubr.bf16.gmra.mrb[48].mxu0 %v10694_v44  ;;  %7883 = vmatprep.mubr.bf16.mxu1 %v10711_v45  ;;  %v10440_v44 = vcombine.low %v562_v33, %v578_v34  ;;  %v10457_v45 = vcombine.high %v586_v39, %v602_v40  ;;  %v826_v32 = vld [vmem:[%s13737_s5 + $0xcb8] sm:$0xff] }
 0x468   : > { %9427 = vmatprep.mubr.bf16.mxu0 %v10727_v46  ;;  %v10473_v46 = vcombine.high %v594_v41, %v610_v42  ;;  %v818_v33 = vld [vmem:[%s13737_s5 + $0xc78] sm:$0xff] }
 0x469   : > { %v834_v34 = vld [vmem:[%s13737_s5 + $0xcf8] sm:$0xff] }
 0x46e   : > { %7884 = vmatmul.mubr.bf16.gmra.mrb[52].mxu1 %v10710_v51  ;;  %v10456_v51 = vcombine.low %v586_v39, %v602_v40  ;;  %v842_v39 = vld [vmem:[%s13737_s5 + $0xd38] sm:$0xff] }
 0x46f   : > { %9428 = vmatmul.mubr.bf16.gmra.mrb[52].mxu0 %v10726_v52  ;;  %7893 = vmatprep.mubr.bf16.mxu1 %v10743_v53  ;;  %v10472_v52 = vcombine.low %v594_v41, %v610_v42  ;;  %v10489_v53 = vcombine.high %v618_v47, %v634_v48  ;;  %v858_v40 = vld [vmem:[%s13737_s5 + $0xdb8] sm:$0xff] }
 0x470   : > { %9437 = vmatprep.mubr.bf16.mxu0 %v10759_v54  ;;  %v10505_v54 = vcombine.high %v626_v49, %v642_v50  ;;  %v850_v41 = vld [vmem:[%s13737_s5 + $0xd78] sm:$0xff] }
 0x471   : > { %v866_v42 = vld [vmem:[%s13737_s5 + $0xdf8] sm:$0xff] }
 0x476   : > { %7894 = vmatmul.mubr.bf16.gmra.mrb[56].mxu1 %v10742_v59  ;;  %v10488_v59 = vcombine.low %v618_v47, %v634_v48  ;;  %v874_v47 = vld [vmem:[%s13737_s5 + $0xe38] sm:$0xff] }
 0x477   : > { %9438 = vmatmul.mubr.bf16.gmra.mrb[56].mxu0 %v10758_v60  ;;  %7903 = vmatprep.mubr.bf16.mxu1 %v10775_v61  ;;  %v10504_v60 = vcombine.low %v626_v49, %v642_v50  ;;  %v10521_v61 = vcombine.high %v650_v55, %v666_v56  ;;  %v890_v48 = vld [vmem:[%s13737_s5 + $0xeb8] sm:$0xff] }
 0x478   : > { %9447 = vmatprep.mubr.bf16.mxu0 %v10791_v62  ;;  %v10537_v62 = vcombine.high %v658_v57, %v674_v58  ;;  %v882_v49 = vld [vmem:[%s13737_s5 + $0xe78] sm:$0xff] }
 0x479   : > { %v898_v50 = vld [vmem:[%s13737_s5 + $0xef8] sm:$0xff] }
 0x47e   : > { %7904 = vmatmul.mubr.bf16.gmra.mrb[60].mxu1 %v10774_v3  ;;  %v10520_v3 = vcombine.low %v650_v55, %v666_v56  ;;  %v906_v55 = vld [vmem:[%s13737_s5 + $0xf38] sm:$0xff] }
 0x47f   : > { %9448 = vmatmul.mubr.bf16.gmra.mrb[60].mxu0 %v10790_v4  ;;  %7946 = vmatprep.mubr.bf16.mxu1 %v10297_v5  ;;  %v10536_v4 = vcombine.low %v658_v57, %v674_v58  ;;  %v10553_v5 = vcombine.high %v682_v63, %v698_v0  ;;  %v922_v56 = vld [vmem:[%s13737_s5 + $0xfb8] sm:$0xff] }
 0x480   : > { %9490 = vmatprep.mubr.bf16.mxu0 %v10313_v6  ;;  %v10569_v6 = vcombine.high %v690_v1, %v706_v2  ;;  %v914_v57 = vld [vmem:[%s13737_s5 + $0xf78] sm:$0xff] }
 0x481   : > { %v930_v58 = vld [vmem:[%s13737_s5 + $0xff8] sm:$0xff] }
 0x486   : > { %7947 = vmatmul.mubr.bf16.vlgmr.msra.gmra.mrb[0].mxu1 %v10296_v11  ;;  %v10552_v11 = vcombine.low %v682_v63, %v698_v0  ;;  %v10776_v63 = vcombine.low %v906_v55, %v922_v56  ;;  %v10792_v0 = vcombine.low %v914_v57, %v930_v58 }
 0x487   : > { %9491 = vmatmul.mubr.bf16.vlgmr.msra.gmra.mrb[0].mxu0 %v10312_v12  ;;  %7956 = vmatprep.mubr.bf16.mxu1 %v10329_v13  ;;  %v10568_v12 = vcombine.low %v690_v1, %v706_v2  ;;  %v10585_v13 = vcombine.high %v714_v7, %v730_v8  ;;  %v355_v2 = vld [vmem:[#allocation2] sm:$0xff] }
 0x488   : > { %9500 = vmatprep.mubr.bf16.mxu0 %v10345_v14  ;;  %v10601_v14 = vcombine.high %v722_v9, %v738_v10 }
 0x48e   : > { %7957 = vmatmul.mubr.bf16.gmra.mrb[4].mxu1 %v10328_v19  ;;  %v10584_v19 = vcombine.low %v714_v7, %v730_v8 }
 0x48f   : > { %9501 = vmatmul.mubr.bf16.gmra.mrb[4].mxu0 %v10344_v20  ;;  %7966 = vmatprep.mubr.bf16.mxu1 %v10361_v21  ;;  %v10600_v20 = vcombine.low %v722_v9, %v738_v10  ;;  %v10617_v21 = vcombine.high %v746_v15, %v762_v16  ;;  %v357_v10 = vld [vmem:[#allocation2 + $0x10] sm:$0xff] }
 0x490   : > { %9510 = vmatprep.mubr.bf16.mxu0 %v10377_v22  ;;  %v10633_v22 = vcombine.high %v754_v17, %v770_v18 }
 0x496   : > { %7967 = vmatmul.mubr.bf16.gmra.mrb[8].mxu1 %v10360_v27  ;;  %v10616_v27 = vcombine.low %v746_v15, %v762_v16  ;;  %v358_v15 = vld [vmem:[#allocation2 + $0x18] sm:$0xff] }
 0x497   : > { %9511 = vmatmul.mubr.bf16.gmra.mrb[8].mxu0 %v10376_v28  ;;  %7976 = vmatprep.mubr.bf16.mxu1 %v10393_v29  ;;  %v10632_v28 = vcombine.low %v754_v17, %v770_v18  ;;  %v10649_v29 = vcombine.high %v778_v23, %v794_v24 }
 0x498   : > { %9520 = vmatprep.mubr.bf16.mxu0 %v10409_v30  ;;  %v10665_v30 = vcombine.high %v786_v25, %v802_v26 }
 0x49e   : > { %7977 = vmatmul.mubr.bf16.gmra.mrb[12].mxu1 %v10392_v35  ;;  %v10648_v35 = vcombine.low %v778_v23, %v794_v24 }
 0x49f   : > { %9521 = vmatmul.mubr.bf16.gmra.mrb[12].mxu0 %v10408_v36  ;;  %7986 = vmatprep.mubr.bf16.mxu1 %v10425_v37  ;;  %v10664_v36 = vcombine.low %v786_v25, %v802_v26  ;;  %v10681_v37 = vcombine.high %v810_v31, %v826_v32  ;;  %v360_v26 = vld [vmem:[#allocation2 + $0x28] sm:$0xff] }
 0x4a0   : > { %9530 = vmatprep.mubr.bf16.mxu0 %v10441_v38  ;;  %v10697_v38 = vcombine.high %v818_v33, %v834_v34 }
 0x4a6   : > { %7987 = vmatmul.mubr.bf16.gmra.mrb[16].mxu1 %v10424_v43  ;;  %v10680_v43 = vcombine.low %v810_v31, %v826_v32 }
 0x4a7   : > { %9531 = vmatmul.mubr.bf16.gmra.mrb[16].mxu0 %v10440_v44  ;;  %7996 = vmatprep.mubr.bf16.mxu1 %v10457_v45  ;;  %v10696_v44 = vcombine.low %v818_v33, %v834_v34  ;;  %v10713_v45 = vcombine.high %v842_v39, %v858_v40 }
 0x4a8   : > { %9540 = vmatprep.mubr.bf16.mxu0 %v10473_v46  ;;  %v10729_v46 = vcombine.high %v850_v41, %v866_v42 }
 0x4ae   : > { %7997 = vmatmul.mubr.bf16.gmra.mrb[20].mxu1 %v10456_v51  ;;  %v10712_v51 = vcombine.low %v842_v39, %v858_v40 }
 0x4af   : > { %9541 = vmatmul.mubr.bf16.gmra.mrb[20].mxu0 %v10472_v52  ;;  %8006 = vmatprep.mubr.bf16.mxu1 %v10489_v53  ;;  %v10728_v52 = vcombine.low %v850_v41, %v866_v42  ;;  %v10745_v53 = vcombine.high %v874_v47, %v890_v48  ;;  %v363_v42 = vld [vmem:[#allocation2 + $0x40] sm:$0xff] }
 0x4b0   : > { %9550 = vmatprep.mubr.bf16.mxu0 %v10505_v54  ;;  %v10761_v54 = vcombine.high %v882_v49, %v898_v50 }
 0x4b6   : > { %8007 = vmatmul.mubr.bf16.gmra.mrb[24].mxu1 %v10488_v59  ;;  %v10744_v59 = vcombine.low %v874_v47, %v890_v48 }
 0x4b7   : > { %9551 = vmatmul.mubr.bf16.gmra.mrb[24].mxu0 %v10504_v60  ;;  %8016 = vmatprep.mubr.bf16.mxu1 %v10521_v61  ;;  %v10760_v60 = vcombine.low %v882_v49, %v898_v50  ;;  %v10777_v61 = vcombine.high %v906_v55, %v922_v56  ;;  %v365_v50 = vld [vmem:[#allocation2 + $0x50] sm:$0xff]  ;;  %v366_v55 = vld [vmem:[#allocation2 + $0x58] sm:$0xff] }
 0x4b8   : > { %9560 = vmatprep.mubr.bf16.mxu0 %v10537_v62  ;;  %v10793_v62 = vcombine.high %v914_v57, %v930_v58 }
 0x4be   : > { %8017 = vmatmul.mubr.bf16.gmra.mrb[28].mxu1 %v10520_v3 }
 0x4bf   : > { %9561 = vmatmul.mubr.bf16.gmra.mrb[28].mxu0 %v10536_v4  ;;  %8026 = vmatprep.mubr.bf16.mxu1 %v10553_v5 }
 0x4c0   : > { %9570 = vmatprep.mubr.bf16.mxu0 %v10569_v6  ;;  %v356_v6 = vld [vmem:[#allocation2 + $0x8] sm:$0xff] }
 0x4c6   : > { %8027 = vmatmul.mubr.bf16.gmra.mrb[32].mxu1 %v10552_v11 }
 0x4c7   : > { %9571 = vmatmul.mubr.bf16.gmra.mrb[32].mxu0 %v10568_v12  ;;  %8036 = vmatprep.mubr.bf16.mxu1 %v10585_v13 }
 0x4c8   : > { %9580 = vmatprep.mubr.bf16.mxu0 %v10601_v14 }
 0x4ce   : > { %8037 = vmatmul.mubr.bf16.gmra.mrb[36].mxu1 %v10584_v19 }
 0x4cf   : > { %9581 = vmatmul.mubr.bf16.gmra.mrb[36].mxu0 %v10600_v20  ;;  %8046 = vmatprep.mubr.bf16.mxu1 %v10617_v21 }
 0x4d0   : > { %9590 = vmatprep.mubr.bf16.mxu0 %v10633_v22  ;;  %v359_v22 = vld [vmem:[#allocation2 + $0x20] sm:$0xff] }
 0x4d6   : > { %8047 = vmatmul.mubr.bf16.gmra.mrb[40].mxu1 %v10616_v27 }
 0x4d7   : > { %9591 = vmatmul.mubr.bf16.gmra.mrb[40].mxu0 %v10632_v28  ;;  %8056 = vmatprep.mubr.bf16.mxu1 %v10649_v29 }
 0x4d8   : > { %9600 = vmatprep.mubr.bf16.mxu0 %v10665_v30  ;;  %v361_v30 = vld [vmem:[#allocation2 + $0x30] sm:$0xff] }
 0x4de   : > { %8057 = vmatmul.mubr.bf16.gmra.mrb[44].mxu1 %v10648_v35  ;;  %v362_v35 = vld [vmem:[#allocation2 + $0x38] sm:$0xff] }
 0x4df   : > { %9601 = vmatmul.mubr.bf16.gmra.mrb[44].mxu0 %v10664_v36  ;;  %8066 = vmatprep.mubr.bf16.mxu1 %v10681_v37 }
 0x4e0   : > { %9610 = vmatprep.mubr.bf16.mxu0 %v10697_v38 }
 0x4e6   : > { %8067 = vmatmul.mubr.bf16.gmra.mrb[48].mxu1 %v10680_v43 }
 0x4e7   : > { %9611 = vmatmul.mubr.bf16.gmra.mrb[48].mxu0 %v10696_v44  ;;  %8076 = vmatprep.mubr.bf16.mxu1 %v10713_v45 }
 0x4e8   : > { %9620 = vmatprep.mubr.bf16.mxu0 %v10729_v46  ;;  %v364_v46 = vld [vmem:[#allocation2 + $0x48] sm:$0xff] }
 0x4ee   : > { %8077 = vmatmul.mubr.bf16.gmra.mrb[52].mxu1 %v10712_v51 }
 0x4ef   : > { %9621 = vmatmul.mubr.bf16.gmra.mrb[52].mxu0 %v10728_v52  ;;  %8086 = vmatprep.mubr.bf16.mxu1 %v10745_v53 }
 0x4f0   : > { %9630 = vmatprep.mubr.bf16.mxu0 %v10761_v54 }
 0x4f6   : > { %8087 = vmatmul.mubr.bf16.gmra.mrb[56].mxu1 %v10744_v59 }
 0x4f7   : > { %9631 = vmatmul.mubr.bf16.gmra.mrb[56].mxu0 %v10760_v60  ;;  %8096 = vmatprep.mubr.bf16.mxu1 %v10777_v61 }
 0x4f8   : > { %9640 = vmatprep.mubr.bf16.mxu0 %v10793_v62  ;;  %v367_v62 = vld [vmem:[#allocation2 + $0x60] sm:$0xff] }
 0x4fe   : > { %8097 = vmatmul.mubr.bf16.gmra.mrb[60].mxu1 %v10776_v63 }
 0x4ff   : > { %9641 = vmatmul.mubr.bf16.gmra.mrb[60].mxu0 %v10792_v0 }
 0x559   : > { %v7948_v1 = vpop.f32.mrb[0].mxu1 }
 0x55a   : > { %v9492_v3 = vpop.f32.mrb[0].mxu0  ;;  %v7950_v5 = vpop.f32.mrb[1].mxu1 }
 0x55b   : > { %v11318_v4 = vadd.f32 %v9492_v3, %v7948_v1  ;;  %v9494_v7 = vpop.f32.mrb[1].mxu0  ;;  %v7952_v9 = vpop.f32.mrb[2].mxu1 }
 0x55c   : > { %v11319_v8 = vadd.f32 %v9494_v7, %v7950_v5  ;;  %v9496_v11 = vpop.f32.mrb[2].mxu0  ;;  %v7954_v14 = vpop.f32.mrb[3].mxu1 }
 0x55d   : > { %v9651_v12 = vadd.f32 %v11318_v4, %v355_v2  ;;  %v11320_v13 = vadd.f32 %v9496_v11, %v7952_v9  ;;  %v9498_v16 = vpop.f32.mrb[3].mxu0  ;;  %v368_v2 = vld [vmem:[#allocation2 + $0x68] sm:$0xff]  ;;  %v370_v11 = vld [vmem:[#allocation2 + $0x78] sm:$0xff] }
 0x55e   : > { %v9652_v17 = vadd.f32 %v11319_v8, %v356_v6  ;;  %v11321_v18 = vadd.f32 %v9498_v16, %v7954_v14  ;;  %v369_v6 = vld [vmem:[#allocation2 + $0x70] sm:$0xff] }
 0x55f   : > { %9715 = vst [vmem:[#allocation2] sm:$0xff] %v9651_v12  ;;  %v9653_v19 = vadd.f32 %v11320_v13, %v357_v10 }
 0x560   : > { %9716 = vst [vmem:[#allocation2 + $0x8] sm:$0xff] %v9652_v17  ;;  %v9654_v20 = vadd.f32 %v11321_v18, %v358_v15  ;;  %v371_v18 = vld [vmem:[#allocation2 + $0x80] sm:$0xff] }
 0x561   : > { %9717 = vst [vmem:[#allocation2 + $0x10] sm:$0xff] %v9653_v19  ;;  %v7958_v21 = vpop.f32.mrb[4].mxu1 }
 0x562   : > { %9718 = vst [vmem:[#allocation2 + $0x18] sm:$0xff] %v9654_v20  ;;  %v9502_v23 = vpop.f32.mrb[4].mxu0  ;;  %v7960_v25 = vpop.f32.mrb[5].mxu1 }
 0x563   : > { %v11322_v24 = vadd.f32 %v9502_v23, %v7958_v21  ;;  %v9504_v27 = vpop.f32.mrb[5].mxu0  ;;  %v7962_v29 = vpop.f32.mrb[6].mxu1 }
 0x564   : > { %v11323_v28 = vadd.f32 %v9504_v27, %v7960_v25  ;;  %v9506_v31 = vpop.f32.mrb[6].mxu0  ;;  %v7964_v34 = vpop.f32.mrb[7].mxu1 }
 0x565   : > { %v9655_v32 = vadd.f32 %v11322_v24, %v359_v22  ;;  %v11324_v33 = vadd.f32 %v9506_v31, %v7962_v29  ;;  %v9508_v36 = vpop.f32.mrb[7].mxu0  ;;  %v372_v22 = vld [vmem:[#allocation2 + $0x88] sm:$0xff]  ;;  %v374_v31 = vld [vmem:[#allocation2 + $0x98] sm:$0xff] }
 0x566   : > { %v9656_v37 = vadd.f32 %v11323_v28, %v360_v26  ;;  %v11325_v38 = vadd.f32 %v9508_v36, %v7964_v34  ;;  %v373_v26 = vld [vmem:[#allocation2 + $0x90] sm:$0xff] }
 0x567   : > { %9719 = vst [vmem:[#allocation2 + $0x20] sm:$0xff] %v9655_v32  ;;  %v9657_v39 = vadd.f32 %v11324_v33, %v361_v30 }
 0x568   : > { %9720 = vst [vmem:[#allocation2 + $0x28] sm:$0xff] %v9656_v37  ;;  %v9658_v40 = vadd.f32 %v11325_v38, %v362_v35  ;;  %v375_v38 = vld [vmem:[#allocation2 + $0xa0] sm:$0xff] }
 0x569   : > { %9721 = vst [vmem:[#allocation2 + $0x30] sm:$0xff] %v9657_v39  ;;  %v7968_v41 = vpop.f32.mrb[8].mxu1 }
 0x56a   : > { %9722 = vst [vmem:[#allocation2 + $0x38] sm:$0xff] %v9658_v40  ;;  %v9512_v43 = vpop.f32.mrb[8].mxu0  ;;  %v7970_v45 = vpop.f32.mrb[9].mxu1 }
 0x56b   : > { %v11326_v44 = vadd.f32 %v9512_v43, %v7968_v41  ;;  %v9514_v47 = vpop.f32.mrb[9].mxu0  ;;  %v7972_v49 = vpop.f32.mrb[10].mxu1 }
 0x56c   : > { %v11327_v48 = vadd.f32 %v9514_v47, %v7970_v45  ;;  %v9516_v51 = vpop.f32.mrb[10].mxu0  ;;  %v7974_v54 = vpop.f32.mrb[11].mxu1 }
 0x56d   : > { %v9659_v52 = vadd.f32 %v11326_v44, %v363_v42  ;;  %v11328_v53 = vadd.f32 %v9516_v51, %v7972_v49  ;;  %v9518_v56 = vpop.f32.mrb[11].mxu0  ;;  %v376_v42 = vld [vmem:[#allocation2 + $0xa8] sm:$0xff]  ;;  %v378_v51 = vld [vmem:[#allocation2 + $0xb8] sm:$0xff] }
 0x56e   : > { %v9660_v57 = vadd.f32 %v11327_v48, %v364_v46  ;;  %v11329_v58 = vadd.f32 %v9518_v56, %v7974_v54  ;;  %v377_v46 = vld [vmem:[#allocation2 + $0xb0] sm:$0xff] }
 0x56f   : > { %9723 = vst [vmem:[#allocation2 + $0x40] sm:$0xff] %v9659_v52  ;;  %v9661_v59 = vadd.f32 %v11328_v53, %v365_v50 }
 0x570   : > { %9724 = vst [vmem:[#allocation2 + $0x48] sm:$0xff] %v9660_v57  ;;  %v9662_v60 = vadd.f32 %v11329_v58, %v366_v55  ;;  %v379_v58 = vld [vmem:[#allocation2 + $0xc0] sm:$0xff] }
 0x571   : > { %9725 = vst [vmem:[#allocation2 + $0x50] sm:$0xff] %v9661_v59  ;;  %v7978_v61 = vpop.f32.mrb[12].mxu1 }
 0x572   : > { %9726 = vst [vmem:[#allocation2 + $0x58] sm:$0xff] %v9662_v60  ;;  %v9522_v63 = vpop.f32.mrb[12].mxu0  ;;  %v7980_v1 = vpop.f32.mrb[13].mxu1 }
 0x573   : > { %v11330_v0 = vadd.f32 %v9522_v63, %v7978_v61  ;;  %v9524_v3 = vpop.f32.mrb[13].mxu0  ;;  %v7982_v5 = vpop.f32.mrb[14].mxu1 }
 0x574   : > { %v11331_v4 = vadd.f32 %v9524_v3, %v7980_v1  ;;  %v9526_v7 = vpop.f32.mrb[14].mxu0  ;;  %v7984_v10 = vpop.f32.mrb[15].mxu1 }
 0x575   : > { %v9663_v8 = vadd.f32 %v11330_v0, %v367_v62  ;;  %v11332_v9 = vadd.f32 %v9526_v7, %v7982_v5  ;;  %v9528_v12 = vpop.f32.mrb[15].mxu0  ;;  %v380_v62 = vld [vmem:[#allocation2 + $0xc8] sm:$0xff]  ;;  %v382_v7 = vld [vmem:[#allocation2 + $0xd8] sm:$0xff] }
 0x576   : > { %v9664_v13 = vadd.f32 %v11331_v4, %v368_v2  ;;  %v11333_v14 = vadd.f32 %v9528_v12, %v7984_v10  ;;  %v381_v2 = vld [vmem:[#allocation2 + $0xd0] sm:$0xff] }
 0x577   : > { %9727 = vst [vmem:[#allocation2 + $0x60] sm:$0xff] %v9663_v8  ;;  %v9665_v15 = vadd.f32 %v11332_v9, %v369_v6 }
 0x578   : > { %9728 = vst [vmem:[#allocation2 + $0x68] sm:$0xff] %v9664_v13  ;;  %v9666_v16 = vadd.f32 %v11333_v14, %v370_v11  ;;  %v383_v14 = vld [vmem:[#allocation2 + $0xe0] sm:$0xff] }
 0x579   : > { %9729 = vst [vmem:[#allocation2 + $0x70] sm:$0xff] %v9665_v15  ;;  %v7988_v17 = vpop.f32.mrb[16].mxu1 }
 0x57a   : > { %9730 = vst [vmem:[#allocation2 + $0x78] sm:$0xff] %v9666_v16  ;;  %v9532_v19 = vpop.f32.mrb[16].mxu0  ;;  %v7990_v21 = vpop.f32.mrb[17].mxu1 }
 0x57b   : > { %v11334_v20 = vadd.f32 %v9532_v19, %v7988_v17  ;;  %v9534_v23 = vpop.f32.mrb[17].mxu0  ;;  %v7992_v25 = vpop.f32.mrb[18].mxu1 }
 0x57c   : > { %v11335_v24 = vadd.f32 %v9534_v23, %v7990_v21  ;;  %v9536_v27 = vpop.f32.mrb[18].mxu0  ;;  %v7994_v30 = vpop.f32.mrb[19].mxu1 }
 0x57d   : > { %v9667_v28 = vadd.f32 %v11334_v20, %v371_v18  ;;  %v11336_v29 = vadd.f32 %v9536_v27, %v7992_v25  ;;  %v9538_v32 = vpop.f32.mrb[19].mxu0  ;;  %v384_v18 = vld [vmem:[#allocation2 + $0xe8] sm:$0xff]  ;;  %v386_v27 = vld [vmem:[#allocation2 + $0xf8] sm:$0xff] }
 0x57e   : > { %v9668_v33 = vadd.f32 %v11335_v24, %v372_v22  ;;  %v11337_v34 = vadd.f32 %v9538_v32, %v7994_v30  ;;  %v385_v22 = vld [vmem:[#allocation2 + $0xf0] sm:$0xff] }
 0x57f   : > { %9731 = vst [vmem:[#allocation2 + $0x80] sm:$0xff] %v9667_v28  ;;  %v9669_v35 = vadd.f32 %v11336_v29, %v373_v26 }
 0x580   : > { %9732 = vst [vmem:[#allocation2 + $0x88] sm:$0xff] %v9668_v33  ;;  %v9670_v36 = vadd.f32 %v11337_v34, %v374_v31  ;;  %v387_v34 = vld [vmem:[#allocation2 + $0x100] sm:$0xff] }
 0x581   : > { %9733 = vst [vmem:[#allocation2 + $0x90] sm:$0xff] %v9669_v35  ;;  %v7998_v37 = vpop.f32.mrb[20].mxu1 }
 0x582   : > { %9734 = vst [vmem:[#allocation2 + $0x98] sm:$0xff] %v9670_v36  ;;  %v9542_v39 = vpop.f32.mrb[20].mxu0  ;;  %v8000_v41 = vpop.f32.mrb[21].mxu1 }
 0x583   : > { %v11338_v40 = vadd.f32 %v9542_v39, %v7998_v37  ;;  %v9544_v43 = vpop.f32.mrb[21].mxu0  ;;  %v8002_v45 = vpop.f32.mrb[22].mxu1 }
 0x584   : > { %v11339_v44 = vadd.f32 %v9544_v43, %v8000_v41  ;;  %v9546_v47 = vpop.f32.mrb[22].mxu0  ;;  %v8004_v50 = vpop.f32.mrb[23].mxu1 }
 0x585   : > { %v9671_v48 = vadd.f32 %v11338_v40, %v375_v38  ;;  %v11340_v49 = vadd.f32 %v9546_v47, %v8002_v45  ;;  %v9548_v52 = vpop.f32.mrb[23].mxu0  ;;  %v388_v38 = vld [vmem:[#allocation2 + $0x108] sm:$0xff]  ;;  %v390_v47 = vld [vmem:[#allocation2 + $0x118] sm:$0xff] }
 0x586   : > { %v9672_v53 = vadd.f32 %v11339_v44, %v376_v42  ;;  %v11341_v54 = vadd.f32 %v9548_v52, %v8004_v50  ;;  %v389_v42 = vld [vmem:[#allocation2 + $0x110] sm:$0xff] }
 0x587   : > { %9735 = vst [vmem:[#allocation2 + $0xa0] sm:$0xff] %v9671_v48  ;;  %v9673_v55 = vadd.f32 %v11340_v49, %v377_v46 }
 0x588   : > { %9736 = vst [vmem:[#allocation2 + $0xa8] sm:$0xff] %v9672_v53  ;;  %v9674_v56 = vadd.f32 %v11341_v54, %v378_v51  ;;  %v391_v54 = vld [vmem:[#allocation2 + $0x120] sm:$0xff] }
 0x589   : > { %9737 = vst [vmem:[#allocation2 + $0xb0] sm:$0xff] %v9673_v55  ;;  %v8008_v57 = vpop.f32.mrb[24].mxu1 }
 0x58a   : > { %9738 = vst [vmem:[#allocation2 + $0xb8] sm:$0xff] %v9674_v56  ;;  %v9552_v59 = vpop.f32.mrb[24].mxu0  ;;  %v8010_v61 = vpop.f32.mrb[25].mxu1 }
 0x58b   : > { %v11342_v60 = vadd.f32 %v9552_v59, %v8008_v57  ;;  %v9554_v63 = vpop.f32.mrb[25].mxu0  ;;  %v8012_v1 = vpop.f32.mrb[26].mxu1 }
 0x58c   : > { %v11343_v0 = vadd.f32 %v9554_v63, %v8010_v61  ;;  %v9556_v3 = vpop.f32.mrb[26].mxu0  ;;  %v8014_v6 = vpop.f32.mrb[27].mxu1 }
 0x58d   : > { %v9675_v4 = vadd.f32 %v11342_v60, %v379_v58  ;;  %v11344_v5 = vadd.f32 %v9556_v3, %v8012_v1  ;;  %v9558_v8 = vpop.f32.mrb[27].mxu0  ;;  %v392_v58 = vld [vmem:[#allocation2 + $0x128] sm:$0xff]  ;;  %v394_v3 = vld [vmem:[#allocation2 + $0x138] sm:$0xff] }
 0x58e   : > { %v9676_v9 = vadd.f32 %v11343_v0, %v380_v62  ;;  %v11345_v10 = vadd.f32 %v9558_v8, %v8014_v6  ;;  %v393_v62 = vld [vmem:[#allocation2 + $0x130] sm:$0xff] }
 0x58f   : > { %9739 = vst [vmem:[#allocation2 + $0xc0] sm:$0xff] %v9675_v4  ;;  %v9677_v11 = vadd.f32 %v11344_v5, %v381_v2 }
 0x590   : > { %9740 = vst [vmem:[#allocation2 + $0xc8] sm:$0xff] %v9676_v9  ;;  %v9678_v12 = vadd.f32 %v11345_v10, %v382_v7  ;;  %v395_v10 = vld [vmem:[#allocation2 + $0x140] sm:$0xff] }
 0x591   : > { %9741 = vst [vmem:[#allocation2 + $0xd0] sm:$0xff] %v9677_v11  ;;  %v8018_v13 = vpop.f32.mrb[28].mxu1 }
 0x592   : > { %9742 = vst [vmem:[#allocation2 + $0xd8] sm:$0xff] %v9678_v12  ;;  %v9562_v15 = vpop.f32.mrb[28].mxu0  ;;  %v8020_v17 = vpop.f32.mrb[29].mxu1 }
 0x593   : > { %v11346_v16 = vadd.f32 %v9562_v15, %v8018_v13  ;;  %v9564_v19 = vpop.f32.mrb[29].mxu0  ;;  %v8022_v21 = vpop.f32.mrb[30].mxu1 }
 0x594   : > { %v11347_v20 = vadd.f32 %v9564_v19, %v8020_v17  ;;  %v9566_v23 = vpop.f32.mrb[30].mxu0  ;;  %v8024_v26 = vpop.f32.mrb[31].mxu1 }
 0x595   : > { %v9679_v24 = vadd.f32 %v11346_v16, %v383_v14  ;;  %v11348_v25 = vadd.f32 %v9566_v23, %v8022_v21  ;;  %v9568_v28 = vpop.f32.mrb[31].mxu0  ;;  %v396_v14 = vld [vmem:[#allocation2 + $0x148] sm:$0xff]  ;;  %v398_v23 = vld [vmem:[#allocation2 + $0x158] sm:$0xff] }
 0x596   : > { %v9680_v29 = vadd.f32 %v11347_v20, %v384_v18  ;;  %v11349_v30 = vadd.f32 %v9568_v28, %v8024_v26  ;;  %v397_v18 = vld [vmem:[#allocation2 + $0x150] sm:$0xff] }
 0x597   : > { %9743 = vst [vmem:[#allocation2 + $0xe0] sm:$0xff] %v9679_v24  ;;  %v9681_v31 = vadd.f32 %v11348_v25, %v385_v22 }
 0x598   : > { %9744 = vst [vmem:[#allocation2 + $0xe8] sm:$0xff] %v9680_v29  ;;  %v9682_v32 = vadd.f32 %v11349_v30, %v386_v27  ;;  %v399_v30 = vld [vmem:[#allocation2 + $0x160] sm:$0xff] }
 0x599   : > { %9745 = vst [vmem:[#allocation2 + $0xf0] sm:$0xff] %v9681_v31  ;;  %v8028_v33 = vpop.f32.mrb[32].mxu1 }
 0x59a   : > { %9746 = vst [vmem:[#allocation2 + $0xf8] sm:$0xff] %v9682_v32  ;;  %v9572_v35 = vpop.f32.mrb[32].mxu0  ;;  %v8030_v37 = vpop.f32.mrb[33].mxu1 }
 0x59b   : > { %v11350_v36 = vadd.f32 %v9572_v35, %v8028_v33  ;;  %v9574_v39 = vpop.f32.mrb[33].mxu0  ;;  %v8032_v41 = vpop.f32.mrb[34].mxu1 }
 0x59c   : > { %v11351_v40 = vadd.f32 %v9574_v39, %v8030_v37  ;;  %v9576_v43 = vpop.f32.mrb[34].mxu0  ;;  %v8034_v46 = vpop.f32.mrb[35].mxu1 }
 0x59d   : > { %v9683_v44 = vadd.f32 %v11350_v36, %v387_v34  ;;  %v11352_v45 = vadd.f32 %v9576_v43, %v8032_v41  ;;  %v9578_v48 = vpop.f32.mrb[35].mxu0  ;;  %v400_v34 = vld [vmem:[#allocation2 + $0x168] sm:$0xff]  ;;  %v402_v43 = vld [vmem:[#allocation2 + $0x178] sm:$0xff] }
 0x59e   : > { %v9684_v49 = vadd.f32 %v11351_v40, %v388_v38  ;;  %v11353_v50 = vadd.f32 %v9578_v48, %v8034_v46  ;;  %v401_v38 = vld [vmem:[#allocation2 + $0x170] sm:$0xff] }
 0x59f   : > { %9747 = vst [vmem:[#allocation2 + $0x100] sm:$0xff] %v9683_v44  ;;  %v9685_v51 = vadd.f32 %v11352_v45, %v389_v42 }
 0x5a0   : > { %9748 = vst [vmem:[#allocation2 + $0x108] sm:$0xff] %v9684_v49  ;;  %v9686_v52 = vadd.f32 %v11353_v50, %v390_v47  ;;  %v403_v50 = vld [vmem:[#allocation2 + $0x180] sm:$0xff] }
 0x5a1   : > { %9749 = vst [vmem:[#allocation2 + $0x110] sm:$0xff] %v9685_v51  ;;  %v8038_v53 = vpop.f32.mrb[36].mxu1 }
 0x5a2   : > { %9750 = vst [vmem:[#allocation2 + $0x118] sm:$0xff] %v9686_v52  ;;  %v9582_v55 = vpop.f32.mrb[36].mxu0  ;;  %v8040_v57 = vpop.f32.mrb[37].mxu1 }
 0x5a3   : > { %v11354_v56 = vadd.f32 %v9582_v55, %v8038_v53  ;;  %v9584_v59 = vpop.f32.mrb[37].mxu0  ;;  %v8042_v61 = vpop.f32.mrb[38].mxu1 }
 0x5a4   : > { %v11355_v60 = vadd.f32 %v9584_v59, %v8040_v57  ;;  %v9586_v63 = vpop.f32.mrb[38].mxu0  ;;  %v8044_v2 = vpop.f32.mrb[39].mxu1 }
 0x5a5   : > { %v9687_v0 = vadd.f32 %v11354_v56, %v391_v54  ;;  %v11356_v1 = vadd.f32 %v9586_v63, %v8042_v61  ;;  %v9588_v4 = vpop.f32.mrb[39].mxu0  ;;  %v404_v54 = vld [vmem:[#allocation2 + $0x188] sm:$0xff]  ;;  %v406_v63 = vld [vmem:[#allocation2 + $0x198] sm:$0xff] }
 0x5a6   : > { %v9688_v5 = vadd.f32 %v11355_v60, %v392_v58  ;;  %v11357_v6 = vadd.f32 %v9588_v4, %v8044_v2  ;;  %v405_v58 = vld [vmem:[#allocation2 + $0x190] sm:$0xff] }
 0x5a7   : > { %9751 = vst [vmem:[#allocation2 + $0x120] sm:$0xff] %v9687_v0  ;;  %v9689_v7 = vadd.f32 %v11356_v1, %v393_v62 }
 0x5a8   : > { %9752 = vst [vmem:[#allocation2 + $0x128] sm:$0xff] %v9688_v5  ;;  %v9690_v8 = vadd.f32 %v11357_v6, %v394_v3  ;;  %v407_v6 = vld [vmem:[#allocation2 + $0x1a0] sm:$0xff] }
 0x5a9   : > { %9753 = vst [vmem:[#allocation2 + $0x130] sm:$0xff] %v9689_v7  ;;  %v8048_v9 = vpop.f32.mrb[40].mxu1 }
 0x5aa   : > { %9754 = vst [vmem:[#allocation2 + $0x138] sm:$0xff] %v9690_v8  ;;  %v9592_v11 = vpop.f32.mrb[40].mxu0  ;;  %v8050_v13 = vpop.f32.mrb[41].mxu1 }
 0x5ab   : > { %v11358_v12 = vadd.f32 %v9592_v11, %v8048_v9  ;;  %v9594_v15 = vpop.f32.mrb[41].mxu0  ;;  %v8052_v17 = vpop.f32.mrb[42].mxu1 }
 0x5ac   : > { %v11359_v16 = vadd.f32 %v9594_v15, %v8050_v13  ;;  %v9596_v19 = vpop.f32.mrb[42].mxu0  ;;  %v8054_v22 = vpop.f32.mrb[43].mxu1 }
 0x5ad   : > { %v9691_v20 = vadd.f32 %v11358_v12, %v395_v10  ;;  %v11360_v21 = vadd.f32 %v9596_v19, %v8052_v17  ;;  %v9598_v24 = vpop.f32.mrb[43].mxu0  ;;  %v408_v10 = vld [vmem:[#allocation2 + $0x1a8] sm:$0xff]  ;;  %v410_v19 = vld [vmem:[#allocation2 + $0x1b8] sm:$0xff] }
 0x5ae   : > { %v9692_v25 = vadd.f32 %v11359_v16, %v396_v14  ;;  %v11361_v26 = vadd.f32 %v9598_v24, %v8054_v22  ;;  %v409_v14 = vld [vmem:[#allocation2 + $0x1b0] sm:$0xff] }
 0x5af   : > { %9755 = vst [vmem:[#allocation2 + $0x140] sm:$0xff] %v9691_v20  ;;  %v9693_v27 = vadd.f32 %v11360_v21, %v397_v18 }
 0x5b0   : > { %9756 = vst [vmem:[#allocation2 + $0x148] sm:$0xff] %v9692_v25  ;;  %v9694_v28 = vadd.f32 %v11361_v26, %v398_v23  ;;  %v411_v26 = vld [vmem:[#allocation2 + $0x1c0] sm:$0xff] }
 0x5b1   : > { %9757 = vst [vmem:[#allocation2 + $0x150] sm:$0xff] %v9693_v27  ;;  %v8058_v29 = vpop.f32.mrb[44].mxu1 }
 0x5b2   : > { %9758 = vst [vmem:[#allocation2 + $0x158] sm:$0xff] %v9694_v28  ;;  %v9602_v31 = vpop.f32.mrb[44].mxu0  ;;  %v8060_v33 = vpop.f32.mrb[45].mxu1 }
 0x5b3   : > { %v11362_v32 = vadd.f32 %v9602_v31, %v8058_v29  ;;  %v9604_v35 = vpop.f32.mrb[45].mxu0  ;;  %v8062_v37 = vpop.f32.mrb[46].mxu1 }
 0x5b4   : > { %v11363_v36 = vadd.f32 %v9604_v35, %v8060_v33  ;;  %v9606_v39 = vpop.f32.mrb[46].mxu0  ;;  %v8064_v42 = vpop.f32.mrb[47].mxu1 }
 0x5b5   : > { %v9695_v40 = vadd.f32 %v11362_v32, %v399_v30  ;;  %v11364_v41 = vadd.f32 %v9606_v39, %v8062_v37  ;;  %v9608_v44 = vpop.f32.mrb[47].mxu0  ;;  %v412_v30 = vld [vmem:[#allocation2 + $0x1c8] sm:$0xff]  ;;  %v414_v39 = vld [vmem:[#allocation2 + $0x1d8] sm:$0xff] }
 0x5b6   : > { %v9696_v45 = vadd.f32 %v11363_v36, %v400_v34  ;;  %v11365_v46 = vadd.f32 %v9608_v44, %v8064_v42  ;;  %v413_v34 = vld [vmem:[#allocation2 + $0x1d0] sm:$0xff] }
 0x5b7   : > { %9759 = vst [vmem:[#allocation2 + $0x160] sm:$0xff] %v9695_v40  ;;  %v9697_v47 = vadd.f32 %v11364_v41, %v401_v38 }
 0x5b8   : > { %9760 = vst [vmem:[#allocation2 + $0x168] sm:$0xff] %v9696_v45  ;;  %v9698_v48 = vadd.f32 %v11365_v46, %v402_v43  ;;  %v415_v46 = vld [vmem:[#allocation2 + $0x1e0] sm:$0xff] }
 0x5b9   : > { %9761 = vst [vmem:[#allocation2 + $0x170] sm:$0xff] %v9697_v47  ;;  %v8068_v49 = vpop.f32.mrb[48].mxu1 }
 0x5ba   : > { %9762 = vst [vmem:[#allocation2 + $0x178] sm:$0xff] %v9698_v48  ;;  %v9612_v51 = vpop.f32.mrb[48].mxu0  ;;  %v8070_v53 = vpop.f32.mrb[49].mxu1 }
 0x5bb   : > { %v11366_v52 = vadd.f32 %v9612_v51, %v8068_v49  ;;  %v9614_v55 = vpop.f32.mrb[49].mxu0  ;;  %v8072_v57 = vpop.f32.mrb[50].mxu1 }
 0x5bc   : > { %v11367_v56 = vadd.f32 %v9614_v55, %v8070_v53  ;;  %v9616_v59 = vpop.f32.mrb[50].mxu0  ;;  %v8074_v62 = vpop.f32.mrb[51].mxu1 }
 0x5bd   : > { %v9699_v60 = vadd.f32 %v11366_v52, %v403_v50  ;;  %v11368_v61 = vadd.f32 %v9616_v59, %v8072_v57  ;;  %v9618_v0 = vpop.f32.mrb[51].mxu0  ;;  %v416_v50 = vld [vmem:[#allocation2 + $0x1e8] sm:$0xff]  ;;  %v418_v59 = vld [vmem:[#allocation2 + $0x1f8] sm:$0xff] }
 0x5be   : > { %v9700_v1 = vadd.f32 %v11367_v56, %v404_v54  ;;  %v11369_v2 = vadd.f32 %v9618_v0, %v8074_v62  ;;  %v417_v54 = vld [vmem:[#allocation2 + $0x1f0] sm:$0xff] }
 0x5bf   : > { %9763 = vst [vmem:[#allocation2 + $0x180] sm:$0xff] %v9699_v60  ;;  %v9701_v3 = vadd.f32 %v11368_v61, %v405_v58 }
 0x5c0   : > { %9764 = vst [vmem:[#allocation2 + $0x188] sm:$0xff] %v9700_v1  ;;  %v9702_v4 = vadd.f32 %v11369_v2, %v406_v63  ;;  %v9849_v1 = vlaneseq (!%p11306_p12) }
 0x5c1   : > { %9765 = vst [vmem:[#allocation2 + $0x190] sm:$0xff] %v9701_v3  ;;  %v8078_v5 = vpop.f32.mrb[52].mxu1  ;;  %v9847_v3 = vld [vmem:[#allocation8] sm:$0x3] (!%p11306_p12) }
 0x5c2   : > { %9766 = vst [vmem:[#allocation2 + $0x198] sm:$0xff] %v9702_v4  ;;  %v9622_v7 = vpop.f32.mrb[52].mxu0  ;;  %v8080_v9 = vpop.f32.mrb[53].mxu1  ;;  %v9850_v2 = vshrl.u32 (!%p11306_p12), %v9849_v1, 7  ;;  %v9783_v4 = vld [vmem:[#allocation2] sm:$0xff] (!%p11306_p12) }
 0x5c3   : > { %v11370_v8 = vadd.f32 %v9622_v7, %v8078_v5  ;;  %v9624_v11 = vpop.f32.mrb[53].mxu0  ;;  %v8082_v13 = vpop.f32.mrb[54].mxu1 }
 0x5c4   : > { %v11371_v12 = vadd.f32 %v9624_v11, %v8080_v9  ;;  %v9626_v15 = vpop.f32.mrb[54].mxu0  ;;  %v8084_v18 = vpop.f32.mrb[55].mxu1  ;;  %v9851_v5 = vsub.s32 (!%p11306_p12), 0, %v9850_v2  ;;  %v9855_v7 = vsub.s32 (!%p11306_p12), 1, %v9850_v2  ;;  %v9786_v9 = vld [vmem:[#allocation2 + $0x18] sm:$0xff] (!%p11306_p12) }
 0x5c5   : > { %v9703_v16 = vadd.f32 %v11370_v8, %v407_v6  ;;  %v11372_v17 = vadd.f32 %v9626_v15, %v8082_v13  ;;  %v9628_v20 = vpop.f32.mrb[55].mxu0  ;;  %v9784_v6 = vld [vmem:[#allocation2 + $0x8] sm:$0xff] (!%p11306_p12)  ;;  %v9785_v8 = vld [vmem:[#allocation2 + $0x10] sm:$0xff] (!%p11306_p12)  ;;  %v9790_v15 = vld [vmem:[#allocation2 + $0x38] sm:$0xff] (!%p11306_p12) }
 0x5c6   : > { %v9704_v21 = vadd.f32 %v11371_v12, %v408_v10  ;;  %v11373_v22 = vadd.f32 %v9628_v20, %v8084_v18  ;;  %v9787_v10 = vld [vmem:[#allocation2 + $0x20] sm:$0xff] (!%p11306_p12)  ;;  %v14862_v11 = vrot.slane (!%p11306_p12), %v9847_v3, %v9851_v5  ;;  %v14864_v12 = vrot.slane (!%p11306_p12), %v9847_v3, %v9855_v7  ;;  %v9788_v13 = vld [vmem:[#allocation2 + $0x28] sm:$0xff] (!%p11306_p12)  ;;  %v9802_v7 = vld [vmem:[#allocation2 + $0x98] sm:$0xff] (!%p11306_p12) }
 0x5c7   : > { %9767 = vst [vmem:[#allocation2 + $0x1a0] sm:$0xff] %v9703_v16  ;;  %v9705_v23 = vadd.f32 %v11372_v17, %v409_v14  ;;  %v9789_v14 = vld [vmem:[#allocation2 + $0x30] sm:$0xff] (!%p11306_p12)  ;;  %v9791_v16 = vld [vmem:[#allocation2 + $0x40] sm:$0xff] (!%p11306_p12) }
 0x5c8   : > { %9768 = vst [vmem:[#allocation2 + $0x1a8] sm:$0xff] %v9704_v21  ;;  %v9706_v24 = vadd.f32 %v11373_v22, %v410_v19  ;;  %v9859_v17 = vadd.f32 (!%p11306_p12), %v14862_v11, %v9783_v4  ;;  %v9860_v18 = vadd.f32 (!%p11306_p12), %v14864_v12, %v9784_v6  ;;  %v9861_v19 = vadd.f32 (!%p11306_p12), %v14862_v11, %v9785_v8  ;;  %v9792_v21 = vld [vmem:[#allocation2 + $0x48] sm:$0xff] (!%p11306_p12)  ;;  %v9803_v8 = vld [vmem:[#allocation2 + $0xa0] sm:$0xff] (!%p11306_p12) }
 0x5c9   : > { %9769 = vst [vmem:[#allocation2 + $0x1b0] sm:$0xff] %v9705_v23  ;;  %v8088_v25 = vpop.f32.mrb[56].mxu1  ;;  %v9862_v20 = vadd.f32 (!%p11306_p12), %v14864_v12, %v9786_v9  ;;  %v9863_v22 = vadd.f32 (!%p11306_p12), %v14862_v11, %v9787_v10  ;;  %v9864_v23 = vadd.f32 (!%p11306_p12), %v14864_v12, %v9788_v13  ;;  %v9804_v9 = vld [vmem:[#allocation2 + $0xa8] sm:$0xff] (!%p11306_p12) }
 0x5ca   : > { %9770 = vst [vmem:[#allocation2 + $0x1b8] sm:$0xff] %v9706_v24  ;;  %v9632_v27 = vpop.f32.mrb[56].mxu0  ;;  %v8090_v29 = vpop.f32.mrb[57].mxu1  ;;  %v9865_v24 = vadd.f32 (!%p11306_p12), %v14862_v11, %v9789_v14 }
 0x5cb   : > { %v11374_v28 = vadd.f32 %v9632_v27, %v8088_v25  ;;  %v9634_v31 = vpop.f32.mrb[57].mxu0  ;;  %v8092_v33 = vpop.f32.mrb[58].mxu1  ;;  %v9866_v25 = vadd.f32 (!%p11306_p12), %v14864_v12, %v9790_v15  ;;  %v9923_v27 = vmul.f32 (!%p11306_p12), 0.1, %v9859_v17 }
 0x5cc   : > { %v11375_v32 = vadd.f32 %v9634_v31, %v8090_v29  ;;  %v9636_v35 = vpop.f32.mrb[58].mxu0  ;;  %v8094_v38 = vpop.f32.mrb[59].mxu1  ;;  %v9925_v29 = vmul.f32 (!%p11306_p12), 0.1, %v9861_v19  ;;  %v9926_v31 = vmul.f32 (!%p11306_p12), 0.1, %v9862_v20 }
 0x5cd   : > { %v9707_v36 = vadd.f32 %v11374_v28, %v411_v26  ;;  %v11376_v37 = vadd.f32 %v9636_v35, %v8092_v33  ;;  %v9638_v40 = vpop.f32.mrb[59].mxu0  ;;  %v9793_v26 = vld [vmem:[#allocation2 + $0x50] sm:$0xff] (!%p11306_p12)  ;;  %v9924_v28 = vmul.f32 (!%p11306_p12), 0.1, %v9860_v18  ;;  %v9928_v33 = vmul.f32 (!%p11306_p12), 0.1, %v9864_v23 }
 0x5ce   : > { %v9708_v41 = vadd.f32 %v11375_v32, %v412_v30  ;;  %v11377_v42 = vadd.f32 %v9638_v40, %v8094_v38  ;;  %v9867_v30 = vadd.f32 (!%p11306_p12), %v14862_v11, %v9791_v16  ;;  %v9927_v32 = vmul.f32 (!%p11306_p12), 0.1, %v9863_v22  ;;  %v9795_v40 = vld [vmem:[#allocation2 + $0x60] sm:$0xff] (!%p11306_p12)  ;;  %v9805_v16 = vld [vmem:[#allocation2 + $0xb0] sm:$0xff] (!%p11306_p12) }
 0x5cf   : > { %9771 = vst [vmem:[#allocation2 + $0x1c0] sm:$0xff] %v9707_v36  ;;  %v9709_v43 = vadd.f32 %v11376_v37, %v413_v34  ;;  %v9868_v34 = vadd.f32 (!%p11306_p12), %v14864_v12, %v9792_v21  ;;  %v9987_v35 = vmax.f32 (!%p11306_p12), %v9859_v17, %v9923_v27  ;;  %v9988_v36 = vmax.f32 (!%p11306_p12), %v9860_v18, %v9924_v28  ;;  %v9806_v21 = vld [vmem:[#allocation2 + $0xb8] sm:$0xff] (!%p11306_p12)  ;;  %v9808_v27 = vld [vmem:[#allocation2 + $0xc8] sm:$0xff] (!%p11306_p12) }
 0x5d0   : > { %9772 = vst [vmem:[#allocation2 + $0x1c8] sm:$0xff] %v9708_v41  ;;  %v9710_v44 = vadd.f32 %v11377_v42, %v414_v39  ;;  %v9989_v37 = vmax.f32 (!%p11306_p12), %v9861_v19, %v9925_v29  ;;  %v9929_v38 = vmul.f32 (!%p11306_p12), 0.1, %v9865_v24  ;;  %v9794_v39 = vld [vmem:[#allocation2 + $0x58] sm:$0xff] (!%p11306_p12)  ;;  %v9796_v41 = vld [vmem:[#allocation2 + $0x68] sm:$0xff] (!%p11306_p12)  ;;  %v9990_v42 = vmax.f32 (!%p11306_p12), %v9862_v20, %v9926_v31 }
 0x5d1   : > { %9773 = vst [vmem:[#allocation2 + $0x1d0] sm:$0xff] %v9709_v43  ;;  %v8098_v45 = vpop.f32.mrb[60].mxu1  ;;  %v9991_v43 = vmax.f32 (!%p11306_p12), %v9863_v22, %v9927_v32  ;;  %10051 = vst [vmem:[%s13758_s18] sm:$0xff] (!%p11306_p12), %v9987_v35  ;;  %v9881_v31 = vadd.f32 (!%p11306_p12), %v14862_v11, %v9805_v16  ;;  %v9809_v32 = vld [vmem:[#allocation2 + $0xd0] sm:$0xff] (!%p11306_p12) }
 0x5d2   : > { %9774 = vst [vmem:[#allocation2 + $0x1d8] sm:$0xff] %v9710_v44  ;;  %v9642_v47 = vpop.f32.mrb[60].mxu0  ;;  %v8100_v49 = vpop.f32.mrb[61].mxu1  ;;  %v9992_v44 = vmax.f32 (!%p11306_p12), %v9864_v23, %v9928_v33  ;;  %10052 = vst [vmem:[%s13758_s18 + $0x8] sm:$0xff] (!%p11306_p12), %v9988_v36  ;;  %v9878_v23 = vadd.f32 (!%p11306_p12), %v14864_v12, %v9802_v7  ;;  %v9882_v36 = vadd.f32 (!%p11306_p12), %v14864_v12, %v9806_v21 }
 0x5d3   : > { %v11378_v48 = vadd.f32 %v9642_v47, %v8098_v45  ;;  %v9644_v51 = vpop.f32.mrb[61].mxu0  ;;  %v8102_v53 = vpop.f32.mrb[62].mxu1  ;;  %v9930_v45 = vmul.f32 (!%p11306_p12), 0.1, %v9866_v25  ;;  %10053 = vst [vmem:[%s13758_s18 + $0x10] sm:$0xff] (!%p11306_p12), %v9989_v37  ;;  %v9993_v47 = vmax.f32 (!%p11306_p12), %v9865_v24, %v9929_v38  ;;  %10054 = vst [vmem:[%s13758_s18 + $0x18] sm:$0xff] (!%p11306_p12), %v9990_v42  ;;  %v9879_v24 = vadd.f32 (!%p11306_p12), %v14862_v11, %v9803_v8 }
 0x5d4   : > { %v11379_v52 = vadd.f32 %v9644_v51, %v8100_v49  ;;  %v9646_v55 = vpop.f32.mrb[62].mxu0  ;;  %v8104_v58 = vpop.f32.mrb[63].mxu1  ;;  %9782 = sbr.rel (%p11306_p12) target bundleno = 1540 (0x604), region = 52  ;;  %v9932_v49 = vmul.f32 (!%p11306_p12), 0.1, %v9868_v34  ;;  %v9798_v51 = vld [vmem:[#allocation2 + $0x78] sm:$0xff] (!%p11306_p12) }
 0x5d5   : > { %v9711_v56 = vadd.f32 %v11378_v48, %v415_v46  ;;  %v11380_v57 = vadd.f32 %v9646_v55, %v8102_v53  ;;  %v9648_v60 = vpop.f32.mrb[63].mxu0  ;;  %v9797_v46 = vld [vmem:[#allocation2 + $0x70] sm:$0xff] (!%p11306_p12)  ;;  %v9931_v48 = vmul.f32 (!%p11306_p12), 0.1, %v9867_v30  ;;  %10055 = vst [vmem:[%s13758_s18 + $0x20] sm:$0xff] (!%p11306_p12), %v9991_v43  ;;  %10056 = vst [vmem:[%s13758_s18 + $0x28] sm:$0xff] (!%p11306_p12), %v9992_v44  ;;  %v9870_v53 = vadd.f32 (!%p11306_p12), %v14864_v12, %v9794_v39 }
 0x5d6   : > { %v9712_v61 = vadd.f32 %v11379_v52, %v416_v50  ;;  %v11381_v62 = vadd.f32 %v9648_v60, %v8104_v58  ;;  %v9869_v50 = vadd.f32 (!%p11306_p12), %v14862_v11, %v9793_v26  ;;  %v9994_v52 = vmax.f32 (!%p11306_p12), %v9866_v25, %v9930_v45  ;;  %10057 = vst [vmem:[%s13758_s18 + $0x30] sm:$0xff] (!%p11306_p12), %v9993_v47  ;;  %v9807_v26 = vld [vmem:[#allocation2 + $0xc0] sm:$0xff] (!%p11306_p12)  ;;  %v9812_v43 = vld [vmem:[#allocation2 + $0xe8] sm:$0xff] (!%p11306_p12) }
 0x5d7   : > { %9775 = vst [vmem:[#allocation2 + $0x1e0] sm:$0xff] %v9711_v56  ;;  %v9713_v63 = vadd.f32 %v11380_v57, %v417_v54  ;;  %v9871_v54 = vadd.f32 (!%p11306_p12), %v14862_v11, %v9795_v40  ;;  %v9872_v55 = vadd.f32 (!%p11306_p12), %v14864_v12, %v9796_v41  ;;  %v9799_v56 = vld [vmem:[#allocation2 + $0x80] sm:$0xff] (!%p11306_p12)  ;;  %v9800_v57 = vld [vmem:[#allocation2 + $0x88] sm:$0xff] (!%p11306_p12)  ;;  %v9995_v58 = vmax.f32 (!%p11306_p12), %v9867_v30, %v9931_v48  ;;  %v9810_v41 = vld [vmem:[#allocation2 + $0xd8] sm:$0xff] (!%p11306_p12) }
 0x5d8   : > { %9776 = vst [vmem:[#allocation2 + $0x1e8] sm:$0xff] %v9712_v61  ;;  %v9714_v0 = vadd.f32 %v11381_v62, %v418_v59  ;;  %v9996_v59 = vmax.f32 (!%p11306_p12), %v9868_v34, %v9932_v49  ;;  %v9933_v60 = vmul.f32 (!%p11306_p12), 0.1, %v9869_v50  ;;  %v9873_v61 = vadd.f32 (!%p11306_p12), %v14862_v11, %v9797_v46  ;;  %v9801_v62 = vld [vmem:[#allocation2 + $0x90] sm:$0xff] (!%p11306_p12)  ;;  %10058 = vst [vmem:[%s13758_s18 + $0x38] sm:$0xff] (!%p11306_p12), %v9994_v52  ;;  %v9811_v42 = vld [vmem:[#allocation2 + $0xe0] sm:$0xff] (!%p11306_p12) }
 0x5d9   : > { %9777 = vst [vmem:[#allocation2 + $0x1f0] sm:$0xff] %v9713_v63  ;;  %v9934_v63 = vmul.f32 (!%p11306_p12), 0.1, %v9870_v53  ;;  %v9936_v1 = vmul.f32 (!%p11306_p12), 0.1, %v9872_v55  ;;  %v9874_v2 = vadd.f32 (!%p11306_p12), %v14864_v12, %v9798_v51  ;;  %10059 = vst [vmem:[%s13758_s18 + $0x40] sm:$0xff] (!%p11306_p12), %v9995_v58  ;;  %v9875_v5 = vadd.f32 (!%p11306_p12), %v14862_v11, %v9799_v56 }
 0x5da   : > { %9778 = vst [vmem:[#allocation2 + $0x1f8] sm:$0xff] %v9714_v0  ;;  %v9935_v0 = vmul.f32 (!%p11306_p12), 0.1, %v9871_v54  ;;  %10060 = vst [vmem:[%s13758_s18 + $0x48] sm:$0xff] (!%p11306_p12), %v9996_v59  ;;  %v9997_v3 = vmax.f32 (!%p11306_p12), %v9869_v50, %v9933_v60  ;;  %v9937_v4 = vmul.f32 (!%p11306_p12), 0.1, %v9873_v61  ;;  %v9876_v6 = vadd.f32 (!%p11306_p12), %v14864_v12, %v9800_v57 }
 0x5db   : > { %v9998_v10 = vmax.f32 %v9870_v53, %v9934_v63  ;;  %v10000_v14 = vmax.f32 %v9872_v55, %v9936_v1  ;;  %v9938_v15 = vmul.f32 0.1, %v9874_v2  ;;  %v9939_v18 = vmul.f32 0.1, %v9875_v5  ;;  %v9813_v48 = vld [vmem:[#allocation2 + $0xf0] sm:$0xff]  ;;  %v9814_v53 = vld [vmem:[#allocation2 + $0xf8] sm:$0xff] }
 0x5dc   : > { %v9999_v13 = vmax.f32 %v9871_v54, %v9935_v0  ;;  %10061 = vst [vmem:[%s13758_s18 + $0x50] sm:$0xff] %v9997_v3  ;;  %v10001_v17 = vmax.f32 %v9873_v61, %v9937_v4  ;;  %v9940_v19 = vmul.f32 0.1, %v9876_v6  ;;  %v9877_v20 = vadd.f32 %v14862_v11, %v9801_v62  ;;  %v9815_v58 = vld [vmem:[#allocation2 + $0x100] sm:$0xff]  ;;  %v9816_v59 = vld [vmem:[#allocation2 + $0x108] sm:$0xff]  ;;  %v9817_v0 = vld [vmem:[#allocation2 + $0x110] sm:$0xff] }
 0x5dd   : > { %10062 = vst [vmem:[%s13758_s18 + $0x58] sm:$0xff] %v9998_v10  ;;  %10064 = vst [vmem:[%s13758_s18 + $0x68] sm:$0xff] %v10000_v14  ;;  %v10002_v22 = vmax.f32 %v9874_v2, %v9938_v15  ;;  %v9880_v25 = vadd.f32 %v14864_v12, %v9804_v9  ;;  %v10003_v28 = vmax.f32 %v9875_v5, %v9939_v18  ;;  %v9942_v33 = vmul.f32 0.1, %v9878_v23  ;;  %v9818_v9 = vld [vmem:[#allocation2 + $0x118] sm:$0xff]  ;;  %v9819_v10 = vld [vmem:[#allocation2 + $0x120] sm:$0xff] }
 0x5de   : > { %10063 = vst [vmem:[%s13758_s18 + $0x60] sm:$0xff] %v9999_v13  ;;  %10065 = vst [vmem:[%s13758_s18 + $0x70] sm:$0xff] %v10001_v17  ;;  %v10004_v29 = vmax.f32 %v9876_v6, %v9940_v19  ;;  %v9941_v30 = vmul.f32 0.1, %v9877_v20  ;;  %v9943_v34 = vmul.f32 0.1, %v9879_v24  ;;  %v9883_v39 = vadd.f32 %v14862_v11, %v9807_v26 }
 0x5df   : > { %10066 = vst [vmem:[%s13758_s18 + $0x78] sm:$0xff] %v10002_v22  ;;  %v9944_v35 = vmul.f32 0.1, %v9880_v25  ;;  %10067 = vst [vmem:[%s13758_s18 + $0x80] sm:$0xff] %v10003_v28  ;;  %v9945_v38 = vmul.f32 0.1, %v9881_v31  ;;  %v9884_v40 = vadd.f32 %v14864_v12, %v9808_v27  ;;  %v10006_v44 = vmax.f32 %v9878_v23, %v9942_v33 }
 0x5e0   : > { %10068 = vst [vmem:[%s13758_s18 + $0x88] sm:$0xff] %v10004_v29  ;;  %v10005_v37 = vmax.f32 %v9877_v20, %v9941_v30  ;;  %v10007_v45 = vmax.f32 %v9879_v24, %v9943_v34  ;;  %v9946_v47 = vmul.f32 0.1, %v9882_v36  ;;  %v9947_v50 = vmul.f32 0.1, %v9883_v39  ;;  %v9820_v13 = vld [vmem:[#allocation2 + $0x128] sm:$0xff] }
 0x5e1   : > { %v10008_v46 = vmax.f32 %v9880_v25, %v9944_v35  ;;  %v10009_v49 = vmax.f32 %v9881_v31, %v9945_v38  ;;  %v9948_v51 = vmul.f32 0.1, %v9884_v40  ;;  %v9885_v52 = vadd.f32 %v14862_v11, %v9809_v32  ;;  %10070 = vst [vmem:[%s13758_s18 + $0x98] sm:$0xff] %v10006_v44  ;;  %v9821_v18 = vld [vmem:[#allocation2 + $0x130] sm:$0xff]  ;;  %v9822_v23 = vld [vmem:[#allocation2 + $0x138] sm:$0xff]  ;;  %v9823_v28 = vld [vmem:[#allocation2 + $0x140] sm:$0xff] }
 0x5e2   : > { %10069 = vst [vmem:[%s13758_s18 + $0x90] sm:$0xff] %v10005_v37  ;;  %10071 = vst [vmem:[%s13758_s18 + $0xa0] sm:$0xff] %v10007_v45  ;;  %v10010_v54 = vmax.f32 %v9882_v36, %v9946_v47  ;;  %v9886_v55 = vadd.f32 %v14864_v12, %v9810_v41  ;;  %v9887_v56 = vadd.f32 %v14862_v11, %v9811_v42  ;;  %v9824_v29 = vld [vmem:[#allocation2 + $0x148] sm:$0xff]  ;;  %v9825_v34 = vld [vmem:[#allocation2 + $0x150] sm:$0xff] }
 0x5e3   : > { %10072 = vst [vmem:[%s13758_s18 + $0xa8] sm:$0xff] %v10008_v46  ;;  %v9888_v57 = vadd.f32 %v14864_v12, %v9812_v43  ;;  %10073 = vst [vmem:[%s13758_s18 + $0xb0] sm:$0xff] %v10009_v49  ;;  %v10011_v60 = vmax.f32 %v9883_v39, %v9947_v50  ;;  %v10012_v61 = vmax.f32 %v9884_v40, %v9948_v51  ;;  %v9949_v62 = vmul.f32 0.1, %v9885_v52  ;;  %v9826_v43 = vld [vmem:[#allocation2 + $0x158] sm:$0xff]  ;;  %v9827_v44 = vld [vmem:[#allocation2 + $0x160] sm:$0xff] }
 0x5e4   : > { %v9889_v63 = vadd.f32 %v14862_v11, %v9813_v48  ;;  %10074 = vst [vmem:[%s13758_s18 + $0xb8] sm:$0xff] %v10010_v54  ;;  %v9950_v1 = vmul.f32 0.1, %v9886_v55  ;;  %v9951_v2 = vmul.f32 0.1, %v9887_v56  ;;  %v9890_v4 = vadd.f32 %v14864_v12, %v9814_v53  ;;  %v9828_v45 = vld [vmem:[#allocation2 + $0x168] sm:$0xff] }
 0x5e5   : > { %v9952_v3 = vmul.f32 0.1, %v9888_v57  ;;  %10075 = vst [vmem:[%s13758_s18 + $0xc0] sm:$0xff] %v10011_v60  ;;  %10076 = vst [vmem:[%s13758_s18 + $0xc8] sm:$0xff] %v10012_v61  ;;  %v10013_v5 = vmax.f32 %v9885_v52, %v9949_v62  ;;  %v9891_v7 = vadd.f32 %v14862_v11, %v9815_v58  ;;  %v9892_v8 = vadd.f32 %v14864_v12, %v9816_v59  ;;  %v9829_v50 = vld [vmem:[#allocation2 + $0x170] sm:$0xff]  ;;  %v9831_v60 = vld [vmem:[#allocation2 + $0x180] sm:$0xff] }
 0x5e6   : > { %v9953_v6 = vmul.f32 0.1, %v9889_v63  ;;  %v10014_v14 = vmax.f32 %v9886_v55, %v9950_v1  ;;  %v10015_v15 = vmax.f32 %v9887_v56, %v9951_v2  ;;  %v9954_v17 = vmul.f32 0.1, %v9890_v4  ;;  %v9830_v55 = vld [vmem:[#allocation2 + $0x178] sm:$0xff]  ;;  %v9832_v61 = vld [vmem:[#allocation2 + $0x188] sm:$0xff] }
 0x5e7   : > { %v10016_v16 = vmax.f32 %v9888_v57, %v9952_v3  ;;  %10077 = vst [vmem:[%s13758_s18 + $0xd0] sm:$0xff] %v10013_v5  ;;  %v9955_v20 = vmul.f32 0.1, %v9891_v7  ;;  %v9956_v21 = vmul.f32 0.1, %v9892_v8  ;;  %v9893_v22 = vadd.f32 %v14862_v11, %v9817_v0  ;;  %v9833_v2 = vld [vmem:[#allocation2 + $0x190] sm:$0xff] }
 0x5e8   : > { %v10017_v19 = vmax.f32 %v9889_v63, %v9953_v6  ;;  %10078 = vst [vmem:[%s13758_s18 + $0xd8] sm:$0xff] %v10014_v14  ;;  %10079 = vst [vmem:[%s13758_s18 + $0xe0] sm:$0xff] %v10015_v15  ;;  %v10018_v24 = vmax.f32 %v9890_v4, %v9954_v17  ;;  %v9894_v25 = vadd.f32 %v14864_v12, %v9818_v9  ;;  %v9835_v14 = vld [vmem:[#allocation2 + $0x1a0] sm:$0xff]  ;;  %v9836_v15 = vld [vmem:[#allocation2 + $0x1a8] sm:$0xff] }
 0x5e9   : > { %10080 = vst [vmem:[%s13758_s18 + $0xe8] sm:$0xff] %v10016_v16  ;;  %v9895_v26 = vadd.f32 %v14862_v11, %v9819_v10  ;;  %v9896_v27 = vadd.f32 %v14864_v12, %v9820_v13  ;;  %v10019_v30 = vmax.f32 %v9891_v7, %v9955_v20  ;;  %v10020_v31 = vmax.f32 %v9892_v8, %v9956_v21  ;;  %v9834_v13 = vld [vmem:[#allocation2 + $0x198] sm:$0xff]  ;;  %v9837_v20 = vld [vmem:[#allocation2 + $0x1b0] sm:$0xff] }
 0x5ea   : > { %10081 = vst [vmem:[%s13758_s18 + $0xf0] sm:$0xff] %v10017_v19  ;;  %v9957_v32 = vmul.f32 0.1, %v9893_v22  ;;  %v9897_v33 = vadd.f32 %v14862_v11, %v9821_v18  ;;  %10082 = vst [vmem:[%s13758_s18 + $0xf8] sm:$0xff] %v10018_v24  ;;  %v9958_v35 = vmul.f32 0.1, %v9894_v25  ;;  %v9898_v38 = vadd.f32 %v14864_v12, %v9822_v23 }
 0x5eb   : > { %v9959_v36 = vmul.f32 0.1, %v9895_v26  ;;  %v9960_v37 = vmul.f32 0.1, %v9896_v27  ;;  %10083 = vst [vmem:[%s13758_s18 + $0x100] sm:$0xff] %v10019_v30  ;;  %10084 = vst [vmem:[%s13758_s18 + $0x108] sm:$0xff] %v10020_v31  ;;  %v9899_v41 = vadd.f32 %v14862_v11, %v9823_v28  ;;  %v9900_v42 = vadd.f32 %v14864_v12, %v9824_v29 }
 0x5ec   : > { %v10021_v39 = vmax.f32 %v9893_v22, %v9957_v32  ;;  %v9961_v40 = vmul.f32 0.1, %v9897_v33  ;;  %v10022_v46 = vmax.f32 %v9894_v25, %v9958_v35  ;;  %v9962_v49 = vmul.f32 0.1, %v9898_v38  ;;  %v9838_v25 = vld [vmem:[#allocation2 + $0x1b8] sm:$0xff]  ;;  %v9839_v30 = vld [vmem:[#allocation2 + $0x1c0] sm:$0xff] }
 0x5ed   : > { %v10023_v47 = vmax.f32 %v9895_v26, %v9959_v36  ;;  %v10024_v48 = vmax.f32 %v9896_v27, %v9960_v37  ;;  %v9963_v52 = vmul.f32 0.1, %v9899_v41  ;;  %v9964_v53 = vmul.f32 0.1, %v9900_v42  ;;  %v9840_v31 = vld [vmem:[#allocation2 + $0x1c8] sm:$0xff]  ;;  %v9841_v36 = vld [vmem:[#allocation2 + $0x1d0] sm:$0xff] }
 0x5ee   : > { %10085 = vst [vmem:[%s13758_s18 + $0x110] sm:$0xff] %v10021_v39  ;;  %v10025_v51 = vmax.f32 %v9897_v33, %v9961_v40  ;;  %v9901_v54 = vadd.f32 %v14862_v11, %v9825_v34  ;;  %10086 = vst [vmem:[%s13758_s18 + $0x118] sm:$0xff] %v10022_v46  ;;  %v10026_v56 = vmax.f32 %v9898_v38, %v9962_v49  ;;  %v9843_v46 = vld [vmem:[#allocation2 + $0x1e0] sm:$0xff] }
 0x5ef   : > { %10087 = vst [vmem:[%s13758_s18 + $0x120] sm:$0xff] %v10023_v47  ;;  %10088 = vst [vmem:[%s13758_s18 + $0x128] sm:$0xff] %v10024_v48  ;;  %v9902_v57 = vadd.f32 %v14864_v12, %v9826_v43  ;;  %v9903_v58 = vadd.f32 %v14862_v11, %v9827_v44  ;;  %v9904_v59 = vadd.f32 %v14864_v12, %v9828_v45  ;;  %v9842_v45 = vld [vmem:[#allocation2 + $0x1d8] sm:$0xff]  ;;  %v9844_v47 = vld [vmem:[#allocation2 + $0x1e8] sm:$0xff] }
 0x5f0   : > { %10089 = vst [vmem:[%s13758_s18 + $0x130] sm:$0xff] %v10025_v51  ;;  %v10027_v62 = vmax.f32 %v9899_v41, %v9963_v52  ;;  %v10028_v63 = vmax.f32 %v9900_v42, %v9964_v53  ;;  %v9965_v0 = vmul.f32 0.1, %v9901_v54  ;;  %v9905_v1 = vadd.f32 %v14862_v11, %v9829_v50  ;;  %10090 = vst [vmem:[%s13758_s18 + $0x138] sm:$0xff] %v10026_v56  ;;  %v9845_v52 = vld [vmem:[#allocation2 + $0x1f0] sm:$0xff] }
 0x5f1   : > { %v9966_v3 = vmul.f32 0.1, %v9902_v57  ;;  %v9967_v4 = vmul.f32 0.1, %v9903_v58  ;;  %v9968_v5 = vmul.f32 0.1, %v9904_v59  ;;  %v9906_v6 = vadd.f32 %v14864_v12, %v9830_v55 }
 0x5f2   : > { %10091 = vst [vmem:[%s13758_s18 + $0x140] sm:$0xff] %v10027_v62  ;;  %10092 = vst [vmem:[%s13758_s18 + $0x148] sm:$0xff] %v10028_v63  ;;  %v10029_v7 = vmax.f32 %v9901_v54, %v9965_v0  ;;  %v9969_v8 = vmul.f32 0.1, %v9905_v1  ;;  %v9907_v9 = vadd.f32 %v14862_v11, %v9831_v60  ;;  %v9908_v10 = vadd.f32 %v14864_v12, %v9832_v61 }
 0x5f3   : > { %v10030_v16 = vmax.f32 %v9902_v57, %v9966_v3  ;;  %v10031_v17 = vmax.f32 %v9903_v58, %v9967_v4  ;;  %v10032_v18 = vmax.f32 %v9904_v59, %v9968_v5  ;;  %v9970_v19 = vmul.f32 0.1, %v9906_v6  ;;  %v9846_v57 = vld [vmem:[#allocation2 + $0x1f8] sm:$0xff] }
 0x5f4   : > { %10093 = vst [vmem:[%s13758_s18 + $0x150] sm:$0xff] %v10029_v7  ;;  %v10033_v21 = vmax.f32 %v9905_v1, %v9969_v8  ;;  %v9971_v22 = vmul.f32 0.1, %v9907_v9  ;;  %v9972_v23 = vmul.f32 0.1, %v9908_v10  ;;  %v9909_v24 = vadd.f32 %v14862_v11, %v9833_v2 }
 0x5f5   : > { %10094 = vst [vmem:[%s13758_s18 + $0x158] sm:$0xff] %v10030_v16  ;;  %10095 = vst [vmem:[%s13758_s18 + $0x160] sm:$0xff] %v10031_v17  ;;  %v10034_v26 = vmax.f32 %v9906_v6, %v9970_v19  ;;  %v9910_v27 = vadd.f32 %v14864_v12, %v9834_v13  ;;  %v9911_v28 = vadd.f32 %v14862_v11, %v9835_v14 }
 0x5f6   : > { %10096 = vst [vmem:[%s13758_s18 + $0x168] sm:$0xff] %v10032_v18  ;;  %v9912_v29 = vadd.f32 %v14864_v12, %v9836_v15  ;;  %10097 = vst [vmem:[%s13758_s18 + $0x170] sm:$0xff] %v10033_v21  ;;  %v10035_v32 = vmax.f32 %v9907_v9, %v9971_v22  ;;  %v10036_v33 = vmax.f32 %v9908_v10, %v9972_v23  ;;  %v9973_v34 = vmul.f32 0.1, %v9909_v24 }
 0x5f7   : > { %v9913_v35 = vadd.f32 %v14862_v11, %v9837_v20  ;;  %10098 = vst [vmem:[%s13758_s18 + $0x178] sm:$0xff] %v10034_v26  ;;  %v9974_v37 = vmul.f32 0.1, %v9910_v27  ;;  %v9975_v38 = vmul.f32 0.1, %v9911_v28  ;;  %v9914_v40 = vadd.f32 %v14864_v12, %v9838_v25 }
 0x5f8   : > { %v9976_v39 = vmul.f32 0.1, %v9912_v29  ;;  %10099 = vst [vmem:[%s13758_s18 + $0x180] sm:$0xff] %v10035_v32  ;;  %10100 = vst [vmem:[%s13758_s18 + $0x188] sm:$0xff] %v10036_v33  ;;  %v10037_v41 = vmax.f32 %v9909_v24, %v9973_v34  ;;  %v9915_v43 = vadd.f32 %v14862_v11, %v9839_v30  ;;  %v9916_v44 = vadd.f32 %v14864_v12, %v9840_v31 }
 0x5f9   : > { %v9977_v42 = vmul.f32 0.1, %v9913_v35  ;;  %v10038_v48 = vmax.f32 %v9910_v27, %v9974_v37  ;;  %v10039_v49 = vmax.f32 %v9911_v28, %v9975_v38  ;;  %v9978_v51 = vmul.f32 0.1, %v9914_v40 }
 0x5fa   : > { %v10040_v50 = vmax.f32 %v9912_v29, %v9976_v39  ;;  %10101 = vst [vmem:[%s13758_s18 + $0x190] sm:$0xff] %v10037_v41  ;;  %v9979_v54 = vmul.f32 0.1, %v9915_v43  ;;  %v9980_v55 = vmul.f32 0.1, %v9916_v44  ;;  %v9917_v56 = vadd.f32 %v14862_v11, %v9841_v36 }
 0x5fb   : > { %v10041_v53 = vmax.f32 %v9913_v35, %v9977_v42  ;;  %10102 = vst [vmem:[%s13758_s18 + $0x198] sm:$0xff] %v10038_v48  ;;  %10103 = vst [vmem:[%s13758_s18 + $0x1a0] sm:$0xff] %v10039_v49  ;;  %v10042_v58 = vmax.f32 %v9914_v40, %v9978_v51  ;;  %v9918_v59 = vadd.f32 %v14864_v12, %v9842_v45 }
 0x5fc   : > { %10104 = vst [vmem:[%s13758_s18 + $0x1a8] sm:$0xff] %v10040_v50  ;;  %v9919_v60 = vadd.f32 %v14862_v11, %v9843_v46  ;;  %v9920_v61 = vadd.f32 %v14864_v12, %v9844_v47  ;;  %v10043_v62 = vmax.f32 %v9915_v43, %v9979_v54  ;;  %v10044_v63 = vmax.f32 %v9916_v44, %v9980_v55 }
 0x5fd   : > { %10105 = vst [vmem:[%s13758_s18 + $0x1b0] sm:$0xff] %v10041_v53  ;;  %v9981_v0 = vmul.f32 0.1, %v9917_v56  ;;  %v9921_v1 = vadd.f32 %v14862_v11, %v9845_v52  ;;  %10106 = vst [vmem:[%s13758_s18 + $0x1b8] sm:$0xff] %v10042_v58  ;;  %v9982_v2 = vmul.f32 0.1, %v9918_v59  ;;  %v9922_v5 = vadd.f32 %v14864_v12, %v9846_v57 }
 0x5fe   : > { %v9983_v3 = vmul.f32 0.1, %v9919_v60  ;;  %v9984_v4 = vmul.f32 0.1, %v9920_v61  ;;  %10107 = vst [vmem:[%s13758_s18 + $0x1c0] sm:$0xff] %v10043_v62  ;;  %10108 = vst [vmem:[%s13758_s18 + $0x1c8] sm:$0xff] %v10044_v63 }
 0x5ff   : > { %v10045_v6 = vmax.f32 %v9917_v56, %v9981_v0  ;;  %v9985_v7 = vmul.f32 0.1, %v9921_v1  ;;  %v10046_v8 = vmax.f32 %v9918_v59, %v9982_v2  ;;  %v9986_v13 = vmul.f32 0.1, %v9922_v5 }
 0x600   : > { %v10047_v9 = vmax.f32 %v9919_v60, %v9983_v3  ;;  %v10048_v10 = vmax.f32 %v9920_v61, %v9984_v4 }
 0x601   : > { %10109 = vst [vmem:[%s13758_s18 + $0x1d0] sm:$0xff] %v10045_v6  ;;  %v10049_v11 = vmax.f32 %v9921_v1, %v9985_v7  ;;  %10110 = vst [vmem:[%s13758_s18 + $0x1d8] sm:$0xff] %v10046_v8  ;;  %v10050_v14 = vmax.f32 %v9922_v5, %v9986_v13 }
 0x602   : > { %10111 = vst [vmem:[%s13758_s18 + $0x1e0] sm:$0xff] %v10047_v9  ;;  %10112 = vst [vmem:[%s13758_s18 + $0x1e8] sm:$0xff] %v10048_v10 }
 0x603   : > { %10113 = vst [vmem:[%s13758_s18 + $0x1f0] sm:$0xff] %v10049_v11  ;;  %10114 = vst [vmem:[%s13758_s18 + $0x1f8] sm:$0xff] %v10050_v14 }
 0x604 PF: > { %s15149_s4 = sld [smem:[#allocation18_spill]]  ;;  %s15151_s21 = sld [smem:[#allocation22_spill]] }
 0x605   : > { %s15152_s16 = sld [smem:[#allocation26_spill]]  ;;  %s10132_s30 = sshll.u32 %s13758_s18, 4  ;;  %s15001_s30 = int_to_ptr.vmem [resolvable:$true] %s10132_s30 }
 0x606   : > { %s15005_s10 = scalar_lea.sflag [#allocation5], %s277_s26  ;;  %s13283_s6 = scalar_lea.vmem %s15001_s30, 8192 }
 0x607   : > { %p13284_p0 = scmp.ne.s32.totalorder %s15001_s30, %s13283_s6  ;;  %s13447_s27 = smov [#allocation9]  }
 0x608   : > { %s13287_s29 = sshll.u32 %s13447_s27, 4  ;;  %s13288_s29 = int_to_ptr.vmem [resolvable:$false] %s13287_s29 }
 0x609   : > { %s13289_s9 = scalar_lea.vmem %s13288_s29, 16384  ;;  %p13290_p8 = scmp.lt.s32.totalorder %s15001_s30, %s13288_s29 }
 0x60a   : > { %s11317_s5 = sshll.u32 %s15149_s4, 13  ;;  %p15154_p4 = scmp.ne.s32.totalorder %s15151_s21, 0 }
 0x60b   : > { %s15153_s8 = smov %s15152_s16  ;;  %s14998_s13 = scalar_lea.hbm %s15152_s16, %s11317_s5 }
 0x60c   : > { %p13285_p10 = pnand %p13284_p0, %p15154_p4  ;;  %p13291_p6 = scmp.lt.s32.totalorder %s13289_s9, %s13283_s6 }
 0x60e   : > { %p13286_p13 = pneg %p13285_p10  ;;  %p13292_p2 = por %p13291_p6, %p13290_p8 }
 0x610   : > { %p13293_p1 = pnand %p13292_p2, %p13286_p13 }
 0x612   : > { %13296 = shalt.err (!%p13293_p1)
}
 0x613   : > { %s13297_s26 = scalar_lea.hbm %s14998_s13, 8192  ;;  %s13301_s4 = scalar_lea.hbm %s15153_s8, 16384 }
 0x614   : > { %p13298_p9 = scmp.ne.s32.totalorder %s14998_s13, %s13297_s26  ;;  %p13302_p7 = scmp.lt.u32.totalorder %s14998_s13, %s15153_s8 }
 0x615   : > { %p13303_p11 = scmp.lt.u32.totalorder %s13301_s4, %s13297_s26  ;;  %p13305_p0 = scmp.lt.u32.totalorder %s13297_s26, %s14998_s13 }
 0x616   : > { %p13299_p3 = pnand %p13298_p9, %p15154_p4 }
 0x617   : > { %p13304_p12 = por %p13303_p11, %p13302_p7 }
 0x618   : > { %p13300_p5 = pneg %p13299_p3 }
 0x619   : > { %p13306_p10 = por %p13305_p0, %p13304_p12 }
 0x61b   : > { %p13307_p13 = pnand %p13306_p10, %p13300_p5 }
 0x61d   : > { %13310 = shalt.err (!%p13307_p13)
}
 0x61e   : > { %s13448_s28 = smov 256   ;;  %s13449_s22 = smov 16  }
 0x61f   : > { %12286 = dma.vmem_to_hbm [thread:$0]  (%p15154_p4), %s15001_s30, 8192, %s14998_s13, %s15005_s10, %s13448_s28, %s13448_s28, %s13449_s22  }
 0x620 PF: > { %s15155_s16 = sld [smem:[#allocation14_spill]]  ;;  %s15156_s6 = sld [smem:[#allocation23_spill]] }
 0x621   : > { %p12306_p8 = scmp.ge.s32.totalorder %s13437_s25, 2 }
 0x626   : > { %s10147_s27 = sand.u32 1, %s15155_s16   ;;  %p15157_p6 = scmp.ne.s32.totalorder %s15156_s6, 0 }
 0x627   : > { %s10148_s29 = scalar_lea.sflag [#allocation5], %s10147_s27 }
 0x628   : > { %p12300_p2 = pnand %p12306_p8, %p15157_p6 }
 0x62a   : > { %13380 = dma.done.wait (!%p12300_p2), %s10148_s29, 8192  }
 0x62b   : > { %13382 = vsyncadd (!%p12300_p2), %s10148_s29, 4294959104  ;;  %s22_s25 = sadd.s32 1, %s13437_s25   ;;  %s15159_s12 = sld [smem:[#allocation15_spill]] }
 0x62c   : > { %p15034_p1 = scmp.ge.s32.totalorder %s22_s25, 6   ;;  %s15160_s15 = sld [smem:[#allocation16_spill]] }
 0x62d   : > { %s15161_s30 = sld [smem:[#allocation24_spill]]  ;;  %s15162_s13 = smov %s13393_s14 }
 0x62e   : > { %s15163_s14 = smov %s13649_s7  ;;  %s15164_s16 = smov %s13405_s17 }
 0x62f   : > { %s15165_s17 = smov %s13642_s2  ;;  %s15166_s18 = smov %s13413_s19 }
 0x630   : > { %s15167_s19 = smov %s13417_s20  ;;  %s15168_s20 = smov %s13654_s11 }
 0x631   : > { %s15169_s21 = smov %s13429_s23  ;;  %s15170_s22 = smov %s13433_s24 }
 0x632   : > { %s15172_s24 = smov %s15178_s3  ;;  %21 = sbr.rel (!%p15034_p1) target bundleno = 15 (0xf), region = 103 }
 0x633   : > { %s15171_s23 = smov %s15161_s30 }
 0x639   :  { %10153 = vsyncpa [#allocation4], 1 }
 0x63a   :  { %10155 = vsyncpa [#allocation4 + $0x1], 1 }
 0x63b   :  { %10156 = vsyncpa [#allocation7], 1 }
 0x63c   :  { %10158 = vsyncpa [#allocation7 + $0x1], 1 }
 0x63d   :  { %10159 = vsyncpa [#allocation5], 1 }
 0x63e   :  { %10161 = vsyncpa [#allocation5 + $0x1], 1 }

</bundles_post_ra>
